<compile_context>
chip_gen: v6e
topology: v6e:2x2x1
jax: 0.10.0
libtpu: 0.0.40
codegen_flags: <defaults>
</compile_context>

<pallas_src>
from functools import lru_cache

import numpy as np
import jax
import jax.numpy as jnp
from jax import lax
from jax.experimental import pallas as pl
from jax.experimental.pallas import tpu as pltpu  # noqa: F401  (TPU backend module)


_K1_PAD = 16  # block-1 merged K (9*Cin = 9) padded to one bf16 sublane tile, NOT to 128


# -----------------------------------------------------------------------------
# Fused 4-block kernel: everything stays in VMEM, all data movement is matmuls.
# -----------------------------------------------------------------------------
def protonet_fused_kernel(p1_ref, w1_ref, b1_ref, pool1_ref,
                          w2_ref, b2_ref, sh2_ref, pool2_ref,
                          w3_ref, b3_ref, sh3_ref, pool3_ref,
                          w4_ref, b4_ref, sh4_ref, pool4_ref,
                          out_ref):
    def conv_bn_relu_pool(patches, w_ref, b_ref, pool_ref):
        # patches: (S, K) bf16 merged-K im2col for this block
        # w_ref:   (K, 128) bf16 conv weights (BN scale folded), b_ref: (1, 128) f32 folded bias
        # pool_ref:(4, So, S) bf16 0/1 maxpool-parity selection matrices
        acc = jnp.dot(patches, w_ref[...], preferred_element_type=jnp.float32)
        y = jnp.maximum(acc + b_ref[...], 0.0).astype(jnp.bfloat16)   # folded BN + ReLU
        pooled = jnp.dot(pool_ref[0], y, preferred_element_type=jnp.float32)
        for q in range(1, 4):                                         # 2x2 max-pool
            pooled = jnp.maximum(
                pooled, jnp.dot(pool_ref[q], y, preferred_element_type=jnp.float32))
        return pooled.astype(jnp.bfloat16)                            # (So, 128)

    # Block 1 (Cin=1): patches pre-gathered host-side (tiny), merged K padded to 16.
    act = conv_bn_relu_pool(p1_ref[...], w1_ref, b1_ref, pool1_ref)

    # Blocks 2-4: build the 9-tap merged-K patches in-kernel via exact 0/1 shift matmuls.
    for w_ref, b_ref, sh_ref, pool_ref in (
        (w2_ref, b2_ref, sh2_ref, pool2_ref),
        (w3_ref, b3_ref, sh3_ref, pool3_ref),
        (w4_ref, b4_ref, sh4_ref, pool4_ref),
    ):
        taps = [
            jnp.dot(sh_ref[d], act, preferred_element_type=jnp.float32).astype(jnp.bfloat16)
            for d in range(9)
        ]
        patches = jnp.concatenate(taps, axis=-1)        # (S, 9*128) merged-K, lane-aligned
        act = conv_bn_relu_pool(patches, w_ref, b_ref, pool_ref)

    out_ref[...] = act.astype(jnp.float32)              # (N*Hf*Wf, 128)


# -----------------------------------------------------------------------------
# Host-side (trace-time) constant builders.
# -----------------------------------------------------------------------------
@lru_cache(maxsize=None)
def _structure_constants(N, H, W):
    """0/1 selection matrices encoding the 3x3 tap shifts (blocks 2-4) and 2x2 maxpool
    gathers (all blocks) for the 4-block chain starting at spatial (H, W)."""
    pools, shifts = [], []
    h, w = H, W
    for b in range(4):
        S = N * h * w
        n_i, y_i, x_i = np.meshgrid(np.arange(N), np.arange(h), np.arange(w), indexing="ij")
        m = ((n_i * h + y_i) * w + x_i).ravel()

        if b > 0:  # block-1 taps are gathered host-side (Cin=1), no shift matrices needed
            sh = np.zeros((9, S, S), np.float32)
            offs = [(ky - 1, kx - 1) for ky in range(3) for kx in range(3)]
            for d, (dy, dx) in enumerate(offs):
                yy, xx = y_i + dy, x_i + dx
                valid = ((yy >= 0) & (yy < h) & (xx >= 0) & (xx < w)).ravel()
                src = ((n_i * h + np.clip(yy, 0, h - 1)) * w + np.clip(xx, 0, w - 1)).ravel()
                sh[d, m[valid], src[valid]] = 1.0       # zero rows == conv zero padding
            shifts.append(sh)

        ho, wo = h // 2, w // 2
        So = N * ho * wo
        pool = np.zeros((4, So, S), np.float32)
        n_o, oy, ox = np.meshgrid(np.arange(N), np.arange(ho), np.arange(wo), indexing="ij")
        i_o = ((n_o * ho + oy) * wo + ox).ravel()
        for q, (py, px) in enumerate([(py, px) for py in range(2) for px in range(2)]):
            j = ((n_o * h + 2 * oy + py) * w + 2 * ox + px).ravel()
            pool[q, i_o, j] = 1.0
        pools.append(pool)
        h, w = ho, wo
    return pools, shifts


def _block1_patches(x):
    """x: (N, H, W) f32 -> (N*H*W, 16) bf16 im2col patches for the 1-channel first conv."""
    N, H, W = x.shape
    xpad = jnp.pad(x, ((0, 0), (1, 1), (1, 1)))
    taps = [xpad[:, ky:ky + H, kx:kx + W] for ky in range(3) for kx in range(3)]
    p = jnp.stack(taps, axis=-1).reshape(N * H * W, 9)
    p = jnp.pad(p, ((0, 0), (0, _K1_PAD - 9)))
    return p.astype(jnp.bfloat16)


# -----------------------------------------------------------------------------
# Forward pass, params, reference.
# -----------------------------------------------------------------------------
def protonet_forward(x, params):
    """x: (num_samples, seq_len, mel_bins) == PyTorch x.view(-1, 1, seq, mel) in NCHW."""
    N, H, W = x.shape
    assert H % 16 == 0 and W % 16 == 0, "spatial dims must survive 4 exact 2x2 maxpools"
    assert N * H * W <= 2048, "fused VMEM-resident path only; see TODO for larger inputs"

    pools_np, shifts_np = _structure_constants(N, H, W)
    pools = [jnp.asarray(p, dtype=jnp.bfloat16) for p in pools_np]
    shifts = [jnp.asarray(s, dtype=jnp.bfloat16) for s in shifts_np]

    # Merge taps into K, cast weights to bf16 (BN scale already folded in); biases stay f32.
    ws, bs = [], []
    for i, (w, b) in enumerate(params):
        kh, kw, cin, cout = w.shape
        wk = w.reshape(kh * kw * cin, cout)
        if i == 0:
            wk = jnp.pad(wk, ((0, _K1_PAD - kh * kw * cin), (0, 0)))
        ws.append(wk.astype(jnp.bfloat16))
        bs.append(b.reshape(1, cout).astype(jnp.float32))

    p1 = _block1_patches(x)

    Hf, Wf = H // 16, W // 16
    out = pl.pallas_call(
        protonet_fused_kernel,
        out_shape=jax.ShapeDtypeStruct((N * Hf * Wf, 128), jnp.float32),
    )(p1, ws[0], bs[0], pools[0],
      ws[1], bs[1], shifts[0], pools[1],
      ws[2], bs[2], shifts[1], pools[2],
      ws[3], bs[3], shifts[2], pools[3])

    # flatten exactly like PyTorch's x.view(x.size(0), -1) on an NCHW tensor
    out = out.reshape(N, Hf, Wf, 128)
    return jnp.transpose(out, (0, 3, 1, 2)).reshape(N, -1)


def init_params(key):
    """Deterministic synthetic params for 4 conv blocks; Conv2d bias + eval-mode BN folded
    (scale into the weights, everything else into a per-channel bias)."""
    eps = 1e-5
    cins = [1, 128, 128, 128]
    params = []
    for cin in cins:
        key, k1, k2, k3, k4, k5, k6 = jax.random.split(key, 7)
        w = jax.random.normal(k1, (3, 3, cin, 128), jnp.float32) / np.sqrt(9.0 * cin)
        conv_b = 0.05 * jax.random.normal(k2, (128,), jnp.float32)
        gamma = 1.0 + 0.1 * jax.random.normal(k3, (128,), jnp.float32)
        beta = 0.1 * jax.random.normal(k4, (128,), jnp.float32)
        r_mean = 0.05 * jax.random.normal(k5, (128,), jnp.float32)
        r_var = 1.0 + 0.2 * jax.random.uniform(k6, (128,), jnp.float32)
        scale = gamma / jnp.sqrt(r_var + eps)
        w_folded = w * scale                              # fold BN scale into the weights
        bias = beta + (conv_b - r_mean) * scale           # folded bias
        params.append((w_folded, bias))
    return params


def protonet_reference(x, params):
    """Pure-JAX (XLA, f32) reference for numerical validation."""
    N, H, W = x.shape
    h = x.reshape(N, H, W, 1).astype(jnp.float32)
    for w, b in params:
        y = lax.conv_general_dilated(h, w, (1, 1), "SAME",
                                     dimension_numbers=("NHWC", "HWIO", "NHWC"))
        y = jnp.maximum(y + b, 0.0)
        h = lax.reduce_window(y, -jnp.inf, lax.max,
                              (1, 2, 2, 1), (1, 2, 2, 1), "VALID")
    return jnp.transpose(h, (0, 3, 1, 2)).reshape(N, -1)


if __name__ == "__main__":
    key = jax.random.PRNGKey(0)
    kx, kp = jax.random.split(key)
    # (num_samples=2, seq_len=16, mel_bins=16): after 4 maxpools spatial is 1x1 -> output (2, 128)
    x = jax.random.normal(kx, (2, 16, 16), jnp.float32)
    params = init_params(kp)

    fwd = jax.jit(protonet_forward)
    out = jax.block_until_ready(fwd(x, params))
    assert out.shape == (2, 128), out.shape

    ref = jax.block_until_ready(protonet_reference(x, params))
    # bf16 matmul operands (f32 accumulation) vs f32 reference -> loosened tolerance
    np.testing.assert_allclose(np.asarray(out), np.asarray(ref), rtol=3e-2, atol=3e-2)

    print("KERNEL_OK")
</pallas_src>

<mosaic_0001>
module attributes {stable_mosaic.version = 11 : i64} {
  func.func @protonet_fused_kernel(%arg0: memref<512x16xbf16, #tpu.memory_space<vmem>>, %arg1: memref<16x128xbf16, #tpu.memory_space<vmem>>, %arg2: memref<1x128xf32, #tpu.memory_space<vmem>>, %arg3: memref<4x128x512xbf16, #tpu.memory_space<vmem>>, %arg4: memref<1152x128xbf16, #tpu.memory_space<vmem>>, %arg5: memref<1x128xf32, #tpu.memory_space<vmem>>, %arg6: memref<9x128x128xbf16, #tpu.memory_space<vmem>>, %arg7: memref<4x32x128xbf16, #tpu.memory_space<vmem>>, %arg8: memref<1152x128xbf16, #tpu.memory_space<vmem>>, %arg9: memref<1x128xf32, #tpu.memory_space<vmem>>, %arg10: memref<9x32x32xbf16, #tpu.memory_space<vmem>>, %arg11: memref<4x8x32xbf16, #tpu.memory_space<vmem>>, %arg12: memref<1152x128xbf16, #tpu.memory_space<vmem>>, %arg13: memref<1x128xf32, #tpu.memory_space<vmem>>, %arg14: memref<9x8x8xbf16, #tpu.memory_space<vmem>>, %arg15: memref<4x2x8xbf16, #tpu.memory_space<vmem>>, %arg16: memref<2x128xf32, #tpu.memory_space<vmem>>) attributes {dimension_semantics = [], scalar_prefetch = 0 : i64, scratch_operands = 0 : i64, tpu.core_type = #tpu.core_type<tc>} {
    %c0 = arith.constant 0 : index
    %c0_0 = arith.constant 0 : index
    %0 = vector.load %arg0[%c0, %c0_0] : memref<512x16xbf16, #tpu.memory_space<vmem>>, vector<512x16xbf16>
    %c0_1 = arith.constant 0 : index
    %c0_2 = arith.constant 0 : index
    %1 = vector.load %arg1[%c0_1, %c0_2] : memref<16x128xbf16, #tpu.memory_space<vmem>>, vector<16x128xbf16>
    %cst = arith.constant dense<0.000000e+00> : vector<512x128xf32>
    %2 = tpu.matmul %0, %1, %cst {dimension_numbers = #tpu.dot_dimension_numbers<[1], [0], [0], [1], [0, 0, 1, 1], [], []>} : vector<512x16xbf16>, vector<16x128xbf16>, vector<512x128xf32> -> vector<512x128xf32>
    %c0_3 = arith.constant 0 : index
    %c0_4 = arith.constant 0 : index
    %3 = vector.load %arg2[%c0_3, %c0_4] : memref<1x128xf32, #tpu.memory_space<vmem>>, vector<1x128xf32>
    %4 = vector.broadcast %3 : vector<1x128xf32> to vector<512x128xf32>
    %5 = arith.addf %2, %4 : vector<512x128xf32>
    %cst_5 = arith.constant 0.000000e+00 : f32
    %6 = vector.broadcast %cst_5 : f32 to vector<512x128xf32>
    %7 = arith.maximumf %5, %6 : vector<512x128xf32>
    %8 = arith.truncf %7 : vector<512x128xf32> to vector<512x128xbf16>
    %c0_6 = arith.constant 0 : index
    %c0_7 = arith.constant 0 : index
    %c0_8 = arith.constant 0 : index
    %9 = vector.load %arg3[%c0_6, %c0_7, %c0_8] : memref<4x128x512xbf16, #tpu.memory_space<vmem>>, vector<1x128x512xbf16>
    %10 = vector.shape_cast %9 : vector<1x128x512xbf16> to vector<128x512xbf16>
    %cst_9 = arith.constant dense<0.000000e+00> : vector<128x128xf32>
    %11 = tpu.matmul %10, %8, %cst_9 {dimension_numbers = #tpu.dot_dimension_numbers<[1], [0], [0], [1], [0, 0, 1, 1], [], []>} : vector<128x512xbf16>, vector<512x128xbf16>, vector<128x128xf32> -> vector<128x128xf32>
    %c1 = arith.constant 1 : index
    %c0_10 = arith.constant 0 : index
    %c0_11 = arith.constant 0 : index
    %12 = vector.load %arg3[%c1, %c0_10, %c0_11] : memref<4x128x512xbf16, #tpu.memory_space<vmem>>, vector<1x128x512xbf16>
    %13 = vector.shape_cast %12 : vector<1x128x512xbf16> to vector<128x512xbf16>
    %cst_12 = arith.constant dense<0.000000e+00> : vector<128x128xf32>
    %14 = tpu.matmul %13, %8, %cst_12 {dimension_numbers = #tpu.dot_dimension_numbers<[1], [0], [0], [1], [0, 0, 1, 1], [], []>} : vector<128x512xbf16>, vector<512x128xbf16>, vector<128x128xf32> -> vector<128x128xf32>
    %15 = arith.maximumf %11, %14 : vector<128x128xf32>
    %c2 = arith.constant 2 : index
    %c0_13 = arith.constant 0 : index
    %c0_14 = arith.constant 0 : index
    %16 = vector.load %arg3[%c2, %c0_13, %c0_14] : memref<4x128x512xbf16, #tpu.memory_space<vmem>>, vector<1x128x512xbf16>
    %17 = vector.shape_cast %16 : vector<1x128x512xbf16> to vector<128x512xbf16>
    %cst_15 = arith.constant dense<0.000000e+00> : vector<128x128xf32>
    %18 = tpu.matmul %17, %8, %cst_15 {dimension_numbers = #tpu.dot_dimension_numbers<[1], [0], [0], [1], [0, 0, 1, 1], [], []>} : vector<128x512xbf16>, vector<512x128xbf16>, vector<128x128xf32> -> vector<128x128xf32>
    %19 = arith.maximumf %15, %18 : vector<128x128xf32>
    %c3 = arith.constant 3 : index
    %c0_16 = arith.constant 0 : index
    %c0_17 = arith.constant 0 : index
    %20 = vector.load %arg3[%c3, %c0_16, %c0_17] : memref<4x128x512xbf16, #tpu.memory_space<vmem>>, vector<1x128x512xbf16>
    %21 = vector.shape_cast %20 : vector<1x128x512xbf16> to vector<128x512xbf16>
    %cst_18 = arith.constant dense<0.000000e+00> : vector<128x128xf32>
    %22 = tpu.matmul %21, %8, %cst_18 {dimension_numbers = #tpu.dot_dimension_numbers<[1], [0], [0], [1], [0, 0, 1, 1], [], []>} : vector<128x512xbf16>, vector<512x128xbf16>, vector<128x128xf32> -> vector<128x128xf32>
    %23 = arith.maximumf %19, %22 : vector<128x128xf32>
    %24 = arith.truncf %23 : vector<128x128xf32> to vector<128x128xbf16>
    %c0_19 = arith.constant 0 : index
    %c0_20 = arith.constant 0 : index
    %c0_21 = arith.constant 0 : index
    %25 = vector.load %arg6[%c0_19, %c0_20, %c0_21] : memref<9x128x128xbf16, #tpu.memory_space<vmem>>, vector<1x128x128xbf16>
    %26 = vector.shape_cast %25 : vector<1x128x128xbf16> to vector<128x128xbf16>
    %cst_22 = arith.constant dense<0.000000e+00> : vector<128x128xf32>
    %27 = tpu.matmul %26, %24, %cst_22 {dimension_numbers = #tpu.dot_dimension_numbers<[1], [0], [0], [1], [0, 0, 1, 1], [], []>} : vector<128x128xbf16>, vector<128x128xbf16>, vector<128x128xf32> -> vector<128x128xf32>
    %28 = arith.truncf %27 : vector<128x128xf32> to vector<128x128xbf16>
    %c1_23 = arith.constant 1 : index
    %c0_24 = arith.constant 0 : index
    %c0_25 = arith.constant 0 : index
    %29 = vector.load %arg6[%c1_23, %c0_24, %c0_25] : memref<9x128x128xbf16, #tpu.memory_space<vmem>>, vector<1x128x128xbf16>
    %30 = vector.shape_cast %29 : vector<1x128x128xbf16> to vector<128x128xbf16>
    %cst_26 = arith.constant dense<0.000000e+00> : vector<128x128xf32>
    %31 = tpu.matmul %30, %24, %cst_26 {dimension_numbers = #tpu.dot_dimension_numbers<[1], [0], [0], [1], [0, 0, 1, 1], [], []>} : vector<128x128xbf16>, vector<128x128xbf16>, vector<128x128xf32> -> vector<128x128xf32>
    %32 = arith.truncf %31 : vector<128x128xf32> to vector<128x128xbf16>
    %c2_27 = arith.constant 2 : index
    %c0_28 = arith.constant 0 : index
    %c0_29 = arith.constant 0 : index
    %33 = vector.load %arg6[%c2_27, %c0_28, %c0_29] : memref<9x128x128xbf16, #tpu.memory_space<vmem>>, vector<1x128x128xbf16>
    %34 = vector.shape_cast %33 : vector<1x128x128xbf16> to vector<128x128xbf16>
    %cst_30 = arith.constant dense<0.000000e+00> : vector<128x128xf32>
    %35 = tpu.matmul %34, %24, %cst_30 {dimension_numbers = #tpu.dot_dimension_numbers<[1], [0], [0], [1], [0, 0, 1, 1], [], []>} : vector<128x128xbf16>, vector<128x128xbf16>, vector<128x128xf32> -> vector<128x128xf32>
    %36 = arith.truncf %35 : vector<128x128xf32> to vector<128x128xbf16>
    %c3_31 = arith.constant 3 : index
    %c0_32 = arith.constant 0 : index
    %c0_33 = arith.constant 0 : index
    %37 = vector.load %arg6[%c3_31, %c0_32, %c0_33] : memref<9x128x128xbf16, #tpu.memory_space<vmem>>, vector<1x128x128xbf16>
    %38 = vector.shape_cast %37 : vector<1x128x128xbf16> to vector<128x128xbf16>
    %cst_34 = arith.constant dense<0.000000e+00> : vector<128x128xf32>
    %39 = tpu.matmul %38, %24, %cst_34 {dimension_numbers = #tpu.dot_dimension_numbers<[1], [0], [0], [1], [0, 0, 1, 1], [], []>} : vector<128x128xbf16>, vector<128x128xbf16>, vector<128x128xf32> -> vector<128x128xf32>
    %40 = arith.truncf %39 : vector<128x128xf32> to vector<128x128xbf16>
    %c4 = arith.constant 4 : index
    %c0_35 = arith.constant 0 : index
    %c0_36 = arith.constant 0 : index
    %41 = vector.load %arg6[%c4, %c0_35, %c0_36] : memref<9x128x128xbf16, #tpu.memory_space<vmem>>, vector<1x128x128xbf16>
    %42 = vector.shape_cast %41 : vector<1x128x128xbf16> to vector<128x128xbf16>
    %cst_37 = arith.constant dense<0.000000e+00> : vector<128x128xf32>
    %43 = tpu.matmul %42, %24, %cst_37 {dimension_numbers = #tpu.dot_dimension_numbers<[1], [0], [0], [1], [0, 0, 1, 1], [], []>} : vector<128x128xbf16>, vector<128x128xbf16>, vector<128x128xf32> -> vector<128x128xf32>
    %44 = arith.truncf %43 : vector<128x128xf32> to vector<128x128xbf16>
    %c5 = arith.constant 5 : index
    %c0_38 = arith.constant 0 : index
    %c0_39 = arith.constant 0 : index
    %45 = vector.load %arg6[%c5, %c0_38, %c0_39] : memref<9x128x128xbf16, #tpu.memory_space<vmem>>, vector<1x128x128xbf16>
    %46 = vector.shape_cast %45 : vector<1x128x128xbf16> to vector<128x128xbf16>
    %cst_40 = arith.constant dense<0.000000e+00> : vector<128x128xf32>
    %47 = tpu.matmul %46, %24, %cst_40 {dimension_numbers = #tpu.dot_dimension_numbers<[1], [0], [0], [1], [0, 0, 1, 1], [], []>} : vector<128x128xbf16>, vector<128x128xbf16>, vector<128x128xf32> -> vector<128x128xf32>
    %48 = arith.truncf %47 : vector<128x128xf32> to vector<128x128xbf16>
    %c6 = arith.constant 6 : index
    %c0_41 = arith.constant 0 : index
    %c0_42 = arith.constant 0 : index
    %49 = vector.load %arg6[%c6, %c0_41, %c0_42] : memref<9x128x128xbf16, #tpu.memory_space<vmem>>, vector<1x128x128xbf16>
    %50 = vector.shape_cast %49 : vector<1x128x128xbf16> to vector<128x128xbf16>
    %cst_43 = arith.constant dense<0.000000e+00> : vector<128x128xf32>
    %51 = tpu.matmul %50, %24, %cst_43 {dimension_numbers = #tpu.dot_dimension_numbers<[1], [0], [0], [1], [0, 0, 1, 1], [], []>} : vector<128x128xbf16>, vector<128x128xbf16>, vector<128x128xf32> -> vector<128x128xf32>
    %52 = arith.truncf %51 : vector<128x128xf32> to vector<128x128xbf16>
    %c7 = arith.constant 7 : index
    %c0_44 = arith.constant 0 : index
    %c0_45 = arith.constant 0 : index
    %53 = vector.load %arg6[%c7, %c0_44, %c0_45] : memref<9x128x128xbf16, #tpu.memory_space<vmem>>, vector<1x128x128xbf16>
    %54 = vector.shape_cast %53 : vector<1x128x128xbf16> to vector<128x128xbf16>
    %cst_46 = arith.constant dense<0.000000e+00> : vector<128x128xf32>
    %55 = tpu.matmul %54, %24, %cst_46 {dimension_numbers = #tpu.dot_dimension_numbers<[1], [0], [0], [1], [0, 0, 1, 1], [], []>} : vector<128x128xbf16>, vector<128x128xbf16>, vector<128x128xf32> -> vector<128x128xf32>
    %56 = arith.truncf %55 : vector<128x128xf32> to vector<128x128xbf16>
    %c8 = arith.constant 8 : index
    %c0_47 = arith.constant 0 : index
    %c0_48 = arith.constant 0 : index
    %57 = vector.load %arg6[%c8, %c0_47, %c0_48] : memref<9x128x128xbf16, #tpu.memory_space<vmem>>, vector<1x128x128xbf16>
    %58 = vector.shape_cast %57 : vector<1x128x128xbf16> to vector<128x128xbf16>
    %cst_49 = arith.constant dense<0.000000e+00> : vector<128x128xf32>
    %59 = tpu.matmul %58, %24, %cst_49 {dimension_numbers = #tpu.dot_dimension_numbers<[1], [0], [0], [1], [0, 0, 1, 1], [], []>} : vector<128x128xbf16>, vector<128x128xbf16>, vector<128x128xf32> -> vector<128x128xf32>
    %60 = arith.truncf %59 : vector<128x128xf32> to vector<128x128xbf16>
    %61 = tpu.concatenate %28, %32, %36, %40, %44, %48, %52, %56, %60 in 1 : vector<128x128xbf16>, vector<128x128xbf16>, vector<128x128xbf16>, vector<128x128xbf16>, vector<128x128xbf16>, vector<128x128xbf16>, vector<128x128xbf16>, vector<128x128xbf16>, vector<128x128xbf16> -> vector<128x1152xbf16>
    %c0_50 = arith.constant 0 : index
    %c0_51 = arith.constant 0 : index
    %62 = vector.load %arg4[%c0_50, %c0_51] : memref<1152x128xbf16, #tpu.memory_space<vmem>>, vector<1152x128xbf16>
    %cst_52 = arith.constant dense<0.000000e+00> : vector<128x128xf32>
    %63 = tpu.matmul %61, %62, %cst_52 {dimension_numbers = #tpu.dot_dimension_numbers<[1], [0], [0], [1], [0, 0, 1, 1], [], []>} : vector<128x1152xbf16>, vector<1152x128xbf16>, vector<128x128xf32> -> vector<128x128xf32>
    %c0_53 = arith.constant 0 : index
    %c0_54 = arith.constant 0 : index
    %64 = vector.load %arg5[%c0_53, %c0_54] : memref<1x128xf32, #tpu.memory_space<vmem>>, vector<1x128xf32>
    %65 = vector.broadcast %64 : vector<1x128xf32> to vector<128x128xf32>
    %66 = arith.addf %63, %65 : vector<128x128xf32>
    %cst_55 = arith.constant 0.000000e+00 : f32
    %67 = vector.broadcast %cst_55 : f32 to vector<128x128xf32>
    %68 = arith.maximumf %66, %67 : vector<128x128xf32>
    %69 = arith.truncf %68 : vector<128x128xf32> to vector<128x128xbf16>
    %c0_56 = arith.constant 0 : index
    %c0_57 = arith.constant 0 : index
    %c0_58 = arith.constant 0 : index
    %70 = vector.load %arg7[%c0_56, %c0_57, %c0_58] : memref<4x32x128xbf16, #tpu.memory_space<vmem>>, vector<1x32x128xbf16>
    %71 = vector.shape_cast %70 : vector<1x32x128xbf16> to vector<32x128xbf16>
    %cst_59 = arith.constant dense<0.000000e+00> : vector<32x128xf32>
    %72 = tpu.matmul %71, %69, %cst_59 {dimension_numbers = #tpu.dot_dimension_numbers<[1], [0], [0], [1], [0, 0, 1, 1], [], []>} : vector<32x128xbf16>, vector<128x128xbf16>, vector<32x128xf32> -> vector<32x128xf32>
    %c1_60 = arith.constant 1 : index
    %c0_61 = arith.constant 0 : index
    %c0_62 = arith.constant 0 : index
    %73 = vector.load %arg7[%c1_60, %c0_61, %c0_62] : memref<4x32x128xbf16, #tpu.memory_space<vmem>>, vector<1x32x128xbf16>
    %74 = vector.shape_cast %73 : vector<1x32x128xbf16> to vector<32x128xbf16>
    %cst_63 = arith.constant dense<0.000000e+00> : vector<32x128xf32>
    %75 = tpu.matmul %74, %69, %cst_63 {dimension_numbers = #tpu.dot_dimension_numbers<[1], [0], [0], [1], [0, 0, 1, 1], [], []>} : vector<32x128xbf16>, vector<128x128xbf16>, vector<32x128xf32> -> vector<32x128xf32>
    %76 = arith.maximumf %72, %75 : vector<32x128xf32>
    %c2_64 = arith.constant 2 : index
    %c0_65 = arith.constant 0 : index
    %c0_66 = arith.constant 0 : index
    %77 = vector.load %arg7[%c2_64, %c0_65, %c0_66] : memref<4x32x128xbf16, #tpu.memory_space<vmem>>, vector<1x32x128xbf16>
    %78 = vector.shape_cast %77 : vector<1x32x128xbf16> to vector<32x128xbf16>
    %cst_67 = arith.constant dense<0.000000e+00> : vector<32x128xf32>
    %79 = tpu.matmul %78, %69, %cst_67 {dimension_numbers = #tpu.dot_dimension_numbers<[1], [0], [0], [1], [0, 0, 1, 1], [], []>} : vector<32x128xbf16>, vector<128x128xbf16>, vector<32x128xf32> -> vector<32x128xf32>
    %80 = arith.maximumf %76, %79 : vector<32x128xf32>
    %c3_68 = arith.constant 3 : index
    %c0_69 = arith.constant 0 : index
    %c0_70 = arith.constant 0 : index
    %81 = vector.load %arg7[%c3_68, %c0_69, %c0_70] : memref<4x32x128xbf16, #tpu.memory_space<vmem>>, vector<1x32x128xbf16>
    %82 = vector.shape_cast %81 : vector<1x32x128xbf16> to vector<32x128xbf16>
    %cst_71 = arith.constant dense<0.000000e+00> : vector<32x128xf32>
    %83 = tpu.matmul %82, %69, %cst_71 {dimension_numbers = #tpu.dot_dimension_numbers<[1], [0], [0], [1], [0, 0, 1, 1], [], []>} : vector<32x128xbf16>, vector<128x128xbf16>, vector<32x128xf32> -> vector<32x128xf32>
    %84 = arith.maximumf %80, %83 : vector<32x128xf32>
    %85 = arith.truncf %84 : vector<32x128xf32> to vector<32x128xbf16>
    %c0_72 = arith.constant 0 : index
    %c0_73 = arith.constant 0 : index
    %c0_74 = arith.constant 0 : index
    %86 = vector.load %arg10[%c0_72, %c0_73, %c0_74] : memref<9x32x32xbf16, #tpu.memory_space<vmem>>, vector<1x32x32xbf16>
    %87 = vector.shape_cast %86 : vector<1x32x32xbf16> to vector<32x32xbf16>
    %cst_75 = arith.constant dense<0.000000e+00> : vector<32x128xf32>
    %88 = tpu.matmul %87, %85, %cst_75 {dimension_numbers = #tpu.dot_dimension_numbers<[1], [0], [0], [1], [0, 0, 1, 1], [], []>} : vector<32x32xbf16>, vector<32x128xbf16>, vector<32x128xf32> -> vector<32x128xf32>
    %89 = arith.truncf %88 : vector<32x128xf32> to vector<32x128xbf16>
    %c1_76 = arith.constant 1 : index
    %c0_77 = arith.constant 0 : index
    %c0_78 = arith.constant 0 : index
    %90 = vector.load %arg10[%c1_76, %c0_77, %c0_78] : memref<9x32x32xbf16, #tpu.memory_space<vmem>>, vector<1x32x32xbf16>
    %91 = vector.shape_cast %90 : vector<1x32x32xbf16> to vector<32x32xbf16>
    %cst_79 = arith.constant dense<0.000000e+00> : vector<32x128xf32>
    %92 = tpu.matmul %91, %85, %cst_79 {dimension_numbers = #tpu.dot_dimension_numbers<[1], [0], [0], [1], [0, 0, 1, 1], [], []>} : vector<32x32xbf16>, vector<32x128xbf16>, vector<32x128xf32> -> vector<32x128xf32>
    %93 = arith.truncf %92 : vector<32x128xf32> to vector<32x128xbf16>
    %c2_80 = arith.constant 2 : index
    %c0_81 = arith.constant 0 : index
    %c0_82 = arith.constant 0 : index
    %94 = vector.load %arg10[%c2_80, %c0_81, %c0_82] : memref<9x32x32xbf16, #tpu.memory_space<vmem>>, vector<1x32x32xbf16>
    %95 = vector.shape_cast %94 : vector<1x32x32xbf16> to vector<32x32xbf16>
    %cst_83 = arith.constant dense<0.000000e+00> : vector<32x128xf32>
    %96 = tpu.matmul %95, %85, %cst_83 {dimension_numbers = #tpu.dot_dimension_numbers<[1], [0], [0], [1], [0, 0, 1, 1], [], []>} : vector<32x32xbf16>, vector<32x128xbf16>, vector<32x128xf32> -> vector<32x128xf32>
    %97 = arith.truncf %96 : vector<32x128xf32> to vector<32x128xbf16>
    %c3_84 = arith.constant 3 : index
    %c0_85 = arith.constant 0 : index
    %c0_86 = arith.constant 0 : index
    %98 = vector.load %arg10[%c3_84, %c0_85, %c0_86] : memref<9x32x32xbf16, #tpu.memory_space<vmem>>, vector<1x32x32xbf16>
    %99 = vector.shape_cast %98 : vector<1x32x32xbf16> to vector<32x32xbf16>
    %cst_87 = arith.constant dense<0.000000e+00> : vector<32x128xf32>
    %100 = tpu.matmul %99, %85, %cst_87 {dimension_numbers = #tpu.dot_dimension_numbers<[1], [0], [0], [1], [0, 0, 1, 1], [], []>} : vector<32x32xbf16>, vector<32x128xbf16>, vector<32x128xf32> -> vector<32x128xf32>
    %101 = arith.truncf %100 : vector<32x128xf32> to vector<32x128xbf16>
    %c4_88 = arith.constant 4 : index
    %c0_89 = arith.constant 0 : index
    %c0_90 = arith.constant 0 : index
    %102 = vector.load %arg10[%c4_88, %c0_89, %c0_90] : memref<9x32x32xbf16, #tpu.memory_space<vmem>>, vector<1x32x32xbf16>
    %103 = vector.shape_cast %102 : vector<1x32x32xbf16> to vector<32x32xbf16>
    %cst_91 = arith.constant dense<0.000000e+00> : vector<32x128xf32>
    %104 = tpu.matmul %103, %85, %cst_91 {dimension_numbers = #tpu.dot_dimension_numbers<[1], [0], [0], [1], [0, 0, 1, 1], [], []>} : vector<32x32xbf16>, vector<32x128xbf16>, vector<32x128xf32> -> vector<32x128xf32>
    %105 = arith.truncf %104 : vector<32x128xf32> to vector<32x128xbf16>
    %c5_92 = arith.constant 5 : index
    %c0_93 = arith.constant 0 : index
    %c0_94 = arith.constant 0 : index
    %106 = vector.load %arg10[%c5_92, %c0_93, %c0_94] : memref<9x32x32xbf16, #tpu.memory_space<vmem>>, vector<1x32x32xbf16>
    %107 = vector.shape_cast %106 : vector<1x32x32xbf16> to vector<32x32xbf16>
    %cst_95 = arith.constant dense<0.000000e+00> : vector<32x128xf32>
    %108 = tpu.matmul %107, %85, %cst_95 {dimension_numbers = #tpu.dot_dimension_numbers<[1], [0], [0], [1], [0, 0, 1, 1], [], []>} : vector<32x32xbf16>, vector<32x128xbf16>, vector<32x128xf32> -> vector<32x128xf32>
    %109 = arith.truncf %108 : vector<32x128xf32> to vector<32x128xbf16>
    %c6_96 = arith.constant 6 : index
    %c0_97 = arith.constant 0 : index
    %c0_98 = arith.constant 0 : index
    %110 = vector.load %arg10[%c6_96, %c0_97, %c0_98] : memref<9x32x32xbf16, #tpu.memory_space<vmem>>, vector<1x32x32xbf16>
    %111 = vector.shape_cast %110 : vector<1x32x32xbf16> to vector<32x32xbf16>
    %cst_99 = arith.constant dense<0.000000e+00> : vector<32x128xf32>
    %112 = tpu.matmul %111, %85, %cst_99 {dimension_numbers = #tpu.dot_dimension_numbers<[1], [0], [0], [1], [0, 0, 1, 1], [], []>} : vector<32x32xbf16>, vector<32x128xbf16>, vector<32x128xf32> -> vector<32x128xf32>
    %113 = arith.truncf %112 : vector<32x128xf32> to vector<32x128xbf16>
    %c7_100 = arith.constant 7 : index
    %c0_101 = arith.constant 0 : index
    %c0_102 = arith.constant 0 : index
    %114 = vector.load %arg10[%c7_100, %c0_101, %c0_102] : memref<9x32x32xbf16, #tpu.memory_space<vmem>>, vector<1x32x32xbf16>
    %115 = vector.shape_cast %114 : vector<1x32x32xbf16> to vector<32x32xbf16>
    %cst_103 = arith.constant dense<0.000000e+00> : vector<32x128xf32>
    %116 = tpu.matmul %115, %85, %cst_103 {dimension_numbers = #tpu.dot_dimension_numbers<[1], [0], [0], [1], [0, 0, 1, 1], [], []>} : vector<32x32xbf16>, vector<32x128xbf16>, vector<32x128xf32> -> vector<32x128xf32>
    %117 = arith.truncf %116 : vector<32x128xf32> to vector<32x128xbf16>
    %c8_104 = arith.constant 8 : index
    %c0_105 = arith.constant 0 : index
    %c0_106 = arith.constant 0 : index
    %118 = vector.load %arg10[%c8_104, %c0_105, %c0_106] : memref<9x32x32xbf16, #tpu.memory_space<vmem>>, vector<1x32x32xbf16>
    %119 = vector.shape_cast %118 : vector<1x32x32xbf16> to vector<32x32xbf16>
    %cst_107 = arith.constant dense<0.000000e+00> : vector<32x128xf32>
    %120 = tpu.matmul %119, %85, %cst_107 {dimension_numbers = #tpu.dot_dimension_numbers<[1], [0], [0], [1], [0, 0, 1, 1], [], []>} : vector<32x32xbf16>, vector<32x128xbf16>, vector<32x128xf32> -> vector<32x128xf32>
    %121 = arith.truncf %120 : vector<32x128xf32> to vector<32x128xbf16>
    %122 = tpu.concatenate %89, %93, %97, %101, %105, %109, %113, %117, %121 in 1 : vector<32x128xbf16>, vector<32x128xbf16>, vector<32x128xbf16>, vector<32x128xbf16>, vector<32x128xbf16>, vector<32x128xbf16>, vector<32x128xbf16>, vector<32x128xbf16>, vector<32x128xbf16> -> vector<32x1152xbf16>
    %c0_108 = arith.constant 0 : index
    %c0_109 = arith.constant 0 : index
    %123 = vector.load %arg8[%c0_108, %c0_109] : memref<1152x128xbf16, #tpu.memory_space<vmem>>, vector<1152x128xbf16>
    %cst_110 = arith.constant dense<0.000000e+00> : vector<32x128xf32>
    %124 = tpu.matmul %122, %123, %cst_110 {dimension_numbers = #tpu.dot_dimension_numbers<[1], [0], [0], [1], [0, 0, 1, 1], [], []>} : vector<32x1152xbf16>, vector<1152x128xbf16>, vector<32x128xf32> -> vector<32x128xf32>
    %c0_111 = arith.constant 0 : index
    %c0_112 = arith.constant 0 : index
    %125 = vector.load %arg9[%c0_111, %c0_112] : memref<1x128xf32, #tpu.memory_space<vmem>>, vector<1x128xf32>
    %126 = vector.broadcast %125 : vector<1x128xf32> to vector<32x128xf32>
    %127 = arith.addf %124, %126 : vector<32x128xf32>
    %cst_113 = arith.constant 0.000000e+00 : f32
    %128 = vector.broadcast %cst_113 : f32 to vector<32x128xf32>
    %129 = arith.maximumf %127, %128 : vector<32x128xf32>
    %130 = arith.truncf %129 : vector<32x128xf32> to vector<32x128xbf16>
    %c0_114 = arith.constant 0 : index
    %c0_115 = arith.constant 0 : index
    %c0_116 = arith.constant 0 : index
    %131 = vector.load %arg11[%c0_114, %c0_115, %c0_116] : memref<4x8x32xbf16, #tpu.memory_space<vmem>>, vector<1x8x32xbf16>
    %132 = vector.shape_cast %131 : vector<1x8x32xbf16> to vector<8x32xbf16>
    %cst_117 = arith.constant dense<0.000000e+00> : vector<8x128xf32>
    %133 = tpu.matmul %132, %130, %cst_117 {dimension_numbers = #tpu.dot_dimension_numbers<[1], [0], [0], [1], [0, 0, 1, 1], [], []>} : vector<8x32xbf16>, vector<32x128xbf16>, vector<8x128xf32> -> vector<8x128xf32>
    %c1_118 = arith.constant 1 : index
    %c0_119 = arith.constant 0 : index
    %c0_120 = arith.constant 0 : index
    %134 = vector.load %arg11[%c1_118, %c0_119, %c0_120] : memref<4x8x32xbf16, #tpu.memory_space<vmem>>, vector<1x8x32xbf16>
    %135 = vector.shape_cast %134 : vector<1x8x32xbf16> to vector<8x32xbf16>
    %cst_121 = arith.constant dense<0.000000e+00> : vector<8x128xf32>
    %136 = tpu.matmul %135, %130, %cst_121 {dimension_numbers = #tpu.dot_dimension_numbers<[1], [0], [0], [1], [0, 0, 1, 1], [], []>} : vector<8x32xbf16>, vector<32x128xbf16>, vector<8x128xf32> -> vector<8x128xf32>
    %137 = arith.maximumf %133, %136 : vector<8x128xf32>
    %c2_122 = arith.constant 2 : index
    %c0_123 = arith.constant 0 : index
    %c0_124 = arith.constant 0 : index
    %138 = vector.load %arg11[%c2_122, %c0_123, %c0_124] : memref<4x8x32xbf16, #tpu.memory_space<vmem>>, vector<1x8x32xbf16>
    %139 = vector.shape_cast %138 : vector<1x8x32xbf16> to vector<8x32xbf16>
    %cst_125 = arith.constant dense<0.000000e+00> : vector<8x128xf32>
    %140 = tpu.matmul %139, %130, %cst_125 {dimension_numbers = #tpu.dot_dimension_numbers<[1], [0], [0], [1], [0, 0, 1, 1], [], []>} : vector<8x32xbf16>, vector<32x128xbf16>, vector<8x128xf32> -> vector<8x128xf32>
    %141 = arith.maximumf %137, %140 : vector<8x128xf32>
    %c3_126 = arith.constant 3 : index
    %c0_127 = arith.constant 0 : index
    %c0_128 = arith.constant 0 : index
    %142 = vector.load %arg11[%c3_126, %c0_127, %c0_128] : memref<4x8x32xbf16, #tpu.memory_space<vmem>>, vector<1x8x32xbf16>
    %143 = vector.shape_cast %142 : vector<1x8x32xbf16> to vector<8x32xbf16>
    %cst_129 = arith.constant dense<0.000000e+00> : vector<8x128xf32>
    %144 = tpu.matmul %143, %130, %cst_129 {dimension_numbers = #tpu.dot_dimension_numbers<[1], [0], [0], [1], [0, 0, 1, 1], [], []>} : vector<8x32xbf16>, vector<32x128xbf16>, vector<8x128xf32> -> vector<8x128xf32>
    %145 = arith.maximumf %141, %144 : vector<8x128xf32>
    %146 = arith.truncf %145 : vector<8x128xf32> to vector<8x128xbf16>
    %c0_130 = arith.constant 0 : index
    %c0_131 = arith.constant 0 : index
    %c0_132 = arith.constant 0 : index
    %147 = vector.load %arg14[%c0_130, %c0_131, %c0_132] : memref<9x8x8xbf16, #tpu.memory_space<vmem>>, vector<1x8x8xbf16>
    %148 = vector.shape_cast %147 : vector<1x8x8xbf16> to vector<8x8xbf16>
    %cst_133 = arith.constant dense<0.000000e+00> : vector<8x128xf32>
    %149 = tpu.matmul %148, %146, %cst_133 {dimension_numbers = #tpu.dot_dimension_numbers<[1], [0], [0], [1], [0, 0, 1, 1], [], []>} : vector<8x8xbf16>, vector<8x128xbf16>, vector<8x128xf32> -> vector<8x128xf32>
    %150 = arith.truncf %149 : vector<8x128xf32> to vector<8x128xbf16>
    %c1_134 = arith.constant 1 : index
    %c0_135 = arith.constant 0 : index
    %c0_136 = arith.constant 0 : index
    %151 = vector.load %arg14[%c1_134, %c0_135, %c0_136] : memref<9x8x8xbf16, #tpu.memory_space<vmem>>, vector<1x8x8xbf16>
    %152 = vector.shape_cast %151 : vector<1x8x8xbf16> to vector<8x8xbf16>
    %cst_137 = arith.constant dense<0.000000e+00> : vector<8x128xf32>
    %153 = tpu.matmul %152, %146, %cst_137 {dimension_numbers = #tpu.dot_dimension_numbers<[1], [0], [0], [1], [0, 0, 1, 1], [], []>} : vector<8x8xbf16>, vector<8x128xbf16>, vector<8x128xf32> -> vector<8x128xf32>
    %154 = arith.truncf %153 : vector<8x128xf32> to vector<8x128xbf16>
    %c2_138 = arith.constant 2 : index
    %c0_139 = arith.constant 0 : index
    %c0_140 = arith.constant 0 : index
    %155 = vector.load %arg14[%c2_138, %c0_139, %c0_140] : memref<9x8x8xbf16, #tpu.memory_space<vmem>>, vector<1x8x8xbf16>
    %156 = vector.shape_cast %155 : vector<1x8x8xbf16> to vector<8x8xbf16>
    %cst_141 = arith.constant dense<0.000000e+00> : vector<8x128xf32>
    %157 = tpu.matmul %156, %146, %cst_141 {dimension_numbers = #tpu.dot_dimension_numbers<[1], [0], [0], [1], [0, 0, 1, 1], [], []>} : vector<8x8xbf16>, vector<8x128xbf16>, vector<8x128xf32> -> vector<8x128xf32>
    %158 = arith.truncf %157 : vector<8x128xf32> to vector<8x128xbf16>
    %c3_142 = arith.constant 3 : index
    %c0_143 = arith.constant 0 : index
    %c0_144 = arith.constant 0 : index
    %159 = vector.load %arg14[%c3_142, %c0_143, %c0_144] : memref<9x8x8xbf16, #tpu.memory_space<vmem>>, vector<1x8x8xbf16>
    %160 = vector.shape_cast %159 : vector<1x8x8xbf16> to vector<8x8xbf16>
    %cst_145 = arith.constant dense<0.000000e+00> : vector<8x128xf32>
    %161 = tpu.matmul %160, %146, %cst_145 {dimension_numbers = #tpu.dot_dimension_numbers<[1], [0], [0], [1], [0, 0, 1, 1], [], []>} : vector<8x8xbf16>, vector<8x128xbf16>, vector<8x128xf32> -> vector<8x128xf32>
    %162 = arith.truncf %161 : vector<8x128xf32> to vector<8x128xbf16>
    %c4_146 = arith.constant 4 : index
    %c0_147 = arith.constant 0 : index
    %c0_148 = arith.constant 0 : index
    %163 = vector.load %arg14[%c4_146, %c0_147, %c0_148] : memref<9x8x8xbf16, #tpu.memory_space<vmem>>, vector<1x8x8xbf16>
    %164 = vector.shape_cast %163 : vector<1x8x8xbf16> to vector<8x8xbf16>
    %cst_149 = arith.constant dense<0.000000e+00> : vector<8x128xf32>
    %165 = tpu.matmul %164, %146, %cst_149 {dimension_numbers = #tpu.dot_dimension_numbers<[1], [0], [0], [1], [0, 0, 1, 1], [], []>} : vector<8x8xbf16>, vector<8x128xbf16>, vector<8x128xf32> -> vector<8x128xf32>
    %166 = arith.truncf %165 : vector<8x128xf32> to vector<8x128xbf16>
    %c5_150 = arith.constant 5 : index
    %c0_151 = arith.constant 0 : index
    %c0_152 = arith.constant 0 : index
    %167 = vector.load %arg14[%c5_150, %c0_151, %c0_152] : memref<9x8x8xbf16, #tpu.memory_space<vmem>>, vector<1x8x8xbf16>
    %168 = vector.shape_cast %167 : vector<1x8x8xbf16> to vector<8x8xbf16>
    %cst_153 = arith.constant dense<0.000000e+00> : vector<8x128xf32>
    %169 = tpu.matmul %168, %146, %cst_153 {dimension_numbers = #tpu.dot_dimension_numbers<[1], [0], [0], [1], [0, 0, 1, 1], [], []>} : vector<8x8xbf16>, vector<8x128xbf16>, vector<8x128xf32> -> vector<8x128xf32>
    %170 = arith.truncf %169 : vector<8x128xf32> to vector<8x128xbf16>
    %c6_154 = arith.constant 6 : index
    %c0_155 = arith.constant 0 : index
    %c0_156 = arith.constant 0 : index
    %171 = vector.load %arg14[%c6_154, %c0_155, %c0_156] : memref<9x8x8xbf16, #tpu.memory_space<vmem>>, vector<1x8x8xbf16>
    %172 = vector.shape_cast %171 : vector<1x8x8xbf16> to vector<8x8xbf16>
    %cst_157 = arith.constant dense<0.000000e+00> : vector<8x128xf32>
    %173 = tpu.matmul %172, %146, %cst_157 {dimension_numbers = #tpu.dot_dimension_numbers<[1], [0], [0], [1], [0, 0, 1, 1], [], []>} : vector<8x8xbf16>, vector<8x128xbf16>, vector<8x128xf32> -> vector<8x128xf32>
    %174 = arith.truncf %173 : vector<8x128xf32> to vector<8x128xbf16>
    %c7_158 = arith.constant 7 : index
    %c0_159 = arith.constant 0 : index
    %c0_160 = arith.constant 0 : index
    %175 = vector.load %arg14[%c7_158, %c0_159, %c0_160] : memref<9x8x8xbf16, #tpu.memory_space<vmem>>, vector<1x8x8xbf16>
    %176 = vector.shape_cast %175 : vector<1x8x8xbf16> to vector<8x8xbf16>
    %cst_161 = arith.constant dense<0.000000e+00> : vector<8x128xf32>
    %177 = tpu.matmul %176, %146, %cst_161 {dimension_numbers = #tpu.dot_dimension_numbers<[1], [0], [0], [1], [0, 0, 1, 1], [], []>} : vector<8x8xbf16>, vector<8x128xbf16>, vector<8x128xf32> -> vector<8x128xf32>
    %178 = arith.truncf %177 : vector<8x128xf32> to vector<8x128xbf16>
    %c8_162 = arith.constant 8 : index
    %c0_163 = arith.constant 0 : index
    %c0_164 = arith.constant 0 : index
    %179 = vector.load %arg14[%c8_162, %c0_163, %c0_164] : memref<9x8x8xbf16, #tpu.memory_space<vmem>>, vector<1x8x8xbf16>
    %180 = vector.shape_cast %179 : vector<1x8x8xbf16> to vector<8x8xbf16>
    %cst_165 = arith.constant dense<0.000000e+00> : vector<8x128xf32>
    %181 = tpu.matmul %180, %146, %cst_165 {dimension_numbers = #tpu.dot_dimension_numbers<[1], [0], [0], [1], [0, 0, 1, 1], [], []>} : vector<8x8xbf16>, vector<8x128xbf16>, vector<8x128xf32> -> vector<8x128xf32>
    %182 = arith.truncf %181 : vector<8x128xf32> to vector<8x128xbf16>
    %183 = tpu.concatenate %150, %154, %158, %162, %166, %170, %174, %178, %182 in 1 : vector<8x128xbf16>, vector<8x128xbf16>, vector<8x128xbf16>, vector<8x128xbf16>, vector<8x128xbf16>, vector<8x128xbf16>, vector<8x128xbf16>, vector<8x128xbf16>, vector<8x128xbf16> -> vector<8x1152xbf16>
    %c0_166 = arith.constant 0 : index
    %c0_167 = arith.constant 0 : index
    %184 = vector.load %arg12[%c0_166, %c0_167] : memref<1152x128xbf16, #tpu.memory_space<vmem>>, vector<1152x128xbf16>
    %cst_168 = arith.constant dense<0.000000e+00> : vector<8x128xf32>
    %185 = tpu.matmul %183, %184, %cst_168 {dimension_numbers = #tpu.dot_dimension_numbers<[1], [0], [0], [1], [0, 0, 1, 1], [], []>} : vector<8x1152xbf16>, vector<1152x128xbf16>, vector<8x128xf32> -> vector<8x128xf32>
    %c0_169 = arith.constant 0 : index
    %c0_170 = arith.constant 0 : index
    %186 = vector.load %arg13[%c0_169, %c0_170] : memref<1x128xf32, #tpu.memory_space<vmem>>, vector<1x128xf32>
    %187 = vector.broadcast %186 : vector<1x128xf32> to vector<8x128xf32>
    %188 = arith.addf %185, %187 : vector<8x128xf32>
    %cst_171 = arith.constant 0.000000e+00 : f32
    %189 = vector.broadcast %cst_171 : f32 to vector<8x128xf32>
    %190 = arith.maximumf %188, %189 : vector<8x128xf32>
    %191 = arith.truncf %190 : vector<8x128xf32> to vector<8x128xbf16>
    %c0_172 = arith.constant 0 : index
    %c0_173 = arith.constant 0 : index
    %c0_174 = arith.constant 0 : index
    %192 = vector.load %arg15[%c0_172, %c0_173, %c0_174] : memref<4x2x8xbf16, #tpu.memory_space<vmem>>, vector<1x2x8xbf16>
    %193 = vector.shape_cast %192 : vector<1x2x8xbf16> to vector<2x8xbf16>
    %cst_175 = arith.constant dense<0.000000e+00> : vector<2x128xf32>
    %194 = tpu.matmul %193, %191, %cst_175 {dimension_numbers = #tpu.dot_dimension_numbers<[1], [0], [0], [1], [0, 0, 1, 1], [], []>} : vector<2x8xbf16>, vector<8x128xbf16>, vector<2x128xf32> -> vector<2x128xf32>
    %c1_176 = arith.constant 1 : index
    %c0_177 = arith.constant 0 : index
    %c0_178 = arith.constant 0 : index
    %195 = vector.load %arg15[%c1_176, %c0_177, %c0_178] : memref<4x2x8xbf16, #tpu.memory_space<vmem>>, vector<1x2x8xbf16>
    %196 = vector.shape_cast %195 : vector<1x2x8xbf16> to vector<2x8xbf16>
    %cst_179 = arith.constant dense<0.000000e+00> : vector<2x128xf32>
    %197 = tpu.matmul %196, %191, %cst_179 {dimension_numbers = #tpu.dot_dimension_numbers<[1], [0], [0], [1], [0, 0, 1, 1], [], []>} : vector<2x8xbf16>, vector<8x128xbf16>, vector<2x128xf32> -> vector<2x128xf32>
    %198 = arith.maximumf %194, %197 : vector<2x128xf32>
    %c2_180 = arith.constant 2 : index
    %c0_181 = arith.constant 0 : index
    %c0_182 = arith.constant 0 : index
    %199 = vector.load %arg15[%c2_180, %c0_181, %c0_182] : memref<4x2x8xbf16, #tpu.memory_space<vmem>>, vector<1x2x8xbf16>
    %200 = vector.shape_cast %199 : vector<1x2x8xbf16> to vector<2x8xbf16>
    %cst_183 = arith.constant dense<0.000000e+00> : vector<2x128xf32>
    %201 = tpu.matmul %200, %191, %cst_183 {dimension_numbers = #tpu.dot_dimension_numbers<[1], [0], [0], [1], [0, 0, 1, 1], [], []>} : vector<2x8xbf16>, vector<8x128xbf16>, vector<2x128xf32> -> vector<2x128xf32>
    %202 = arith.maximumf %198, %201 : vector<2x128xf32>
    %c3_184 = arith.constant 3 : index
    %c0_185 = arith.constant 0 : index
    %c0_186 = arith.constant 0 : index
    %203 = vector.load %arg15[%c3_184, %c0_185, %c0_186] : memref<4x2x8xbf16, #tpu.memory_space<vmem>>, vector<1x2x8xbf16>
    %204 = vector.shape_cast %203 : vector<1x2x8xbf16> to vector<2x8xbf16>
    %cst_187 = arith.constant dense<0.000000e+00> : vector<2x128xf32>
    %205 = tpu.matmul %204, %191, %cst_187 {dimension_numbers = #tpu.dot_dimension_numbers<[1], [0], [0], [1], [0, 0, 1, 1], [], []>} : vector<2x8xbf16>, vector<8x128xbf16>, vector<2x128xf32> -> vector<2x128xf32>
    %206 = arith.maximumf %202, %205 : vector<2x128xf32>
    %207 = arith.truncf %206 : vector<2x128xf32> to vector<2x128xbf16>
    %208 = arith.extf %207 : vector<2x128xbf16> to vector<2x128xf32>
    %c0_188 = arith.constant 0 : index
    %c0_189 = arith.constant 0 : index
    %209 = vector.load %arg16[%c0_188, %c0_189] : memref<2x128xf32, #tpu.memory_space<vmem>>, vector<2x128xf32>
    tpu.vector_store %arg16[%c0_188, %c0_189], %208 {strides = array<i32>} : memref<2x128xf32, #tpu.memory_space<vmem>>, vector<2x128xf32>,
    return
  }
}

</mosaic_0001>

<bundles_post_ra>
// kernel: protonet_forward.1
= control target key start
LH: loop header
LB: loop body
LE: loop exit
PB: predicated region body
PF: predicated region fallthrough
CT: control target
= control target key end

     0   :  { %s14778_s0 = inlined_call_operand.vmem [shape: bf16[512,16], index: 0, kind: input, shape index: {}]   ;;  %s14779_s1 = inlined_call_operand.vmem [shape: bf16[16,128], index: 1, kind: input, shape index: {}]   ;;  %s14780_s2 = inlined_call_operand.vmem [shape: f32[1,128], index: 2, kind: input, shape index: {}]   ;;  %s14781_s3 = inlined_call_operand.vmem [shape: bf16[4,128,512], index: 3, kind: input, shape index: {}]   ;;  %s14782_s4 = inlined_call_operand.vmem [shape: bf16[1152,128], index: 4, kind: input, shape index: {}]   ;;  %s14783_s5 = inlined_call_operand.vmem [shape: f32[1,128], index: 5, kind: input, shape index: {}]   ;;  %s14784_s6 = inlined_call_operand.vmem [shape: bf16[9,128,128], index: 6, kind: input, shape index: {}]   ;;  %s14785_s7 = inlined_call_operand.vmem [shape: bf16[4,32,128], index: 7, kind: input, shape index: {}]   ;;  %s14786_s8 = inlined_call_operand.vmem [shape: bf16[1152,128], index: 8, kind: input, shape index: {}]   ;;  %s14787_s9 = inlined_call_operand.vmem [shape: f32[1,128], index: 9, kind: input, shape index: {}]   ;;  %s14788_s10 = inlined_call_operand.vmem [shape: bf16[9,32,32], index: 10, kind: input, shape index: {}]   ;;  %s14789_s11 = inlined_call_operand.vmem [shape: bf16[4,8,32], index: 11, kind: input, shape index: {}]   ;;  %s14790_s12 = inlined_call_operand.vmem [shape: bf16[1152,128], index: 12, kind: input, shape index: {}]   ;;  %s14791_s13 = inlined_call_operand.vmem [shape: f32[1,128], index: 13, kind: input, shape index: {}]   ;;  %s14792_s14 = inlined_call_operand.vmem [shape: bf16[9,8,8], index: 14, kind: input, shape index: {}]   ;;  %s14793_s15 = inlined_call_operand.vmem [shape: bf16[4,2,8], index: 15, kind: input, shape index: {}]   ;;  %s14794_s16 = inlined_call_operand.hbm [shape: f32[2,128], index: 16, kind: output, shape index: {}]  }
   0x1   :  { %14796 = sst [smem:[#allocation22_spill]] %s14778_s0 }
   0x2   :  { %v11160_v0 = vld [vmem:[%s14779_s1] sm:$0xff]   ;;  %vm294_vm0 = vcmask 130048   ;;  %s14797_s25 = sld [smem:[#allocation22_spill]] }
   0x3   :  { %10469 = vmatprep.subr.bf16.mxu0 %v11160_v0  ;;  %v11195_v33 = vld [vmem:[%s14781_s3 + $0x4] ss:$16 sps:$4 sm:$0xff]   ;;  %v11950_v36 = vld [vmem:[%s14780_s2] ss:$0 sm:$0xff] }
   0x4   :  { %10470 = vmatpush3.bf16.msra.mxu0 %v11160_v0  ;;  %v11198_v34 = vld [vmem:[%s14781_s3 + $0x104] ss:$16 sps:$4 sm:$0xff]   ;;  %1000 = vmatprep.mubr.bf16.mxu1 %v11195_v33 }
   0x8   :  { %v11161_v1 = vld [vmem:[%s14797_s25] sm:$0xff]   ;;  %v11162_v2 = vld [vmem:[%s14797_s25 + $0x8] sm:$0xff]   ;;  %v11163_v3 = vld [vmem:[%s14797_s25 + $0x10] sm:$0xff]  }
   0x9   :  { %10471 = vmatprep.mubr.msk.bf16.mxu0 %vm294_vm0, %v11161_v1  ;;  %v11164_v4 = vld [vmem:[%s14797_s25 + $0x18] sm:$0xff]   ;;  %v11165_v5 = vld [vmem:[%s14797_s25 + $0x20] sm:$0xff]   ;;  %v11166_v6 = vld [vmem:[%s14797_s25 + $0x28] sm:$0xff]  }
   0xa   :  { %10472 = vmatmul.mubr.msk.bf16.vlgmr.msra.gmra.mxu0 %vm294_vm0, %v11162_v2  ;;  %v11167_v7 = vld [vmem:[%s14797_s25 + $0x30] sm:$0xff]   ;;  %v11168_v8 = vld [vmem:[%s14797_s25 + $0x38] sm:$0xff]   ;;  %v11169_v9 = vld [vmem:[%s14797_s25 + $0x40] sm:$0xff]  }
   0xb   :  { %10475 = vmatprep.mubr.msk.bf16.mxu0 %vm294_vm0, %v11163_v3  ;;  %v11170_v10 = vld [vmem:[%s14797_s25 + $0x48] sm:$0xff]   ;;  %v11171_v11 = vld [vmem:[%s14797_s25 + $0x50] sm:$0xff]   ;;  %v11172_v12 = vld [vmem:[%s14797_s25 + $0x58] sm:$0xff]  }
   0xc   :  { %v11173_v13 = vld [vmem:[%s14797_s25 + $0x60] sm:$0xff]   ;;  %v11174_v14 = vld [vmem:[%s14797_s25 + $0x68] sm:$0xff]   ;;  %v11175_v15 = vld [vmem:[%s14797_s25 + $0x70] sm:$0xff]  }
   0xd   :  { %v11176_v16 = vld [vmem:[%s14797_s25 + $0x78] sm:$0xff]   ;;  %v11177_v17 = vld [vmem:[%s14797_s25 + $0x80] sm:$0xff]   ;;  %v11178_v18 = vld [vmem:[%s14797_s25 + $0x88] sm:$0xff]  }
   0xe   :  { %v11179_v19 = vld [vmem:[%s14797_s25 + $0x90] sm:$0xff]   ;;  %v11180_v20 = vld [vmem:[%s14797_s25 + $0x98] sm:$0xff]   ;;  %v11181_v21 = vld [vmem:[%s14797_s25 + $0xa0] sm:$0xff]  }
   0xf   :  { %v11182_v22 = vld [vmem:[%s14797_s25 + $0xa8] sm:$0xff]   ;;  %v11183_v23 = vld [vmem:[%s14797_s25 + $0xb0] sm:$0xff]   ;;  %v11184_v24 = vld [vmem:[%s14797_s25 + $0xb8] sm:$0xff]  }
  0x10   :  { %v11185_v25 = vld [vmem:[%s14797_s25 + $0xc0] sm:$0xff]   ;;  %v11186_v26 = vld [vmem:[%s14797_s25 + $0xc8] sm:$0xff]   ;;  %v11187_v27 = vld [vmem:[%s14797_s25 + $0xd0] sm:$0xff]  }
  0x11   :  { %v11188_v28 = vld [vmem:[%s14797_s25 + $0xd8] sm:$0xff]   ;;  %v11189_v29 = vld [vmem:[%s14797_s25 + $0xe0] sm:$0xff]   ;;  %v11190_v30 = vld [vmem:[%s14797_s25 + $0xe8] sm:$0xff]  }
  0x12   :  { %10476 = vmatmul.mubr.msk.bf16.gmra.mxu0 %vm294_vm0, %v11164_v4  ;;  %v11191_v31 = vld [vmem:[%s14797_s25 + $0xf0] sm:$0xff]   ;;  %v11192_v32 = vld [vmem:[%s14797_s25 + $0xf8] sm:$0xff]  }
  0x13   :  { %10479 = vmatprep.mubr.msk.bf16.mxu0 %vm294_vm0, %v11165_v5 }
  0x1a   :  { %10480 = vmatmul.mubr.msk.bf16.gmra.mxu0 %vm294_vm0, %v11166_v6 }
  0x1b   :  { %10483 = vmatprep.mubr.msk.bf16.mxu0 %vm294_vm0, %v11167_v7 }
  0x22   :  { %10484 = vmatmul.mubr.msk.bf16.gmra.mxu0 %vm294_vm0, %v11168_v8 }
  0x23   :  { %10487 = vmatprep.mubr.msk.bf16.mxu0 %vm294_vm0, %v11169_v9 }
  0x2a   :  { %10488 = vmatmul.mubr.msk.bf16.gmra.mxu0 %vm294_vm0, %v11170_v10 }
  0x2b   :  { %10491 = vmatprep.mubr.msk.bf16.mxu0 %vm294_vm0, %v11171_v11 }
  0x32   :  { %10492 = vmatmul.mubr.msk.bf16.gmra.mxu0 %vm294_vm0, %v11172_v12 }
  0x33   :  { %10495 = vmatprep.mubr.msk.bf16.mxu0 %vm294_vm0, %v11173_v13 }
  0x3a   :  { %10496 = vmatmul.mubr.msk.bf16.gmra.mxu0 %vm294_vm0, %v11174_v14 }
  0x3b   :  { %10499 = vmatprep.mubr.msk.bf16.mxu0 %vm294_vm0, %v11175_v15 }
  0x42   :  { %10500 = vmatmul.mubr.msk.bf16.gmra.mxu0 %vm294_vm0, %v11176_v16 }
  0x43   :  { %10503 = vmatprep.mubr.msk.bf16.mxu0 %vm294_vm0, %v11177_v17 }
  0x4a   :  { %10504 = vmatmul.mubr.msk.bf16.gmra.mxu0 %vm294_vm0, %v11178_v18 }
  0x4b   :  { %10507 = vmatprep.mubr.msk.bf16.mxu0 %vm294_vm0, %v11179_v19 }
  0x52   :  { %10508 = vmatmul.mubr.msk.bf16.gmra.mxu0 %vm294_vm0, %v11180_v20 }
  0x53   :  { %10511 = vmatprep.mubr.msk.bf16.mxu0 %vm294_vm0, %v11181_v21 }
  0x5a   :  { %10512 = vmatmul.mubr.msk.bf16.gmra.mxu0 %vm294_vm0, %v11182_v22 }
  0x5b   :  { %10515 = vmatprep.mubr.msk.bf16.mxu0 %vm294_vm0, %v11183_v23 }
  0x62   :  { %10516 = vmatmul.mubr.msk.bf16.gmra.mxu0 %vm294_vm0, %v11184_v24 }
  0x63   :  { %10519 = vmatprep.mubr.msk.bf16.mxu0 %vm294_vm0, %v11185_v25 }
  0x6a   :  { %10520 = vmatmul.mubr.msk.bf16.gmra.mxu0 %vm294_vm0, %v11186_v26 }
  0x6b   :  { %10523 = vmatprep.mubr.msk.bf16.mxu0 %vm294_vm0, %v11187_v27 }
  0x72   :  { %10524 = vmatmul.mubr.msk.bf16.gmra.mxu0 %vm294_vm0, %v11188_v28 }
  0x73   :  { %10527 = vmatprep.mubr.msk.bf16.mxu0 %vm294_vm0, %v11189_v29 }
  0x7a   :  { %10528 = vmatmul.mubr.msk.bf16.gmra.mxu0 %vm294_vm0, %v11190_v30 }
  0x7b   :  { %10531 = vmatprep.mubr.msk.bf16.mxu0 %vm294_vm0, %v11191_v31 }
  0x82   :  { %10532 = vmatmul.mubr.msk.bf16.gmra.mxu0 %vm294_vm0, %v11192_v32 }
  0x83   :  { %1387 = vmatprep.mubr.bf16.mxu0 %v11198_v34 }
  0xca   :  { %v10473_v35 = vpop.f32.mrf.mxu0 }
  0xcb   :  { %v434_v38 = vadd.f32 %v10473_v35, %v11950_v36 }
  0xcc   :  { %v11952_v37 = vpop.f32.mrf.mxu0 }
  0xcd   :  { %v682_v42 = vmax.f32 %v434_v38, 0.0 }
  0xce   :  { %v10474_v39 = vpop.f32.mrf.mxu0 }
  0xcf   :  { %v437_v40 = vadd.f32 %v10474_v39, %v11950_v36 }
  0xd0   :  { %v11956_v41 = vpop.f32.mrf.mxu0 }
  0xd1   :  { %v683_v43 = vmax.f32 %v437_v40, 0.0 }
  0xd2   :  { %v10477_v44 = vpop.f32.mrf.mxu0 }
  0xd3   :  { %v11958_v45 = vpack.c.bf16 %v683_v43, %v682_v42  ;;  %v450_v47 = vadd.f32 %v10477_v44, %v11950_v36 }
  0xd4   :  { %v11960_v46 = vpop.f32.mrf.mxu0 }
  0xd5   :  { %v686_v51 = vmax.f32 %v450_v47, 0.0 }
  0xd6   :  { %v10478_v48 = vpop.f32.mrf.mxu0 }
  0xd7   :  { %v453_v49 = vadd.f32 %v10478_v48, %v11950_v36 }
  0xd8   :  { %v11964_v50 = vpop.f32.mrf.mxu0 }
  0xd9   :  { %v687_v52 = vmax.f32 %v453_v49, 0.0 }
  0xda   :  { %v10481_v53 = vpop.f32.mrf.mxu0 }
  0xdb   :  { %v11966_v54 = vpack.c.bf16 %v687_v52, %v686_v51  ;;  %v11985_v10 = vadd.f32 %v10481_v53, %v11950_v36 }
  0xdc   :  { %v11968_v55 = vpop.f32.mrf.mxu0 }
  0xdd   :  { %v690_v16 = vmax.f32 %v11985_v10, 0.0 }
  0xde   :  { %v10482_v56 = vpop.f32.mrf.mxu0 }
  0xdf   :  { %v469_v24 = vadd.f32 %v10482_v56, %v11950_v36 }
  0xe0   :  { %v460_v57 = vpop.f32.mrf.mxu0 }
  0xe1   :  { %v461_v30 = vadd.f32 %v11950_v36, %v460_v57  ;;  %v691_v43 = vmax.f32 %v469_v24, 0.0 }
  0xe2   :  { %v10485_v58 = vpop.f32.mrf.mxu0 }
  0xe3   :  { %v482_v11 = vadd.f32 %v10485_v58, %v11950_v36  ;;  %v689_v49 = vmax.f32 %v461_v30, 0.0 }
  0xe4   :  { %v473_v59 = vpop.f32.mrf.mxu0 }
  0xe5   :  { %v694_v17 = vmax.f32 %v482_v11, 0.0  ;;  %v474_v31 = vadd.f32 %v11950_v36, %v473_v59 }
  0xe6   :  { %v10486_v60 = vpop.f32.mrf.mxu0 }
  0xe7   :  { %v485_v13 = vadd.f32 %v10486_v60, %v11950_v36  ;;  %v692_v51 = vmax.f32 %v474_v31, 0.0 }
  0xe8   :  { %v476_v61 = vpop.f32.mrf.mxu0 }
  0xe9   :  { %v477_v14 = vadd.f32 %v11950_v36, %v476_v61  ;;  %v695_v20 = vmax.f32 %v485_v13, 0.0 }
  0xea   :  { %v11970_v62 = vpop.f32.mrf.mxu0 }
  0xeb   :  { %v693_v21 = vmax.f32 %v477_v14, 0.0  ;;  %v12003_v40 = vpack.c.bf16 %v695_v20, %v694_v17  ;;  %v12037_v14 = vpack.c.bf16 %v691_v43, %v690_v16  ;;  %v498_v30 = vadd.f32 %v11970_v62, %v11950_v36 }
  0xec   :  { %v11972_v63 = vpop.f32.mrf.mxu0  ;;  %v429_v62 = vadd.f32 %v11950_v36, %v11956_v41 }
  0xed   :  { %v12018_v59 = vpack.c.bf16 %v693_v21, %v692_v51  ;;  %v698_v43 = vmax.f32 %v498_v30, 0.0  ;;  %v11213_v30 = vld [vmem:[%s14781_s3 + $0x164] ss:$16 sps:$4 sm:$0xff]  }
  0xee   :  { %v11974_v0 = vpop.f32.mrf.mxu0  ;;  %v681_v41 = vmax.f32 %v429_v62, 0.0 }
  0xef   :  { %v501_v24 = vadd.f32 %v11974_v0, %v11950_v36 }
  0xf0   :  { %v11976_v1 = vpop.f32.mrf.mxu0 }
  0xf2   :  { %v11978_v2 = vpop.f32.mrf.mxu0 }
  0xf3   :  { %v514_v11 = vadd.f32 %v11978_v2, %v11950_v36  ;;  %v445_v2 = vadd.f32 %v11950_v36, %v11964_v50 }
  0xf4   :  { %v11980_v3 = vpop.f32.mrf.mxu0 }
  0xf5   :  { %v702_v20 = vmax.f32 %v514_v11, 0.0  ;;  %v506_v16 = vadd.f32 %v11950_v36, %v11980_v3  ;;  %v442_v3 = vadd.f32 %v11950_v36, %v11960_v46  ;;  %v699_v46 = vmax.f32 %v501_v24, 0.0  ;;  %v11209_v24 = vld [vmem:[%s14781_s3 + $0x40] ss:$16 sps:$4 sm:$0xff]  }
  0xf6   :  { %v10494_v4 = vpop.f32.mrf.mxu0 }
  0xf7   :  { %v517_v61 = vadd.f32 %v10494_v4, %v11950_v36  ;;  %v700_v31 = vmax.f32 %v506_v16, 0.0  ;;  %v12095_v51 = vpack.c.bf16 %v699_v46, %v698_v43  ;;  %v11207_v16 = vld [vmem:[%s14781_s3 + $0x144] ss:$16 sps:$4 sm:$0xff]  }
  0xf8   :  { %v11982_v5 = vpop.f32.mrf.mxu0  ;;  %v11217_v43 = vld [vmem:[%s14781_s3 + $0x84] ss:$16 sps:$4 sm:$0xff]  }
  0xfa   :  { %v10497_v6 = vpop.f32.mrf.mxu0 }
  0xfb   :  { %v530_v32 = vadd.f32 %v10497_v6, %v11950_v36 }
  0xfc   :  { %v521_v7 = vpop.f32.mrf.mxu0 }
  0xfd   :  { %v706_v53 = vmax.f32 %v530_v32, 0.0  ;;  %v522_v56 = vadd.f32 %v11950_v36, %v521_v7  ;;  %v458_v7 = vadd.f32 %v11950_v36, %v11968_v55 }
  0xfe   :  { %v10498_v8 = vpop.f32.mrf.mxu0 }
  0xff   :  { %v533_v26 = vadd.f32 %v10498_v8, %v11950_v36  ;;  %v704_v13 = vmax.f32 %v522_v56, 0.0 }
 0x100   :  { %v524_v9 = vpop.f32.mrf.mxu0 }
 0x101   :  { %v525_v34 = vadd.f32 %v11950_v36, %v524_v9  ;;  %v707_v44 = vmax.f32 %v533_v26, 0.0 }
 0x102   :  { %v10501_v12 = vpop.f32.mrf.mxu0 }
 0x103   :  { %v546_v18 = vadd.f32 %v10501_v12, %v11950_v36  ;;  %v705_v57 = vmax.f32 %v525_v34, 0.0  ;;  %v12023_v6 = vpack.c.bf16 %v707_v44, %v706_v53  ;;  %v509_v12 = vadd.f32 %v11950_v36, %v11982_v5 }
 0x104   :  { %v537_v15 = vpop.f32.mrf.mxu0  ;;  %v688_v5 = vmax.f32 %v458_v7, 0.0  ;;  %v490_v44 = vadd.f32 %v11950_v36, %v11972_v63 }
 0x105   :  { %v538_v22 = vadd.f32 %v11950_v36, %v537_v15  ;;  %v710_v27 = vmax.f32 %v546_v18, 0.0  ;;  %v703_v15 = vmax.f32 %v517_v61, 0.0  ;;  %v12041_v17 = vpack.c.bf16 %v705_v57, %v704_v13  ;;  %v11193_v61 = vld [vmem:[%s14781_s3] ss:$16 sps:$4 sm:$0xff]  }
 0x106   :  { %v10502_v19 = vpop.f32.mrf.mxu0  ;;  %v701_v21 = vmax.f32 %v509_v12, 0.0  ;;  %v696_v63 = vmax.f32 %v490_v44, 0.0  ;;  %v11201_v12 = vld [vmem:[%s14781_s3 + $0x124] ss:$16 sps:$4 sm:$0xff]  }
 0x107   :  { %v549_v23 = vadd.f32 %v10502_v19, %v11950_v36  ;;  %v708_v35 = vmax.f32 %v538_v22, 0.0 }
 0x108   :  { %v540_v25 = vpop.f32.mrf.mxu0  ;;  %v12077_v34 = vpack.c.bf16 %v701_v21, %v700_v31 }
 0x109   :  { %v711_v28 = vmax.f32 %v549_v23, 0.0  ;;  %v541_v29 = vadd.f32 %v11950_v36, %v540_v25  ;;  %v12053_v23 = vpack.c.bf16 %v689_v49, %v688_v5  ;;  %v12059_v25 = vpack.c.bf16 %v703_v15, %v702_v20 }
 0x10a   :  { %v10505_v33 = vpop.f32.mrf.mxu0  ;;  %v426_v49 = vadd.f32 %v11950_v36, %v11952_v37 }
 0x10b   :  { %v12001_v38 = vpack.c.bf16 %v711_v28, %v710_v27  ;;  %v709_v39 = vmax.f32 %v541_v29, 0.0  ;;  %v562_v48 = vadd.f32 %v10505_v33, %v11950_v36  ;;  %v685_v29 = vmax.f32 %v445_v2, 0.0  ;;  %v11204_v2 = vld [vmem:[%s14781_s3 + $0x120] ss:$16 sps:$4 sm:$0xff]  }
 0x10c   :  { %v12005_v42 = vpop.f32.mrf.mxu0  ;;  %v493_v33 = vadd.f32 %v11950_v36, %v11976_v1  ;;  %v680_v57 = vmax.f32 %v426_v49, 0.0 }
 0x10d   :  { %v12007_v47 = vpack.c.bf16 %v709_v39, %v708_v35  ;;  %9208 = vmatprep.subr.bf16.mxu1 %v12001_v38  ;;  %9336 = vmatprep.subr.bf16.mxu0 %v12001_v38  ;;  %v714_v8 = vmax.f32 %v562_v48, 0.0  ;;  %v684_v35 = vmax.f32 %v442_v3, 0.0  ;;  %v11211_v3 = vld [vmem:[%s14781_s3 + $0x64] ss:$16 sps:$4 sm:$0xff]  }
 0x10e   :  { %v10506_v52 = vpop.f32.mrf.mxu0  ;;  %9209 = vmatpush3.bf16.msra.mxu1 %v12003_v40  ;;  %9337 = vmatpush3.bf16.msra.mxu0 %v12003_v40 }
 0x10f   :  { %v565_v58 = vadd.f32 %v10506_v52, %v11950_v36  ;;  %9210 = vmatprep.subr.bf16.mxu1 %v12007_v47  ;;  %9338 = vmatprep.subr.bf16.mxu0 %v12007_v47  ;;  %v12089_v1 = vpack.c.bf16 %v685_v29, %v684_v35  ;;  %v697_v52 = vmax.f32 %v493_v33, 0.0  ;;  %v11215_v33 = vld [vmem:[%s14781_s3 + $0x60] ss:$16 sps:$4 sm:$0xff]  }
 0x110   :  { %v12020_v60 = vpop.f32.mrf.mxu0  ;;  %v11216_v35 = vld [vmem:[%s14781_s3 + $0x160] ss:$16 sps:$4 sm:$0xff]  }
 0x111   :  { %v715_v9 = vmax.f32 %v565_v58, 0.0  ;;  %v12105_v58 = vpack.c.bf16 %v697_v52, %v696_v63  ;;  %v11219_v52 = vld [vmem:[%s14781_s3 + $0x184] ss:$16 sps:$4 sm:$0xff]  }
 0x112   :  { %v10509_v10 = vpop.f32.mrf.mxu0  ;;  %9211 = vmatpush3.bf16.msra.mxu1 %v12018_v59  ;;  %9339 = vmatpush3.bf16.msra.mxu0 %v12018_v59 }
 0x113   :  { %v12033_v4 = vpack.c.bf16 %v715_v9, %v714_v8  ;;  %9212 = vmatprep.subr.bf16.mxu1 %v12023_v6  ;;  %9340 = vmatprep.subr.bf16.mxu0 %v12023_v6  ;;  %v578_v18 = vadd.f32 %v10509_v10, %v11950_v36  ;;  %v11196_v8 = vld [vmem:[%s14781_s3 + $0x100] ss:$16 sps:$4 sm:$0xff]   ;;  %v12117_v9 = vpack.c.bf16 %v681_v41, %v680_v57  ;;  %v11199_v10 = vld [vmem:[%s14781_s3 + $0x24] ss:$16 sps:$4 sm:$0xff]  }
 0x114   :  { %v12039_v55 = vpop.f32.mrf.mxu0 }
 0x115   :  { %v718_v26 = vmax.f32 %v578_v18, 0.0  ;;  %v11203_v18 = vld [vmem:[%s14781_s3 + $0x20] ss:$16 sps:$4 sm:$0xff]  }
 0x116   :  { %v10510_v19 = vpop.f32.mrf.mxu0  ;;  %9213 = vmatpush3.bf16.msra.mxu1 %v12037_v14  ;;  %9341 = vmatpush3.bf16.msra.mxu0 %v12037_v14 }
 0x117   :  { %v581_v22 = vadd.f32 %v10510_v19, %v11950_v36  ;;  %9214 = vmatprep.subr.bf16.mxu1 %v12041_v17  ;;  %9342 = vmatprep.subr.bf16.mxu0 %v12041_v17  ;;  %v11205_v19 = vld [vmem:[%s14781_s3 + $0x44] ss:$16 sps:$4 sm:$0xff]  }
 0x118   :  { %v12055_v50 = vpop.f32.mrf.mxu0 }
 0x119   :  { %v719_v27 = vmax.f32 %v581_v22, 0.0 }
 0x11a   :  { %v12063_v28 = vpop.f32.mrf.mxu0  ;;  %9215 = vmatpush3.bf16.msra.mxu1 %v12053_v23  ;;  %9343 = vmatpush3.bf16.msra.mxu0 %v12053_v23 }
 0x11b   :  { %v12069_v32 = vpack.c.bf16 %v719_v27, %v718_v26  ;;  %9216 = vmatprep.subr.bf16.mxu1 %v12059_v25  ;;  %9344 = vmatprep.subr.bf16.mxu0 %v12059_v25  ;;  %v11210_v26 = vld [vmem:[%s14781_s3 + $0x140] ss:$16 sps:$4 sm:$0xff]  }
 0x11c   :  { %v12073_v0 = vpop.f32.mrf.mxu0 }
 0x11e   :  { %v12079_v39 = vpop.f32.mrf.mxu0  ;;  %9217 = vmatpush3.bf16.msra.mxu1 %v11966_v54  ;;  %9345 = vmatpush3.bf16.msra.mxu0 %v11966_v54 }
 0x11f   :  { %9218 = vmatprep.subr.bf16.mxu1 %v12077_v34  ;;  %9346 = vmatprep.subr.bf16.mxu0 %v12077_v34 }
 0x120   :  { %v12091_v48 = vpop.f32.mrf.mxu0 }
 0x122   :  { %v12097_v53 = vpop.f32.mrf.mxu0  ;;  %9219 = vmatpush3.bf16.msra.mxu1 %v12089_v1  ;;  %9347 = vmatpush3.bf16.msra.mxu0 %v12089_v1 }
 0x123   :  { %9220 = vmatprep.subr.bf16.mxu1 %v12095_v51  ;;  %9348 = vmatprep.subr.bf16.mxu0 %v12095_v51  ;;  %v610_v57 = vadd.f32 %v12097_v53, %v11950_v36  ;;  %v12210_v53 = vld [vmem:[%s14780_s2] ss:$0 sm:$0xff] }
 0x124   :  { %v12103_v56 = vpop.f32.mrf.mxu0 }
 0x126   :  { %v10518_v37 = vpop.f32.mrf.mxu0  ;;  %9221 = vmatpush3.bf16.msra.mxu1 %v11958_v45  ;;  %9349 = vmatpush3.bf16.msra.mxu0 %v11958_v45 }
 0x127   :  { %9222 = vmatprep.subr.bf16.mxu1 %v12105_v58  ;;  %9350 = vmatprep.subr.bf16.mxu0 %v12105_v58  ;;  %v613_v49 = vadd.f32 %v10518_v37, %v11950_v36 }
 0x128   :  { %v12119_v7 = vpop.f32.mrf.mxu0 }
 0x12a   :  { %v12124_v11 = vpop.f32.mrf.mxu0  ;;  %9223 = vmatpush3.bf16.msra.mxu1 %v12117_v9  ;;  %9351 = vmatpush3.bf16.msra.mxu0 %v12117_v9 }
 0x12b   :  { %9464 = vmatprep.subr.bf16.mxu0 %v12001_v38 }
 0x12c   :  { %v12132_v13 = vpop.f32.mrf.mxu0 }
 0x12d   :  { %1001 = vmatmul.mubr.bf16.vlgmr.msra.gmra.mxu1 %v11193_v61  ;;  %1388 = vmatmul.mubr.bf16.vlgmr.msra.gmra.mxu0 %v11196_v8  ;;  %v727_v8 = vmax.f32 %v613_v49, 0.0 }
 0x12e   :  { %v12134_v15 = vpop.f32.mrf.mxu0  ;;  %9465 = vmatpush3.bf16.msra.mxu0 %v12003_v40  ;;  %1008 = vmatprep.mubr.bf16.mxu1 %v11199_v10 }
 0x12f   :  { %9466 = vmatprep.subr.bf16.mxu0 %v12007_v47  ;;  %1395 = vmatprep.mubr.bf16.mxu0 %v11201_v12  ;;  %v11221_v12 = vld [vmem:[%s14781_s3 + $0x80] ss:$16 sps:$4 sm:$0xff]  }
 0x130   :  { %v12144_v5 = vpop.f32.mrf.mxu0 }
 0x132   :  { %v12149_v20 = vpop.f32.mrf.mxu0  ;;  %9467 = vmatpush3.bf16.msra.mxu0 %v12018_v59 }
 0x133   :  { %9468 = vmatprep.subr.bf16.mxu0 %v12023_v6 }
 0x134   :  { %v12156_v21 = vpop.f32.mrf.mxu0 }
 0x135   :  { %1009 = vmatmul.mubr.bf16.gmra.mxu1 %v11203_v18  ;;  %1396 = vmatmul.mubr.bf16.gmra.mxu0 %v11204_v2  ;;  %v605_v18 = vadd.f32 %v12210_v53, %v12119_v7 }
 0x136   :  { %v12158_v22 = vpop.f32.mrf.mxu0  ;;  %9469 = vmatpush3.bf16.msra.mxu0 %v12037_v14  ;;  %1016 = vmatprep.mubr.bf16.mxu1 %v11205_v19 }
 0x137   :  { %9470 = vmatprep.subr.bf16.mxu0 %v12041_v17  ;;  %1403 = vmatprep.mubr.bf16.mxu0 %v11207_v16 }
 0x138   :  { %v12168_v27 = vpop.f32.mrf.mxu0 }
 0x13a   :  { %v10529_v29 = vpop.f32.mrf.mxu0  ;;  %9471 = vmatpush3.bf16.msra.mxu0 %v12053_v23 }
 0x13b   :  { %9472 = vmatprep.subr.bf16.mxu0 %v12059_v25 }
 0x13c   :  { %v12178_v31 = vpop.f32.mrf.mxu0 }
 0x13d   :  { %1017 = vmatmul.mubr.bf16.gmra.mxu1 %v11209_v24  ;;  %1404 = vmatmul.mubr.bf16.gmra.mxu0 %v11210_v26 }
 0x13e   :  { %v10530_v46 = vpop.f32.mrf.mxu0  ;;  %9473 = vmatpush3.bf16.msra.mxu0 %v11966_v54  ;;  %1024 = vmatprep.mubr.bf16.mxu1 %v11211_v3 }
 0x13f   :  { %9474 = vmatprep.subr.bf16.mxu0 %v12077_v34  ;;  %1411 = vmatprep.mubr.bf16.mxu0 %v11213_v30  ;;  %v661_v19 = vadd.f32 %v12210_v53, %v10530_v46 }
 0x140   :  { %v652_v62 = vpop.f32.mrf.mxu0 }
 0x142   :  { %v10533_v44 = vpop.f32.mrf.mxu0  ;;  %9475 = vmatpush3.bf16.msra.mxu0 %v12089_v1 }
 0x143   :  { %9476 = vmatprep.subr.bf16.mxu0 %v12095_v51  ;;  %v674_v63 = vadd.f32 %v10533_v44, %v11950_v36 }
 0x144   :  { %v665_v41 = vpop.f32.mrf.mxu0 }
 0x145   :  { %1025 = vmatmul.mubr.bf16.gmra.mxu1 %v11215_v33  ;;  %1412 = vmatmul.mubr.bf16.gmra.mxu0 %v11216_v35  ;;  %v666_v37 = vadd.f32 %v11950_v36, %v665_v41  ;;  %v742_v16 = vmax.f32 %v674_v63, 0.0 }
 0x146   :  { %v10534_v61 = vpop.f32.mrf.mxu0  ;;  %9477 = vmatpush3.bf16.msra.mxu0 %v11958_v45  ;;  %1032 = vmatprep.mubr.bf16.mxu1 %v11217_v43 }
 0x147   :  { %v677_v10 = vadd.f32 %v10534_v61, %v11950_v36  ;;  %9478 = vmatprep.subr.bf16.mxu0 %v12105_v58  ;;  %1419 = vmatprep.mubr.bf16.mxu0 %v11219_v52 }
 0x148   :  { %v668_v2 = vpop.f32.mrf.mxu0 }
 0x149   :  { %v743_v36 = vmax.f32 %v677_v10, 0.0  ;;  %v669_v24 = vadd.f32 %v12210_v53, %v668_v2 }
 0x14a   :  { %21 = vsyncpa [#allocation3], 0  ;;  %v726_v26 = vmax.f32 %v610_v57, 0.0  ;;  %v602_v3 = vadd.f32 %v12210_v53, %v12103_v56  ;;  %9479 = vmatpush3.bf16.msra.mxu0 %v12117_v9  ;;  %v11222_v30 = vld [vmem:[%s14781_s3 + $0x180] ss:$16 sps:$4 sm:$0xff]   ;;  %v658_v7 = vadd.f32 %v12210_v53, %v10529_v29  ;;  %v740_v33 = vmax.f32 %v666_v37, 0.0 }
 0x14b   :  { %v12223_v35 = vpack.c.bf16 %v743_v36, %v742_v16  ;;  %v741_v46 = vmax.f32 %v669_v24, 0.0  ;;  %9592 = vmatprep.subr.bf16.mxu0 %v12001_v38  ;;  %v11223_v43 = vld [vmem:[%s14781_s3 + $0xa4] ss:$16 sps:$4 sm:$0xff]   ;;  %v597_v56 = vadd.f32 %v12210_v53, %v12079_v39  ;;  %v725_v49 = vmax.f32 %v605_v18, 0.0 }
 0x14c   :  { %v12231_v44 = vpack.c.bf16 %v727_v8, %v726_v26  ;;  %v11225_v29 = vld [vmem:[%s14781_s3 + $0x1a4] ss:$16 sps:$4 sm:$0xff]   ;;  %v739_v52 = vmax.f32 %v661_v19, 0.0  ;;  %v653_v41 = vadd.f32 %v12210_v53, %v652_v62  ;;  %v594_v38 = vadd.f32 %v12210_v53, %v12063_v28 }
 0x14d   :  { %v12237_v63 = vpack.c.bf16 %v741_v46, %v740_v33  ;;  %1033 = vmatmul.mubr.bf16.gmra.mxu1 %v11221_v12  ;;  %9272 = vmatprep.subr.bf16.mxu1 %v12223_v35  ;;  %v724_v57 = vmax.f32 %v602_v3, 0.0  ;;  %v738_v39 = vmax.f32 %v658_v7, 0.0  ;;  %v650_v61 = vadd.f32 %v12210_v53, %v12178_v31  ;;  %v11227_v31 = vld [vmem:[%s14781_s3 + $0xa0] ss:$16 sps:$4 sm:$0xff]   ;;  %v11229_v16 = vld [vmem:[%s14781_s3 + $0xc4] ss:$16 sps:$4 sm:$0xff]  }
 0x14e   :  { %1420 = vmatmul.mubr.bf16.gmra.mxu0 %v11222_v30  ;;  %9273 = vmatpush3.bf16.msra.mxu1 %v12231_v44  ;;  %v723_v62 = vmax.f32 %v597_v56, 0.0  ;;  %v589_v8 = vadd.f32 %v12210_v53, %v12091_v48  ;;  %v645_v28 = vadd.f32 %v12210_v53, %v12158_v22  ;;  %v737_v12 = vmax.f32 %v653_v41, 0.0  ;;  %v11228_v48 = vld [vmem:[%s14781_s3 + $0x1a0] ss:$16 sps:$4 sm:$0xff]   ;;  %v11235_v41 = vld [vmem:[%s14781_s3 + $0xe4] ss:$16 sps:$4 sm:$0xff]  }
 0x14f   :  { %9274 = vmatprep.subr.bf16.mxu1 %v12237_v63  ;;  %1040 = vmatprep.mubr.bf16.mxu1 %v11223_v43  ;;  %v12248_v37 = vpack.c.bf16 %v725_v49, %v724_v57  ;;  %v12252_v10 = vpack.c.bf16 %v739_v52, %v738_v39  ;;  %v722_v18 = vmax.f32 %v594_v38, 0.0  ;;  %v586_v2 = vadd.f32 %v12210_v53, %v12073_v0  ;;  %v11231_v0 = vld [vmem:[%s14781_s3 + $0x1c4] ss:$16 sps:$4 sm:$0xff]  }
 0x150   :  { %1427 = vmatprep.mubr.bf16.mxu0 %v11225_v29  ;;  %v642_v22 = vadd.f32 %v12210_v53, %v12149_v20  ;;  %v736_v19 = vmax.f32 %v650_v61, 0.0  ;;  %v721_v24 = vmax.f32 %v589_v8, 0.0  ;;  %v735_v26 = vmax.f32 %v645_v28, 0.0  ;;  %v11233_v29 = vld [vmem:[%s14781_s3 + $0xc0] ss:$16 sps:$4 sm:$0xff]  }
 0x151   :  { %v12269_v36 = vpack.c.bf16 %v723_v62, %v722_v18  ;;  %v637_v3 = vadd.f32 %v12210_v53, %v12168_v27  ;;  %v720_v20 = vmax.f32 %v586_v2, 0.0  ;;  %v634_v33 = vadd.f32 %v12210_v53, %v12156_v21  ;;  %v11239_v18 = vld [vmem:[%s14781_s3 + $0xe0] ss:$16 sps:$4 sm:$0xff]  }
 0x152   :  { %9275 = vmatpush3.bf16.msra.mxu1 %v12248_v37  ;;  %v12276_v30 = vpack.c.bf16 %v737_v12, %v736_v19  ;;  %v734_v7 = vmax.f32 %v642_v22, 0.0  ;;  %v573_v46 = vadd.f32 %v12210_v53, %v12055_v50  ;;  %v629_v27 = vadd.f32 %v12210_v53, %v12134_v15  ;;  %v11234_v50 = vld [vmem:[%s14781_s3 + $0x1c0] ss:$16 sps:$4 sm:$0xff]   ;;  %v11246_v19 = vld [vmem:[%s14781_s3 + $0x204] ss:$16 sps:$4 sm:$0xff]  }
 0x153   :  { %9276 = vmatprep.subr.bf16.mxu1 %v12252_v10  ;;  %v12284_v43 = vpack.c.bf16 %v721_v24, %v720_v20  ;;  %v733_v49 = vmax.f32 %v637_v3, 0.0  ;;  %v570_v21 = vadd.f32 %v12210_v53, %v12039_v55  ;;  %v626_v52 = vadd.f32 %v12210_v53, %v12124_v11  ;;  %v11237_v55 = vld [vmem:[%s14781_s3 + $0x1e4] ss:$16 sps:$4 sm:$0xff]   ;;  %v11241_v24 = vld [vmem:[%s14781_s3 + $0x8] ss:$16 sps:$4 sm:$0xff]  }
 0x154   :  { %v12288_v56 = vpack.c.bf16 %v735_v26, %v734_v7  ;;  %v732_v15 = vmax.f32 %v634_v33, 0.0  ;;  %v717_v38 = vmax.f32 %v573_v46, 0.0  ;;  %v731_v57 = vmax.f32 %v629_v27, 0.0  ;;  %v11247_v26 = vld [vmem:[%s14781_s3 + $0x2c] ss:$16 sps:$4 sm:$0xff]  }
 0x155   :  { %1041 = vmatmul.mubr.bf16.gmra.mxu1 %v11227_v31  ;;  %v621_v39 = vadd.f32 %v12210_v53, %v12144_v5  ;;  %v716_v11 = vmax.f32 %v570_v21, 0.0  ;;  %v730_v62 = vmax.f32 %v626_v52, 0.0  ;;  %v618_v8 = vadd.f32 %v12210_v53, %v12132_v13  ;;  %v11240_v13 = vld [vmem:[%s14781_s3 + $0x1e0] ss:$16 sps:$4 sm:$0xff]   ;;  %v11295_v3 = vld [vmem:[%s14781_s3 + $0x224] ss:$16 sps:$4 sm:$0xff]  }
 0x156   :  { %1428 = vmatmul.mubr.bf16.gmra.mxu0 %v11228_v48  ;;  %9277 = vmatpush3.bf16.msra.mxu1 %v12269_v36  ;;  %v12310_v61 = vpack.c.bf16 %v733_v49, %v732_v15  ;;  %v557_v28 = vadd.f32 %v12210_v53, %v12020_v60  ;;  %v554_v2 = vadd.f32 %v12210_v53, %v12005_v42  ;;  %v11243_v48 = vld [vmem:[%s14781_s3 + $0xc] ss:$16 sps:$4 sm:$0xff]   ;;  %v11249_v20 = vld [vmem:[%s14781_s3 + $0x28] ss:$16 sps:$4 sm:$0xff]   ;;  %v11319_v46 = vld [vmem:[%s14781_s3 + $0x2a0] ss:$16 sps:$4 sm:$0xff]  }
 0x157   :  { %9278 = vmatprep.subr.bf16.mxu1 %v12276_v30  ;;  %1048 = vmatprep.mubr.bf16.mxu1 %v11229_v16  ;;  %v12318_v12 = vpack.c.bf16 %v717_v38, %v716_v11  ;;  %v12320_v5 = vpack.c.bf16 %v731_v57, %v730_v62  ;;  %v729_v31 = vmax.f32 %v621_v39, 0.0  ;;  %v728_v60 = vmax.f32 %v618_v8, 0.0  ;;  %v11250_v7 = vld [vmem:[%s14781_s3 + $0x4c] ss:$16 sps:$4 sm:$0xff]   ;;  %v11261_v33 = vld [vmem:[%s14781_s3 + $0xa8] ss:$16 sps:$4 sm:$0xff]  }
 0x158   :  { %1435 = vmatprep.mubr.bf16.mxu0 %v11231_v0  ;;  %v713_v22 = vmax.f32 %v557_v28, 0.0  ;;  %v712_v42 = vmax.f32 %v554_v2, 0.0  ;;  %v11244_v0 = vld [vmem:[%s14781_s3 + $0x200] ss:$16 sps:$4 sm:$0xff]   ;;  %v11327_v27 = vld [vmem:[%s14781_s3 + $0x2c4] ss:$16 sps:$4 sm:$0xff]  }
 0x159   :  { %v12338_v16 = vpack.c.bf16 %v729_v31, %v728_v60  ;;  %v11264_v49 = vld [vmem:[%s14781_s3 + $0xc8] ss:$16 sps:$4 sm:$0xff]   ;;  %v11325_v21 = vld [vmem:[%s14781_s3 + $0x2c0] ss:$16 sps:$4 sm:$0xff]   ;;  %v11270_v15 = vld [vmem:[%s14781_s3 + $0x10c] ss:$16 sps:$4 sm:$0xff]  }
 0x15a   :  { %9279 = vmatpush3.bf16.msra.mxu1 %v12284_v43  ;;  %v12342_v53 = vpack.c.bf16 %v713_v22, %v712_v42  ;;  %v11267_v52 = vld [vmem:[%s14781_s3 + $0xe8] ss:$16 sps:$4 sm:$0xff]   ;;  %v11339_v38 = vld [vmem:[%s14781_s3 + $0x304] ss:$16 sps:$4 sm:$0xff]   ;;  %v11271_v57 = vld [vmem:[%s14781_s3 + $0x12c] ss:$16 sps:$4 sm:$0xff]  }
 0x15b   :  { %9280 = vmatprep.subr.bf16.mxu1 %v12288_v56  ;;  %v11337_v39 = vld [vmem:[%s14781_s3 + $0x300] ss:$16 sps:$4 sm:$0xff]   ;;  %v11345_v11 = vld [vmem:[%s14781_s3 + $0x324] ss:$16 sps:$4 sm:$0xff]   ;;  %v11273_v62 = vld [vmem:[%s14781_s3 + $0x128] ss:$16 sps:$4 sm:$0xff]  }
 0x15c   :  { %v11274_v8 = vld [vmem:[%s14781_s3 + $0x14c] ss:$16 sps:$4 sm:$0xff]   ;;  %v11343_v28 = vld [vmem:[%s14781_s3 + $0x320] ss:$16 sps:$4 sm:$0xff]   ;;  %v11351_v31 = vld [vmem:[%s14781_s3 + $0x344] ss:$16 sps:$4 sm:$0xff]  }
 0x15d   :  { %1049 = vmatmul.mubr.bf16.gmra.mxu1 %v11233_v29  ;;  %v11265_v29 = vld [vmem:[%s14781_s3 + $0xec] ss:$16 sps:$4 sm:$0xff]   ;;  %v11357_v60 = vld [vmem:[%s14781_s3 + $0x364] ss:$16 sps:$4 sm:$0xff]   ;;  %vm5291_vm1 = vcmask 261120   ;;  %vm11723_vm2 = vmmov 0  }
 0x15e   :  { %1436 = vmatmul.mubr.bf16.gmra.mxu0 %v11234_v50  ;;  %9281 = vmatpush3.bf16.msra.mxu1 %v12069_v32  ;;  %v11333_v50 = vld [vmem:[%s14781_s3 + $0x2e4] ss:$16 sps:$4 sm:$0xff]   ;;  %v11277_v2 = vld [vmem:[%s14781_s3 + $0x16c] ss:$16 sps:$4 sm:$0xff]   ;;  %vm6947_vm3 = vcmask 1043456   ;;  %vm6943_vm4 = vcmask 64512  }
 0x15f   :  { %9282 = vmatprep.subr.bf16.mxu1 %v12310_v61  ;;  %1056 = vmatprep.mubr.bf16.mxu1 %v11235_v41  ;;  %v11331_v41 = vld [vmem:[%s14781_s3 + $0x2e0] ss:$16 sps:$4 sm:$0xff]   ;;  %v11280_v22 = vld [vmem:[%s14781_s3 + $0x18c] ss:$16 sps:$4 sm:$0xff]   ;;  %v11363_v42 = vld [vmem:[%s14781_s3 + $0x384] ss:$16 sps:$4 sm:$0xff]  }
 0x160   :  { %1443 = vmatprep.mubr.bf16.mxu0 %v11237_v55  ;;  %v11268_v55 = vld [vmem:[%s14781_s3 + $0x108] ss:$16 sps:$4 sm:$0xff]  }
 0x162   :  { %9283 = vmatpush3.bf16.msra.mxu1 %v12318_v12 }
 0x163   :  { %9284 = vmatprep.subr.bf16.mxu1 %v12320_v5 }
 0x165   :  { %1057 = vmatmul.mubr.bf16.gmra.mxu1 %v11239_v18  ;;  %v11276_v18 = vld [vmem:[%s14781_s3 + $0x148] ss:$16 sps:$4 sm:$0xff]  }
 0x166   :  { %1444 = vmatmul.mubr.bf16.gmra.mxu0 %v11240_v13  ;;  %9285 = vmatpush3.bf16.msra.mxu1 %v12033_v4  ;;  %v11349_v13 = vld [vmem:[%s14781_s3 + $0x340] ss:$16 sps:$4 sm:$0xff]  }
 0x167   :  { %9286 = vmatprep.subr.bf16.mxu1 %v12338_v16  ;;  %1097 = vmatprep.mubr.bf16.mxu1 %v11243_v48  ;;  %v11279_v48 = vld [vmem:[%s14781_s3 + $0x168] ss:$16 sps:$4 sm:$0xff]  }
 0x168   :  { %1790 = vmatprep.mubr.bf16.mxu0 %v11246_v19  ;;  %v11355_v19 = vld [vmem:[%s14781_s3 + $0x360] ss:$16 sps:$4 sm:$0xff]  }
 0x16a   :  { %9287 = vmatpush3.bf16.msra.mxu1 %v12342_v53 }
 0x16b   :  { %9400 = vmatprep.subr.bf16.mxu1 %v12223_v35 }
 0x16d   :  { %1098 = vmatmul.mubr.bf16.vlgmr.msra.gmra.mxu1 %v11241_v24  ;;  %v11282_v24 = vld [vmem:[%s14781_s3 + $0x188] ss:$16 sps:$4 sm:$0xff]  }
 0x16e   :  { %1791 = vmatmul.mubr.bf16.vlgmr.msra.gmra.mxu0 %v11244_v0  ;;  %9401 = vmatpush3.bf16.msra.mxu1 %v12231_v44  ;;  %v11283_v0 = vld [vmem:[%s14781_s3 + $0x1ac] ss:$16 sps:$4 sm:$0xff]  }
 0x16f   :  { %9593 = vmatpush3.bf16.msra.mxu0 %v12003_v40  ;;  %9402 = vmatprep.subr.bf16.mxu1 %v12237_v63  ;;  %v11297_v40 = vld [vmem:[%s14781_s3 + $0x220] ss:$16 sps:$4 sm:$0xff]  }
 0x170   :  { %9594 = vmatprep.subr.bf16.mxu0 %v12007_v47  ;;  %1105 = vmatprep.mubr.bf16.mxu1 %v11247_v26  ;;  %v11301_v47 = vld [vmem:[%s14781_s3 + $0x244] ss:$16 sps:$4 sm:$0xff]   ;;  %v11361_v26 = vld [vmem:[%s14781_s3 + $0x380] ss:$16 sps:$4 sm:$0xff]  }
 0x171   :  { %1798 = vmatprep.mubr.bf16.mxu0 %v11295_v3  ;;  %v11369_v3 = vld [vmem:[%s14781_s3 + $0x3a4] ss:$16 sps:$4 sm:$0xff]  }
 0x172   :  { %9403 = vmatpush3.bf16.msra.mxu1 %v12248_v37 }
 0x173   :  { %9595 = vmatpush3.bf16.msra.mxu0 %v12018_v59  ;;  %9404 = vmatprep.subr.bf16.mxu1 %v12252_v10  ;;  %v11252_v59 = vld [vmem:[%s14781_s3 + $0x48] ss:$16 sps:$4 sm:$0xff]  }
 0x174   :  { %9596 = vmatprep.subr.bf16.mxu0 %v12023_v6  ;;  %v11253_v6 = vld [vmem:[%s14781_s3 + $0x6c] ss:$16 sps:$4 sm:$0xff]  }
 0x175   :  { %1106 = vmatmul.mubr.bf16.gmra.mxu1 %v11249_v20  ;;  %v11285_v20 = vld [vmem:[%s14781_s3 + $0x1a8] ss:$16 sps:$4 sm:$0xff]  }
 0x176   :  { %9405 = vmatpush3.bf16.msra.mxu1 %v12269_v36  ;;  %1113 = vmatprep.mubr.bf16.mxu1 %v11250_v7  ;;  %v11367_v7 = vld [vmem:[%s14781_s3 + $0x3a0] ss:$16 sps:$4 sm:$0xff]  }
 0x177   :  { %9597 = vmatpush3.bf16.msra.mxu0 %v12037_v14  ;;  %9406 = vmatprep.subr.bf16.mxu1 %v12276_v30  ;;  %v11303_v14 = vld [vmem:[%s14781_s3 + $0x240] ss:$16 sps:$4 sm:$0xff]  }
 0x178   :  { %9598 = vmatprep.subr.bf16.mxu0 %v12041_v17  ;;  %1799 = vmatmul.mubr.bf16.gmra.mxu0 %v11297_v40  ;;  %v11307_v17 = vld [vmem:[%s14781_s3 + $0x264] ss:$16 sps:$4 sm:$0xff]  }
 0x179   :  { %1806 = vmatprep.mubr.bf16.mxu0 %v11301_v47  ;;  %v11375_v40 = vld [vmem:[%s14781_s3 + $0x3c4] ss:$16 sps:$4 sm:$0xff]   ;;  %v11288_v47 = vld [vmem:[%s14781_s3 + $0x1c8] ss:$16 sps:$4 sm:$0xff]  }
 0x17a   :  { %9407 = vmatpush3.bf16.msra.mxu1 %v12284_v43 }
 0x17b   :  { %9599 = vmatpush3.bf16.msra.mxu0 %v12053_v23  ;;  %9408 = vmatprep.subr.bf16.mxu1 %v12288_v56  ;;  %v11255_v23 = vld [vmem:[%s14781_s3 + $0x68] ss:$16 sps:$4 sm:$0xff]  }
 0x17c   :  { %9600 = vmatprep.subr.bf16.mxu0 %v12059_v25  ;;  %v11256_v25 = vld [vmem:[%s14781_s3 + $0x8c] ss:$16 sps:$4 sm:$0xff]  }
 0x17d   :  { %1114 = vmatmul.mubr.bf16.gmra.mxu1 %v11252_v59  ;;  %v11289_v59 = vld [vmem:[%s14781_s3 + $0x1ec] ss:$16 sps:$4 sm:$0xff]  }
 0x17e   :  { %9409 = vmatpush3.bf16.msra.mxu1 %v12069_v32  ;;  %1121 = vmatprep.mubr.bf16.mxu1 %v11253_v6  ;;  %v11373_v6 = vld [vmem:[%s14781_s3 + $0x3c0] ss:$16 sps:$4 sm:$0xff]  }
 0x17f   :  { %9601 = vmatpush3.bf16.msra.mxu0 %v11966_v54  ;;  %9410 = vmatprep.subr.bf16.mxu1 %v12310_v61  ;;  %v11309_v54 = vld [vmem:[%s14781_s3 + $0x260] ss:$16 sps:$4 sm:$0xff]  }
 0x180   :  { %9602 = vmatprep.subr.bf16.mxu0 %v12077_v34  ;;  %1807 = vmatmul.mubr.bf16.gmra.mxu0 %v11303_v14  ;;  %v11315_v34 = vld [vmem:[%s14781_s3 + $0x284] ss:$16 sps:$4 sm:$0xff]  }
 0x181   :  { %1814 = vmatprep.mubr.bf16.mxu0 %v11307_v17  ;;  %v11381_v14 = vld [vmem:[%s14781_s3 + $0x3e4] ss:$16 sps:$4 sm:$0xff]   ;;  %v11291_v17 = vld [vmem:[%s14781_s3 + $0x1e8] ss:$16 sps:$4 sm:$0xff]  }
 0x182   :  { %9411 = vmatpush3.bf16.msra.mxu1 %v12318_v12 }
 0x183   :  { %9603 = vmatpush3.bf16.msra.mxu0 %v12089_v1  ;;  %9412 = vmatprep.subr.bf16.mxu1 %v12320_v5  ;;  %v11258_v1 = vld [vmem:[%s14781_s3 + $0x88] ss:$16 sps:$4 sm:$0xff]  }
 0x184   :  { %9604 = vmatprep.subr.bf16.mxu0 %v12095_v51  ;;  %v11259_v51 = vld [vmem:[%s14781_s3 + $0xac] ss:$16 sps:$4 sm:$0xff]  }
 0x185   :  { %1122 = vmatmul.mubr.bf16.gmra.mxu1 %v11255_v23  ;;  %v11294_v23 = vld [vmem:[%s14781_s3 + $0x20c] ss:$16 sps:$4 sm:$0xff]  }
 0x186   :  { %9413 = vmatpush3.bf16.msra.mxu1 %v12033_v4  ;;  %1129 = vmatprep.mubr.bf16.mxu1 %v11256_v25  ;;  %v11379_v25 = vld [vmem:[%s14781_s3 + $0x3e0] ss:$16 sps:$4 sm:$0xff]  }
 0x187   :  { %9605 = vmatpush3.bf16.msra.mxu0 %v11958_v45  ;;  %9414 = vmatprep.subr.bf16.mxu1 %v12338_v16  ;;  %v11313_v45 = vld [vmem:[%s14781_s3 + $0x280] ss:$16 sps:$4 sm:$0xff]  }
 0x188   :  { %9606 = vmatprep.subr.bf16.mxu0 %v12105_v58  ;;  %1815 = vmatmul.mubr.bf16.gmra.mxu0 %v11309_v54  ;;  %v11321_v58 = vld [vmem:[%s14781_s3 + $0x2a4] ss:$16 sps:$4 sm:$0xff]   ;;  %v11292_v54 = vld [vmem:[%s14781_s3 + $0x208] ss:$16 sps:$4 sm:$0xff]  }
 0x189   :  { %1822 = vmatprep.mubr.bf16.mxu0 %v11315_v34  ;;  %v11298_v34 = vld [vmem:[%s14781_s3 + $0x22c] ss:$16 sps:$4 sm:$0xff]  }
 0x18a   :  { %9415 = vmatpush3.bf16.msra.mxu1 %v12342_v53 }
 0x18b   :  { %9607 = vmatpush3.bf16.msra.mxu0 %v12117_v9  ;;  %9528 = vmatprep.subr.bf16.mxu1 %v12223_v35  ;;  %v11262_v9 = vld [vmem:[%s14781_s3 + $0xcc] ss:$16 sps:$4 sm:$0xff]  }
 0x18d   :  { %1130 = vmatmul.mubr.bf16.gmra.mxu1 %v11258_v1 }
 0x18e   :  { %1137 = vmatprep.mubr.bf16.mxu1 %v11259_v51 }
 0x190   :  { %1823 = vmatmul.mubr.bf16.gmra.mxu0 %v11313_v45 }
 0x191   :  { %1830 = vmatprep.mubr.bf16.mxu0 %v11321_v58 }
 0x195   :  { %1138 = vmatmul.mubr.bf16.gmra.mxu1 %v11261_v33 }
 0x196   :  { %1145 = vmatprep.mubr.bf16.mxu1 %v11262_v9 }
 0x198   :  { %1831 = vmatmul.mubr.bf16.gmra.mxu0 %v11319_v46 }
 0x199   :  { %1838 = vmatprep.mubr.bf16.mxu0 %v11327_v27  ;;  %v11300_v27 = vld [vmem:[%s14781_s3 + $0x228] ss:$16 sps:$4 sm:$0xff]  }
 0x19d   :  { %1146 = vmatmul.mubr.bf16.gmra.mxu1 %v11264_v49 }
 0x19e   :  { %1153 = vmatprep.mubr.bf16.mxu1 %v11265_v29 }
 0x1a0   :  { %1839 = vmatmul.mubr.bf16.gmra.mxu0 %v11325_v21 }
 0x1a1   :  { %1846 = vmatprep.mubr.bf16.mxu0 %v11333_v50 }
 0x1a5   :  { %1154 = vmatmul.mubr.bf16.gmra.mxu1 %v11267_v52 }
 0x1a6   :  { %1484 = vmatprep.mubr.bf16.mxu1 %v11270_v15 }
 0x1a8   :  { %1847 = vmatmul.mubr.bf16.gmra.mxu0 %v11331_v41 }
 0x1a9   :  { %2193 = vmatprep.mubr.bf16.mxu0 %v11339_v38 }
 0x1ad   :  { %1485 = vmatmul.mubr.bf16.vlgmr.msra.gmra.mxu1 %v11268_v55  ;;  %v11306_v55 = vld [vmem:[%s14781_s3 + $0x248] ss:$16 sps:$4 sm:$0xff]  }
 0x1ae   :  { %9529 = vmatpush3.bf16.msra.mxu1 %v12231_v44  ;;  %1492 = vmatprep.mubr.bf16.mxu1 %v11271_v57 }
 0x1af   :  { %9530 = vmatprep.subr.bf16.mxu1 %v12237_v63 }
 0x1b0   :  { %2194 = vmatmul.mubr.bf16.vlgmr.msra.gmra.mxu0 %v11337_v39 }
 0x1b1   :  { %2201 = vmatprep.mubr.bf16.mxu0 %v11345_v11 }
 0x1b2   :  { %9531 = vmatpush3.bf16.msra.mxu1 %v12248_v37 }
 0x1b3   :  { %9532 = vmatprep.subr.bf16.mxu1 %v12252_v10 }
 0x1b5   :  { %1493 = vmatmul.mubr.bf16.gmra.mxu1 %v11273_v62 }
 0x1b6   :  { %9533 = vmatpush3.bf16.msra.mxu1 %v12269_v36  ;;  %1500 = vmatprep.mubr.bf16.mxu1 %v11274_v8 }
 0x1b7   :  { %9534 = vmatprep.subr.bf16.mxu1 %v12276_v30 }
 0x1b8   :  { %2202 = vmatmul.mubr.bf16.gmra.mxu0 %v11343_v28 }
 0x1b9   :  { %2209 = vmatprep.mubr.bf16.mxu0 %v11351_v31 }
 0x1ba   :  { %9535 = vmatpush3.bf16.msra.mxu1 %v12284_v43 }
 0x1bb   :  { %9536 = vmatprep.subr.bf16.mxu1 %v12288_v56 }
 0x1bd   :  { %1501 = vmatmul.mubr.bf16.gmra.mxu1 %v11276_v18 }
 0x1be   :  { %9537 = vmatpush3.bf16.msra.mxu1 %v12069_v32  ;;  %1508 = vmatprep.mubr.bf16.mxu1 %v11277_v2  ;;  %v11312_v2 = vld [vmem:[%s14781_s3 + $0x268] ss:$16 sps:$4 sm:$0xff]  }
 0x1bf   :  { %9538 = vmatprep.subr.bf16.mxu1 %v12310_v61 }
 0x1c0   :  { %2210 = vmatmul.mubr.bf16.gmra.mxu0 %v11349_v13 }
 0x1c1   :  { %2217 = vmatprep.mubr.bf16.mxu0 %v11357_v60 }
 0x1c2   :  { %9539 = vmatpush3.bf16.msra.mxu1 %v12318_v12 }
 0x1c3   :  { %9540 = vmatprep.subr.bf16.mxu1 %v12320_v5 }
 0x1c5   :  { %1509 = vmatmul.mubr.bf16.gmra.mxu1 %v11279_v48 }
 0x1c6   :  { %9541 = vmatpush3.bf16.msra.mxu1 %v12033_v4  ;;  %1516 = vmatprep.mubr.bf16.mxu1 %v11280_v22 }
 0x1c7   :  { %9542 = vmatprep.subr.bf16.mxu1 %v12338_v16 }
 0x1c8   :  { %2218 = vmatmul.mubr.bf16.gmra.mxu0 %v11355_v19 }
 0x1c9   :  { %2225 = vmatprep.mubr.bf16.mxu0 %v11363_v42 }
 0x1ca   :  { %9543 = vmatpush3.bf16.msra.mxu1 %v12342_v53 }
 0x1cb   :  { %9656 = vmatprep.subr.bf16.mxu1 %v12223_v35  ;;  %v11286_v35 = vld [vmem:[%s14781_s3 + $0x1cc] ss:$16 sps:$4 sm:$0xff]  }
 0x1cd   :  { %1517 = vmatmul.mubr.bf16.gmra.mxu1 %v11282_v24 }
 0x1ce   :  { %1524 = vmatprep.mubr.bf16.mxu1 %v11283_v0 }
 0x1d0   :  { %2226 = vmatmul.mubr.bf16.gmra.mxu0 %v11361_v26  ;;  %v11316_v26 = vld [vmem:[%s14781_s3 + $0x288] ss:$16 sps:$4 sm:$0xff]  }
 0x1d1   :  { %2233 = vmatprep.mubr.bf16.mxu0 %v11369_v3 }
 0x1d5   :  { %1525 = vmatmul.mubr.bf16.gmra.mxu1 %v11285_v20 }
 0x1d6   :  { %1532 = vmatprep.mubr.bf16.mxu1 %v11286_v35 }
 0x1d8   :  { %2234 = vmatmul.mubr.bf16.gmra.mxu0 %v11367_v7 }
 0x1d9   :  { %2241 = vmatprep.mubr.bf16.mxu0 %v11375_v40 }
 0x1dd   :  { %1533 = vmatmul.mubr.bf16.gmra.mxu1 %v11288_v47 }
 0x1de   :  { %1540 = vmatprep.mubr.bf16.mxu1 %v11289_v59 }
 0x1e0   :  { %2242 = vmatmul.mubr.bf16.gmra.mxu0 %v11373_v6 }
 0x1e1   :  { %2249 = vmatprep.mubr.bf16.mxu0 %v11381_v14 }
 0x1e5   :  { %1541 = vmatmul.mubr.bf16.gmra.mxu1 %v11291_v17 }
 0x1e6   :  { %1887 = vmatprep.mubr.bf16.mxu1 %v11294_v23  ;;  %v11330_v23 = vld [vmem:[%s14781_s3 + $0x2cc] ss:$16 sps:$4 sm:$0xff]  }
 0x1e8   :  { %2250 = vmatmul.mubr.bf16.gmra.mxu0 %v11379_v25 }
 0x1ed   :  { %v9224_v1 = vpop.f32.mrf.mxu1  ;;  %1888 = vmatmul.mubr.bf16.vlgmr.msra.gmra.mxu1 %v11292_v54  ;;  %v9352_v51 = vpop.f32.mrf.mxu0 }
 0x1ee   :  { %9657 = vmatpush3.bf16.msra.mxu1 %v12231_v44  ;;  %1895 = vmatprep.mubr.bf16.mxu1 %v11298_v34  ;;  %v11304_v44 = vld [vmem:[%s14781_s3 + $0x24c] ss:$16 sps:$4 sm:$0xff]  }
 0x1ef   :  { %9658 = vmatprep.subr.bf16.mxu1 %v12237_v63  ;;  %v9225_v45 = vpop.f32.mrf.mxu1  ;;  %v9353_v58 = vpop.f32.mrf.mxu0 }
 0x1f0   :  { %v12590_v33 = vadd.f32 %v9225_v45, %v9224_v1  ;;  %v12592_v9 = vadd.f32 %v9353_v58, %v9352_v51 }
 0x1f1   :  { %v9227_v46 = vpop.f32.mrf.mxu1  ;;  %v12597_v49 = vpop.f32.mrf.mxu0 }
 0x1f2   :  { %9659 = vmatpush3.bf16.msra.mxu1 %v12248_v37 }
 0x1f3   :  { %9660 = vmatprep.subr.bf16.mxu1 %v12252_v10  ;;  %v9228_v63 = vpop.f32.mrf.mxu1  ;;  %v12604_v29 = vpop.f32.mrf.mxu0 }
 0x1f4   :  { %v12606_v21 = vadd.f32 %v9228_v63, %v9227_v46  ;;  %v11328_v63 = vld [vmem:[%s14781_s3 + $0x2c8] ss:$16 sps:$4 sm:$0xff]  }
 0x1f5   :  { %v9230_v50 = vpop.f32.mrf.mxu1  ;;  %1896 = vmatmul.mubr.bf16.gmra.mxu1 %v11300_v27  ;;  %v9358_v52 = vpop.f32.mrf.mxu0 }
 0x1f6   :  { %9661 = vmatpush3.bf16.msra.mxu1 %v12269_v36  ;;  %1903 = vmatprep.mubr.bf16.mxu1 %v11304_v44  ;;  %v11310_v36 = vld [vmem:[%s14781_s3 + $0x26c] ss:$16 sps:$4 sm:$0xff]  }
 0x1f7   :  { %9662 = vmatprep.subr.bf16.mxu1 %v12276_v30  ;;  %v9231_v37 = vpop.f32.mrf.mxu1  ;;  %v9359_v15 = vpop.f32.mrf.mxu0 }
 0x1f8   :  { %v12610_v41 = vadd.f32 %v9231_v37, %v9230_v50  ;;  %v12612_v38 = vadd.f32 %v9359_v15, %v9358_v52  ;;  %v11336_v52 = vld [vmem:[%s14781_s3 + $0x2ec] ss:$16 sps:$4 sm:$0xff]  }
 0x1f9   :  { %v9233_v10 = vpop.f32.mrf.mxu1  ;;  %v12617_v57 = vpop.f32.mrf.mxu0 }
 0x1fa   :  { %9663 = vmatpush3.bf16.msra.mxu1 %v12284_v43 }
 0x1fb   :  { %9664 = vmatprep.subr.bf16.mxu1 %v12288_v56  ;;  %v9234_v30 = vpop.f32.mrf.mxu1  ;;  %v12624_v39 = vpop.f32.mrf.mxu0 }
 0x1fc   :  { %v12626_v11 = vadd.f32 %v9234_v30, %v9233_v10 }
 0x1fd   :  { %v9236_v62 = vpop.f32.mrf.mxu1  ;;  %1904 = vmatmul.mubr.bf16.gmra.mxu1 %v11306_v55  ;;  %v9364_v8 = vpop.f32.mrf.mxu0 }
 0x1fe   :  { %9665 = vmatpush3.bf16.msra.mxu1 %v12069_v32  ;;  %1911 = vmatprep.mubr.bf16.mxu1 %v11310_v36  ;;  %v11318_v32 = vld [vmem:[%s14781_s3 + $0x28c] ss:$16 sps:$4 sm:$0xff]  }
 0x1ff   :  { %9666 = vmatprep.subr.bf16.mxu1 %v12310_v61  ;;  %v9237_v43 = vpop.f32.mrf.mxu1  ;;  %v9365_v28 = vpop.f32.mrf.mxu0 }
 0x200   :  { %v12630_v31 = vadd.f32 %v9237_v43, %v9236_v62  ;;  %v12632_v18 = vadd.f32 %v9365_v28, %v9364_v8 }
 0x201   :  { %v9239_v56 = vpop.f32.mrf.mxu1  ;;  %v12637_v13 = vpop.f32.mrf.mxu0 }
 0x202   :  { %9667 = vmatpush3.bf16.msra.mxu1 %v12318_v12 }
 0x203   :  { %9668 = vmatprep.subr.bf16.mxu1 %v12320_v5  ;;  %v9240_v61 = vpop.f32.mrf.mxu1  ;;  %v12644_v60 = vpop.f32.mrf.mxu0 }
 0x204   :  { %v12646_v48 = vadd.f32 %v9240_v61, %v9239_v56  ;;  %v11334_v56 = vld [vmem:[%s14781_s3 + $0x2e8] ss:$16 sps:$4 sm:$0xff]  }
 0x205   :  { %v9242_v22 = vpop.f32.mrf.mxu1  ;;  %1912 = vmatmul.mubr.bf16.gmra.mxu1 %v11312_v2  ;;  %v9370_v19 = vpop.f32.mrf.mxu0 }
 0x206   :  { %9669 = vmatpush3.bf16.msra.mxu1 %v12033_v4  ;;  %1919 = vmatprep.mubr.bf16.mxu1 %v11318_v32  ;;  %v11324_v4 = vld [vmem:[%s14781_s3 + $0x2ac] ss:$16 sps:$4 sm:$0xff]  }
 0x207   :  { %9670 = vmatprep.subr.bf16.mxu1 %v12338_v16  ;;  %v9243_v12 = vpop.f32.mrf.mxu1  ;;  %v9371_v42 = vpop.f32.mrf.mxu0  ;;  %v11342_v32 = vld [vmem:[%s14781_s3 + $0x30c] ss:$16 sps:$4 sm:$0xff]  }
 0x208   :  { %v12650_v24 = vadd.f32 %v9243_v12, %v9242_v22  ;;  %v12652_v0 = vadd.f32 %v9371_v42, %v9370_v19 }
 0x209   :  { %v9245_v5 = vpop.f32.mrf.mxu1  ;;  %v12657_v3 = vpop.f32.mrf.mxu0 }
 0x20a   :  { %9671 = vmatpush3.bf16.msra.mxu1 %v12342_v53  ;;  %v11322_v53 = vld [vmem:[%s14781_s3 + $0x2a8] ss:$16 sps:$4 sm:$0xff]  }
 0x20b   :  { %v9246_v16 = vpop.f32.mrf.mxu1  ;;  %v12663_v20 = vpop.f32.mrf.mxu0 }
 0x20c   :  { %v12665_v35 = vadd.f32 %v9246_v16, %v9245_v5 }
 0x20d   :  { %v9248_v7 = vpop.f32.mrf.mxu1  ;;  %1920 = vmatmul.mubr.bf16.gmra.mxu1 %v11316_v26 }
 0x20e   :  { %1927 = vmatprep.mubr.bf16.mxu1 %v11324_v4  ;;  %v9376_v40 = vpop.f32.mrf.mxu0 }
 0x20f   :  { %v9249_v47 = vpop.f32.mrf.mxu1 }
 0x210   :  { %v12667_v59 = vadd.f32 %v9249_v47, %v9248_v7  ;;  %v9377_v6 = vpop.f32.mrf.mxu0 }
 0x211   :  { %v9251_v14 = vpop.f32.mrf.mxu1  ;;  %v12672_v17 = vadd.f32 %v9377_v6, %v9376_v40  ;;  %v11340_v40 = vld [vmem:[%s14781_s3 + $0x308] ss:$16 sps:$4 sm:$0xff]   ;;  %v11348_v6 = vld [vmem:[%s14781_s3 + $0x32c] ss:$16 sps:$4 sm:$0xff]  }
 0x212   :  { %v12677_v25 = vpop.f32.mrf.mxu0 }
 0x213   :  { %v9252_v54 = vpop.f32.mrf.mxu1 }
 0x214   :  { %v12679_v34 = vadd.f32 %v9252_v54, %v9251_v14  ;;  %v12681_v1 = vpop.f32.mrf.mxu0 }
 0x215   :  { %v9254_v51 = vpop.f32.mrf.mxu1  ;;  %1928 = vmatmul.mubr.bf16.gmra.mxu1 %v11322_v53 }
 0x216   :  { %1935 = vmatprep.mubr.bf16.mxu1 %v11330_v23  ;;  %v9382_v45 = vpop.f32.mrf.mxu0 }
 0x217   :  { %v9255_v58 = vpop.f32.mrf.mxu1 }
 0x218   :  { %v12683_v46 = vadd.f32 %v9255_v58, %v9254_v51  ;;  %v9383_v27 = vpop.f32.mrf.mxu0 }
 0x219   :  { %v9257_v44 = vpop.f32.mrf.mxu1  ;;  %v12688_v50 = vadd.f32 %v9383_v27, %v9382_v45 }
 0x21a   :  { %v12693_v37 = vpop.f32.mrf.mxu0 }
 0x21b   :  { %v9258_v15 = vpop.f32.mrf.mxu1 }
 0x21c   :  { %v12695_v10 = vadd.f32 %v9258_v15, %v9257_v44  ;;  %v12697_v55 = vpop.f32.mrf.mxu0 }
 0x21d   :  { %v9260_v36 = vpop.f32.mrf.mxu1  ;;  %1936 = vmatmul.mubr.bf16.gmra.mxu1 %v11328_v63 }
 0x21e   :  { %1943 = vmatprep.mubr.bf16.mxu1 %v11336_v52  ;;  %v9388_v30 = vpop.f32.mrf.mxu0  ;;  %v11346_v52 = vld [vmem:[%s14781_s3 + $0x328] ss:$16 sps:$4 sm:$0xff]  }
 0x21f   :  { %v9261_v62 = vpop.f32.mrf.mxu1 }
 0x220   :  { %v12699_v8 = vadd.f32 %v9261_v62, %v9260_v36  ;;  %v9389_v43 = vpop.f32.mrf.mxu0 }
 0x221   :  { %v9263_v28 = vpop.f32.mrf.mxu1  ;;  %v12704_v2 = vadd.f32 %v9389_v43, %v9388_v30  ;;  %v11354_v30 = vld [vmem:[%s14781_s3 + $0x34c] ss:$16 sps:$4 sm:$0xff]  }
 0x222   :  { %v12709_v61 = vpop.f32.mrf.mxu0 }
 0x223   :  { %v9264_v22 = vpop.f32.mrf.mxu1 }
 0x224   :  { %v12711_v19 = vadd.f32 %v9264_v22, %v9263_v28  ;;  %v12713_v12 = vpop.f32.mrf.mxu0 }
 0x225   :  { %v9266_v42 = vpop.f32.mrf.mxu1  ;;  %1944 = vmatmul.mubr.bf16.gmra.mxu1 %v11334_v56 }
 0x226   :  { %2290 = vmatprep.mubr.bf16.mxu1 %v11342_v32  ;;  %v9394_v5 = vpop.f32.mrf.mxu0 }
 0x227   :  { %v9267_v26 = vpop.f32.mrf.mxu1 }
 0x228   :  { %v12715_v4 = vadd.f32 %v9267_v26, %v9266_v42  ;;  %v9395_v16 = vpop.f32.mrf.mxu0 }
 0x229   :  { %v9269_v7 = vpop.f32.mrf.mxu1  ;;  %v12720_v47 = vadd.f32 %v9395_v16, %v9394_v5  ;;  %v11352_v16 = vld [vmem:[%s14781_s3 + $0x348] ss:$16 sps:$4 sm:$0xff]  }
 0x22a   :  { %v12725_v14 = vpop.f32.mrf.mxu0 }
 0x22b   :  { %v9270_v53 = vpop.f32.mrf.mxu1 }
 0x22c   :  { %v12727_v23 = vadd.f32 %v9270_v53, %v9269_v7  ;;  %v12729_v54 = vpop.f32.mrf.mxu0 }
 0x22d   :  { %v9288_v51 = vpop.f32.mrf.mxu1  ;;  %2291 = vmatmul.mubr.bf16.vlgmr.msra.gmra.mxu1 %v11340_v40  ;;  %v11360_v40 = vld [vmem:[%s14781_s3 + $0x36c] ss:$16 sps:$4 sm:$0xff]  }
 0x22e   :  { %2298 = vmatprep.mubr.bf16.mxu1 %v11348_v6  ;;  %v9480_v45 = vpop.f32.mrf.mxu0 }
 0x22f   :  { %v9289_v58 = vpop.f32.mrf.mxu1 }
 0x230   :  { %v9290_v27 = vadd.f32 %v9289_v58, %v9288_v51  ;;  %v9481_v44 = vpop.f32.mrf.mxu0 }
 0x231   :  { %v9291_v63 = vpop.f32.mrf.mxu1  ;;  %v12734_v15 = vadd.f32 %v9481_v44, %v9480_v45 }
 0x232   :  { %v12737_v36 = vadd.f32 %v9290_v27, %v12590_v33  ;;  %v12742_v62 = vpop.f32.mrf.mxu0 }
 0x233   :  { %v9292_v43 = vpop.f32.mrf.mxu1 }
 0x234   :  { %v9293_v28 = vadd.f32 %v9292_v43, %v9291_v63  ;;  %v12744_v56 = vpop.f32.mrf.mxu0  ;;  %v11358_v43 = vld [vmem:[%s14781_s3 + $0x368] ss:$16 sps:$4 sm:$0xff]  }
 0x235   :  { %v9294_v32 = vpop.f32.mrf.mxu1  ;;  %2299 = vmatmul.mubr.bf16.gmra.mxu1 %v11346_v52 }
 0x236   :  { %v12747_v22 = vadd.f32 %v9293_v28, %v12606_v21  ;;  %2306 = vmatprep.mubr.bf16.mxu1 %v11354_v30 }
 0x237   :  { %v9295_v42 = vpop.f32.mrf.mxu1 }
 0x238   :  { %v9296_v5 = vadd.f32 %v9295_v42, %v9294_v32  ;;  %v9486_v33 = vpop.f32.mrf.mxu0  ;;  %v11366_v32 = vld [vmem:[%s14781_s3 + $0x38c] ss:$16 sps:$4 sm:$0xff]  }
 0x239   :  { %v9297_v26 = vpop.f32.mrf.mxu1 }
 0x23a   :  { %v12753_v7 = vadd.f32 %v9296_v5, %v12610_v41  ;;  %v9487_v6 = vpop.f32.mrf.mxu0 }
 0x23b   :  { %v9298_v53 = vpop.f32.mrf.mxu1  ;;  %v12758_v21 = vadd.f32 %v9487_v6, %v9486_v33 }
 0x23c   :  { %v9299_v51 = vadd.f32 %v9298_v53, %v9297_v26  ;;  %v12760_v45 = vpop.f32.mrf.mxu0 }
 0x23d   :  { %v9300_v58 = vpop.f32.mrf.mxu1  ;;  %2307 = vmatmul.mubr.bf16.gmra.mxu1 %v11352_v16 }
 0x23e   :  { %v12763_v27 = vadd.f32 %v9299_v51, %v12626_v11  ;;  %2314 = vmatprep.mubr.bf16.mxu1 %v11360_v40  ;;  %v12765_v44 = vpop.f32.mrf.mxu0 }
 0x23f   :  { %v9301_v41 = vpop.f32.mrf.mxu1 }
 0x240   :  { %v9302_v63 = vadd.f32 %v9301_v41, %v9300_v58  ;;  %v9492_v52 = vpop.f32.mrf.mxu0  ;;  %v11364_v41 = vld [vmem:[%s14781_s3 + $0x388] ss:$16 sps:$4 sm:$0xff]  }
 0x241   :  { %v9303_v30 = vpop.f32.mrf.mxu1 }
 0x242   :  { %v12771_v28 = vadd.f32 %v9302_v63, %v12630_v31  ;;  %v9493_v11 = vpop.f32.mrf.mxu0 }
 0x243   :  { %v9304_v42 = vpop.f32.mrf.mxu1  ;;  %v12776_v5 = vadd.f32 %v9493_v11, %v9492_v52  ;;  %v11372_v52 = vld [vmem:[%s14781_s3 + $0x3ac] ss:$16 sps:$4 sm:$0xff]  }
 0x244   :  { %v9305_v33 = vadd.f32 %v9304_v42, %v9303_v30  ;;  %v12778_v26 = vpop.f32.mrf.mxu0 }
 0x245   :  { %14798 = vst [vmem:[#allocation5_spill] sm:$0xff] %v12778_v26  ;;  %v9306_v16 = vpop.f32.mrf.mxu1  ;;  %2315 = vmatmul.mubr.bf16.gmra.mxu1 %v11358_v43 }
 0x246   :  { %v12781_v40 = vadd.f32 %v9305_v33, %v12646_v48  ;;  %2322 = vmatprep.mubr.bf16.mxu1 %v11366_v32  ;;  %v12783_v6 = vpop.f32.mrf.mxu0 }
 0x247   :  { %14799 = vst [vmem:[#allocation6_spill] sm:$0xff] %v12783_v6  ;;  %v9307_v31 = vpop.f32.mrf.mxu1 }
 0x248   :  { %v9308_v53 = vadd.f32 %v9307_v31, %v9306_v16  ;;  %v9498_v51 = vpop.f32.mrf.mxu0 }
 0x249   :  { %v9309_v58 = vpop.f32.mrf.mxu1 }
 0x24a   :  { %v12789_v63 = vadd.f32 %v9308_v53, %v12650_v24  ;;  %v9499_v48 = vpop.f32.mrf.mxu0 }
 0x24b   :  { %v9310_v30 = vpop.f32.mrf.mxu1  ;;  %v12794_v43 = vadd.f32 %v9499_v48, %v9498_v51  ;;  %v11370_v51 = vld [vmem:[%s14781_s3 + $0x3a8] ss:$16 sps:$4 sm:$0xff]  }
 0x24c   :  { %v9311_v32 = vadd.f32 %v9310_v30, %v9309_v58  ;;  %v12796_v11 = vpop.f32.mrf.mxu0 }
 0x24d   :  { %14800 = vst [vmem:[#allocation7_spill] sm:$0xff] %v12794_v43  ;;  %14801 = vst [vmem:[#allocation8_spill] sm:$0xff] %v12796_v11  ;;  %v9312_v42 = vpop.f32.mrf.mxu1  ;;  %2323 = vmatmul.mubr.bf16.gmra.mxu1 %v11364_v41  ;;  %v11378_v41 = vld [vmem:[%s14781_s3 + $0x3cc] ss:$16 sps:$4 sm:$0xff]  }
 0x24e   :  { %v12799_v33 = vadd.f32 %v9311_v32, %v12665_v35  ;;  %2330 = vmatprep.mubr.bf16.mxu1 %v11372_v52  ;;  %v12801_v16 = vpop.f32.mrf.mxu0 }
 0x24f   :  { %14802 = vst [vmem:[#allocation9_spill] sm:$0xff] %v12801_v16  ;;  %v9313_v24 = vpop.f32.mrf.mxu1 }
 0x250   :  { %v9314_v31 = vadd.f32 %v9313_v24, %v9312_v42  ;;  %v9504_v53 = vpop.f32.mrf.mxu0 }
 0x251   :  { %v9315_v6 = vpop.f32.mrf.mxu1 }
 0x252   :  { %v12807_v58 = vadd.f32 %v9314_v31, %v12667_v59  ;;  %v9505_v35 = vpop.f32.mrf.mxu0 }
 0x253   :  { %v9316_v48 = vpop.f32.mrf.mxu1  ;;  %v12812_v52 = vadd.f32 %v9505_v35, %v9504_v53  ;;  %v11376_v53 = vld [vmem:[%s14781_s3 + $0x3c8] ss:$16 sps:$4 sm:$0xff]  }
 0x254   :  { %v9317_v30 = vadd.f32 %v9316_v48, %v9315_v6  ;;  %v12814_v32 = vpop.f32.mrf.mxu0 }
 0x255   :  { %14803 = vst [vmem:[#allocation10_spill] sm:$0xff] %v12812_v52  ;;  %14804 = vst [vmem:[#allocation11_spill] sm:$0xff] %v12814_v32  ;;  %v9318_v42 = vpop.f32.mrf.mxu1  ;;  %2331 = vmatmul.mubr.bf16.gmra.mxu1 %v11370_v51  ;;  %v11384_v51 = vld [vmem:[%s14781_s3 + $0x3ec] ss:$16 sps:$4 sm:$0xff]  }
 0x256   :  { %v12817_v24 = vadd.f32 %v9317_v30, %v12679_v34  ;;  %2338 = vmatprep.mubr.bf16.mxu1 %v11378_v41  ;;  %v12819_v16 = vpop.f32.mrf.mxu0 }
 0x257   :  { %14805 = vst [vmem:[#allocation12_spill] sm:$0xff] %v12819_v16  ;;  %v9319_v59 = vpop.f32.mrf.mxu1 }
 0x258   :  { %v9320_v31 = vadd.f32 %v9319_v59, %v9318_v42  ;;  %v9510_v11 = vpop.f32.mrf.mxu0 }
 0x259   :  { %v9321_v43 = vpop.f32.mrf.mxu1 }
 0x25a   :  { %v12825_v6 = vadd.f32 %v9320_v31, %v12683_v46  ;;  %v9511_v34 = vpop.f32.mrf.mxu0 }
 0x25b   :  { %v9322_v35 = vpop.f32.mrf.mxu1  ;;  %v12830_v41 = vadd.f32 %v9511_v34, %v9510_v11  ;;  %v11382_v11 = vld [vmem:[%s14781_s3 + $0x3e8] ss:$16 sps:$4 sm:$0xff]  }
 0x25c   :  { %v9323_v48 = vadd.f32 %v9322_v35, %v9321_v43  ;;  %v12832_v30 = vpop.f32.mrf.mxu0 }
 0x25d   :  { %14806 = vst [vmem:[#allocation13_spill] sm:$0xff] %v12830_v41  ;;  %14807 = vst [vmem:[#allocation14_spill] sm:$0xff] %v12832_v30  ;;  %v9324_v42 = vpop.f32.mrf.mxu1  ;;  %2339 = vmatmul.mubr.bf16.gmra.mxu1 %v11376_v53 }
 0x25e   :  { %v12835_v59 = vadd.f32 %v9323_v48, %v12695_v10  ;;  %2346 = vmatprep.mubr.bf16.mxu1 %v11384_v51  ;;  %v12837_v16 = vpop.f32.mrf.mxu0 }
 0x25f   :  { %14808 = vst [vmem:[#allocation15_spill] sm:$0xff] %v12837_v16  ;;  %v9325_v46 = vpop.f32.mrf.mxu1 }
 0x260   :  { %v9326_v31 = vadd.f32 %v9325_v46, %v9324_v42  ;;  %v9516_v32 = vpop.f32.mrf.mxu0 }
 0x261   :  { %v9327_v52 = vpop.f32.mrf.mxu1 }
 0x262   :  { %v12843_v43 = vadd.f32 %v9326_v31, %v12699_v8  ;;  %v9517_v34 = vpop.f32.mrf.mxu0 }
 0x263   :  { %v9328_v35 = vpop.f32.mrf.mxu1  ;;  %v12845_v53 = vadd.f32 %v9517_v34, %v9516_v32 }
 0x264   :  { %v9329_v10 = vadd.f32 %v9328_v35, %v9327_v52  ;;  %v12847_v48 = vpop.f32.mrf.mxu0 }
 0x265   :  { %14809 = vst [vmem:[#allocation16_spill] sm:$0xff] %v12845_v53  ;;  %14810 = vst [vmem:[#allocation17_spill] sm:$0xff] %v12847_v48  ;;  %v9330_v51 = vpop.f32.mrf.mxu1  ;;  %2347 = vmatmul.mubr.bf16.gmra.mxu1 %v11382_v11 }
 0x266   :  { %v12850_v42 = vadd.f32 %v9329_v10, %v12711_v19  ;;  %v12852_v46 = vpop.f32.mrf.mxu0 }
 0x267   :  { %14811 = vst [vmem:[#allocation18_spill] sm:$0xff] %v12852_v46  ;;  %v9331_v16 = vpop.f32.mrf.mxu1 }
 0x268   :  { %v9332_v30 = vadd.f32 %v9331_v16, %v9330_v51  ;;  %v9522_v41 = vpop.f32.mrf.mxu0 }
 0x269   :  { %v9333_v26 = vpop.f32.mrf.mxu1 }
 0x26a   :  { %v12855_v8 = vadd.f32 %v9332_v30, %v12715_v4  ;;  %v9523_v31 = vpop.f32.mrf.mxu0 }
 0x26b   :  { %v9334_v32 = vpop.f32.mrf.mxu1  ;;  %v12857_v34 = vadd.f32 %v9523_v31, %v9522_v41 }
 0x26c   :  { %v9335_v52 = vadd.f32 %v9334_v32, %v9333_v26  ;;  %v12859_v35 = vpop.f32.mrf.mxu0  ;;  %v9357_v26 = vadd.f32 %v12604_v29, %v12597_v49 }
 0x26d   :  { %v9416_v11 = vpop.f32.mrf.mxu1 }
 0x26e   :  { %v12862_v19 = vadd.f32 %v9335_v52, %v12727_v23  ;;  %v12864_v10 = vpop.f32.mrf.mxu0 }
 0x26f   :  { %v9417_v46 = vpop.f32.mrf.mxu1 }
 0x270   :  { %v9418_v16 = vadd.f32 %v9417_v46, %v9416_v11  ;;  %v9608_v51 = vpop.f32.mrf.mxu0 }
 0x271   :  { %v9419_v48 = vpop.f32.mrf.mxu1 }
 0x272   :  { %v12867_v4 = vadd.f32 %v9418_v16, %v12592_v9  ;;  %v9609_v30 = vpop.f32.mrf.mxu0 }
 0x273   :  { %v9420_v53 = vpop.f32.mrf.mxu1  ;;  %v12869_v41 = vadd.f32 %v9609_v30, %v9608_v51 }
 0x274   :  { %v9421_v31 = vadd.f32 %v9420_v53, %v9419_v48  ;;  %v12875_v32 = vpop.f32.mrf.mxu0  ;;  %v9363_v48 = vadd.f32 %v12624_v39, %v12617_v57  ;;  %v9369_v57 = vadd.f32 %v12644_v60, %v12637_v13  ;;  %v9375_v13 = vadd.f32 %v12663_v20, %v12657_v3 }
 0x275   :  { %14812 = vst [vmem:[#allocation19_spill] sm:$0xff] %v12869_v41  ;;  %14813 = vst [vmem:[#allocation20_spill] sm:$0xff] %v12875_v32  ;;  %v9422_v52 = vpop.f32.mrf.mxu1  ;;  %v9381_v3 = vadd.f32 %v12681_v1, %v12677_v25  ;;  %v9387_v25 = vadd.f32 %v12697_v55, %v12693_v37  ;;  %v9393_v37 = vadd.f32 %v12713_v12, %v12709_v61 }
 0x276   :  { %v12877_v46 = vadd.f32 %v9421_v31, %v9357_v26  ;;  %v12879_v11 = vpop.f32.mrf.mxu0  ;;  %v9399_v61 = vadd.f32 %v12729_v54, %v12725_v14  ;;  %v9485_v55 = vadd.f32 %v12744_v56, %v12742_v62  ;;  %v14815_v14 = vmax.f32 %v12737_v36, %v12867_v4 }
 0x277   :  { %14814 = vst [vmem:[#allocation21_spill] sm:$0xff] %v12879_v11  ;;  %v9423_v9 = vpop.f32.mrf.mxu1  ;;  %v9491_v62 = vadd.f32 %v12765_v44, %v12760_v45  ;;  %v14817_v45 = vld [vmem:[#allocation5_spill] sm:$0xff]  ;;  %v14818_v44 = vld [vmem:[#allocation6_spill] sm:$0xff] }
 0x278   :  { %v9424_v51 = vadd.f32 %v9423_v9, %v9422_v52  ;;  %v9614_v30 = vpop.f32.mrf.mxu0 }
 0x279   :  { %v9425_v41 = vpop.f32.mrf.mxu1 }
 0x27a   :  { %v12884_v49 = vadd.f32 %v9424_v51, %v12612_v38  ;;  %v9615_v29 = vpop.f32.mrf.mxu0 }
 0x27b   :  { %v9426_v23 = vpop.f32.mrf.mxu1  ;;  %v12886_v53 = vadd.f32 %v9615_v29, %v9614_v30 }
 0x27c   :  { %v1551_v26 = vmax.f32 %v12753_v7, %v12884_v49  ;;  %v9427_v31 = vadd.f32 %v9426_v23, %v9425_v41 }
 0x27d   :  { %v9428_v11 = vpop.f32.mrf.mxu1 }
 0x27e   :  { %v12892_v32 = vadd.f32 %v9427_v31, %v9363_v48  ;;  %v14816_v31 = vmax.f32 %v12747_v22, %v12877_v46 }
 0x27f   :  { %v9429_v52 = vpop.f32.mrf.mxu1 }
 0x280   :  { %v1552_v9 = vmax.f32 %v12763_v27, %v12892_v32  ;;  %v9430_v38 = vadd.f32 %v9429_v52, %v9428_v11 }
 0x281   :  { %v9431_v51 = vpop.f32.mrf.mxu1 }
 0x282   :  { %v12897_v16 = vadd.f32 %v9430_v38, %v12632_v18 }
 0x283   :  { %v9432_v30 = vpop.f32.mrf.mxu1 }
 0x284   :  { %v1553_v39 = vmax.f32 %v12771_v28, %v12897_v16  ;;  %v9433_v41 = vadd.f32 %v9432_v30, %v9431_v51  ;;  %v14821_v16 = vld [vmem:[#allocation8_spill] sm:$0xff] }
 0x285   :  { %v9434_v23 = vpop.f32.mrf.mxu1 }
 0x286   :  { %v12903_v29 = vadd.f32 %v9433_v41, %v9369_v57 }
 0x287   :  { %v9435_v48 = vpop.f32.mrf.mxu1 }
 0x288   :  { %v9436_v11 = vadd.f32 %v9435_v48, %v9434_v23 }
 0x289   :  { %v9437_v52 = vpop.f32.mrf.mxu1 }
 0x28a   :  { %v12908_v18 = vadd.f32 %v9436_v11, %v12652_v0 }
 0x28b   :  { %v9438_v38 = vpop.f32.mrf.mxu1 }
 0x28c   :  { %v1555_v60 = vmax.f32 %v12789_v63, %v12908_v18  ;;  %v9439_v51 = vadd.f32 %v9438_v38, %v9437_v52  ;;  %v11385_v63 = vld [vmem:[%s14784_s6] sm:$0xff]  }
 0x28d   :  { %v9440_v30 = vpop.f32.mrf.mxu1  ;;  %v11386_v18 = vld [vmem:[%s14784_s6 + $0x40] sm:$0xff]   ;;  %10551 = vmatprep.mubr.bf16.mxu0 %v11385_v63 }
 0x28e   :  { %v12914_v57 = vadd.f32 %v9439_v51, %v9375_v13  ;;  %10583 = vmatprep.mubr.bf16.mxu1 %v11386_v18 }
 0x28f   :  { %v9441_v41 = vpop.f32.mrf.mxu1 }
 0x290   :  { %v9442_v23 = vadd.f32 %v9441_v41, %v9440_v30 }
 0x291   :  { %v9443_v48 = vpop.f32.mrf.mxu1 }
 0x292   :  { %v12919_v0 = vadd.f32 %v9442_v23, %v12672_v17 }
 0x293   :  { %v9444_v11 = vpop.f32.mrf.mxu1 }
 0x294   :  { %v1557_v20 = vmax.f32 %v12807_v58, %v12919_v0  ;;  %v9445_v52 = vadd.f32 %v9444_v11, %v9443_v48  ;;  %v14828_v58 = vld [vmem:[#allocation13_spill] sm:$0xff] }
 0x295   :  { %v9446_v38 = vpop.f32.mrf.mxu1 }
 0x296   :  { %v12925_v13 = vadd.f32 %v9445_v52, %v9381_v3 }
 0x297   :  { %v9447_v51 = vpop.f32.mrf.mxu1 }
 0x298   :  { %v9448_v30 = vadd.f32 %v9447_v51, %v9446_v38 }
 0x299   :  { %v9449_v41 = vpop.f32.mrf.mxu1 }
 0x29a   :  { %v12930_v17 = vadd.f32 %v9448_v30, %v12688_v50 }
 0x29b   :  { %v9450_v23 = vpop.f32.mrf.mxu1 }
 0x29c   :  { %v1559_v1 = vmax.f32 %v12825_v6, %v12930_v17  ;;  %v9451_v48 = vadd.f32 %v9450_v23, %v9449_v41  ;;  %v14833_v17 = vld [vmem:[#allocation17_spill] sm:$0xff] }
 0x29d   :  { %v9452_v11 = vpop.f32.mrf.mxu1 }
 0x29e   :  { %v12936_v3 = vadd.f32 %v9451_v48, %v9387_v25 }
 0x29f   :  { %v9453_v52 = vpop.f32.mrf.mxu1 }
 0x2a0   :  { %v9454_v38 = vadd.f32 %v9453_v52, %v9452_v11 }
 0x2a1   :  { %v9455_v51 = vpop.f32.mrf.mxu1 }
 0x2a2   :  { %v12941_v50 = vadd.f32 %v9454_v38, %v12704_v2 }
 0x2a3   :  { %v9456_v30 = vpop.f32.mrf.mxu1 }
 0x2a4   :  { %v9457_v41 = vadd.f32 %v9456_v30, %v9455_v51 }
 0x2a5   :  { %v9458_v23 = vpop.f32.mrf.mxu1 }
 0x2a6   :  { %v12947_v25 = vadd.f32 %v9457_v41, %v9393_v37 }
 0x2a7   :  { %v9459_v48 = vpop.f32.mrf.mxu1 }
 0x2a8   :  { %v9460_v11 = vadd.f32 %v9459_v48, %v9458_v23 }
 0x2a9   :  { %v9461_v52 = vpop.f32.mrf.mxu1 }
 0x2aa   :  { %v12952_v2 = vadd.f32 %v9460_v11, %v12720_v47 }
 0x2ab   :  { %v9462_v38 = vpop.f32.mrf.mxu1 }
 0x2ac   :  { %v9463_v51 = vadd.f32 %v9462_v38, %v9461_v52 }
 0x2ad   :  { %v9544_v30 = vpop.f32.mrf.mxu1 }
 0x2ae   :  { %v12958_v37 = vadd.f32 %v9463_v51, %v9399_v61 }
 0x2af   :  { %v9545_v41 = vpop.f32.mrf.mxu1 }
 0x2b0   :  { %v9546_v23 = vadd.f32 %v9545_v41, %v9544_v30 }
 0x2b1   :  { %v9547_v48 = vpop.f32.mrf.mxu1 }
 0x2b2   :  { %v1890_v47 = vadd.f32 %v9546_v23, %v12734_v15 }
 0x2b3   :  { %v9548_v11 = vpop.f32.mrf.mxu1 }
 0x2b4   :  { %v12968_v54 = vmax.f32 %v14815_v14, %v1890_v47  ;;  %v9549_v52 = vadd.f32 %v9548_v11, %v9547_v48  ;;  %v9497_v11 = vadd.f32 %v14818_v44, %v14817_v45  ;;  %v14825_v45 = vld [vmem:[#allocation11_spill] sm:$0xff]  ;;  %v14826_v44 = vld [vmem:[#allocation12_spill] sm:$0xff] }
 0x2b5   :  { %v9550_v38 = vpop.f32.mrf.mxu1 }
 0x2b6   :  { %v1893_v61 = vadd.f32 %v9549_v52, %v9485_v55 }
 0x2b7   :  { %v9551_v51 = vpop.f32.mrf.mxu1 }
 0x2b8   :  { %v12973_v30 = vmax.f32 %v14816_v31, %v1893_v61  ;;  %v9552_v41 = vadd.f32 %v9551_v51, %v9550_v38  ;;  %v14820_v61 = vld [vmem:[#allocation7_spill] sm:$0xff] }
 0x2b9   :  { %v9553_v15 = vpop.f32.mrf.mxu1 }
 0x2ba   :  { %v1898_v23 = vadd.f32 %v9552_v41, %v12758_v21 }
 0x2bb   :  { %v9554_v12 = vpop.f32.mrf.mxu1 }
 0x2bc   :  { %v12981_v36 = vmax.f32 %v1551_v26, %v1898_v23  ;;  %v9555_v56 = vadd.f32 %v9554_v12, %v9553_v15  ;;  %v12996_v12 = vpop.f32.mrf.mxu0 }
 0x2bd   :  { %v9556_v4 = vpop.f32.mrf.mxu1 }
 0x2be   :  { %v1901_v55 = vadd.f32 %v9555_v56, %v9491_v62  ;;  %v13003_v38 = vpop.f32.mrf.mxu0 }
 0x2bf   :  { %v9557_v48 = vpop.f32.mrf.mxu1 }
 0x2c0   :  { %v12986_v22 = vmax.f32 %v1552_v9, %v1901_v55  ;;  %v9558_v46 = vadd.f32 %v9557_v48, %v9556_v4  ;;  %v14819_v9 = vmax.f32 %v12781_v40, %v12903_v29  ;;  %v13013_v40 = vpop.f32.mrf.mxu0  ;;  %v14823_v4 = vmax.f32 %v12799_v33, %v12914_v57 }
 0x2c1   :  { %v9559_v21 = vpop.f32.mrf.mxu1  ;;  %v9509_v33 = vadd.f32 %v14826_v44, %v14825_v45 }
 0x2c2   :  { %v1906_v31 = vadd.f32 %v9558_v46, %v12776_v5 }
 0x2c3   :  { %v9560_v47 = vpop.f32.mrf.mxu1 }
 0x2c4   :  { %v12994_v7 = vmax.f32 %v1553_v39, %v1906_v31  ;;  %v9561_v49 = vadd.f32 %v9560_v47, %v9559_v21  ;;  %v14822_v39 = vld [vmem:[#allocation9_spill] sm:$0xff]  ;;  %v13020_v21 = vpop.f32.mrf.mxu0  ;;  %v14824_v31 = vld [vmem:[#allocation10_spill] sm:$0xff] }
 0x2c5   :  { %v9562_v26 = vpop.f32.mrf.mxu1  ;;  %v9503_v41 = vadd.f32 %v14822_v39, %v14821_v16  ;;  %v14830_v16 = vld [vmem:[#allocation15_spill] sm:$0xff] }
 0x2c6   :  { %v1909_v27 = vadd.f32 %v9561_v49, %v9497_v11 }
 0x2c7   :  { %v9563_v32 = vpop.f32.mrf.mxu1 }
 0x2c8   :  { %v13001_v14 = vmax.f32 %v14819_v9, %v1909_v27  ;;  %v9564_v5 = vadd.f32 %v9563_v32, %v9562_v26  ;;  %v13036_v26 = vpop.f32.mrf.mxu0  ;;  %v14827_v9 = vmax.f32 %v12817_v24, %v12925_v13 }
 0x2c9   :  { %v9565_v52 = vpop.f32.mrf.mxu1 }
 0x2ca   :  { %v1914_v51 = vadd.f32 %v9564_v5, %v14820_v61 }
 0x2cb   :  { %v9566_v28 = vpop.f32.mrf.mxu1 }
 0x2cc   :  { %v13011_v15 = vmax.f32 %v1555_v60, %v1914_v51  ;;  %v9567_v23 = vadd.f32 %v9566_v28, %v9565_v52  ;;  %v13043_v51 = vpop.f32.mrf.mxu0  ;;  %v14829_v28 = vld [vmem:[#allocation14_spill] sm:$0xff] }
 0x2cd   :  { %v9568_v62 = vpop.f32.mrf.mxu1  ;;  %v9515_v39 = vadd.f32 %v14830_v16, %v14829_v28 }
 0x2ce   :  { %v1917_v29 = vadd.f32 %v9567_v23, %v9503_v41  ;;  %v13053_v24 = vpop.f32.mrf.mxu0 }
 0x2cf   :  { %v9569_v56 = vpop.f32.mrf.mxu1 }
 0x2d0   :  { %v13018_v55 = vmax.f32 %v14823_v4, %v1917_v29  ;;  %v9570_v48 = vadd.f32 %v9569_v56, %v9568_v62  ;;  %v14831_v56 = vmax.f32 %v12835_v59, %v12936_v3 }
 0x2d1   :  { %v9571_v46 = vpop.f32.mrf.mxu1 }
 0x2d2   :  { %v1922_v47 = vadd.f32 %v9570_v48, %v14824_v31  ;;  %v13060_v31 = vpop.f32.mrf.mxu0 }
 0x2d3   :  { %v9572_v60 = vpop.f32.mrf.mxu1 }
 0x2d4   :  { %v13034_v57 = vmax.f32 %v1557_v20, %v1922_v47  ;;  %v9573_v11 = vadd.f32 %v9572_v60, %v9571_v46  ;;  %v14832_v47 = vld [vmem:[#allocation16_spill] sm:$0xff]  ;;  %v14835_v60 = vmax.f32 %v12843_v43, %v12941_v50  ;;  %v13070_v59 = vpop.f32.mrf.mxu0  ;;  %v9527_v43 = vadd.f32 %v12864_v10, %v12859_v35  ;;  %v14839_v35 = vld [vmem:[#allocation19_spill] sm:$0xff] }
 0x2d5   :  { %v9574_v49 = vpop.f32.mrf.mxu1  ;;  %v14837_v50 = vmax.f32 %v12855_v8, %v12952_v2  ;;  %v14840_v8 = vld [vmem:[#allocation20_spill] sm:$0xff]  ;;  %v14841_v2 = vld [vmem:[#allocation21_spill] sm:$0xff] }
 0x2d6   :  { %v1925_v27 = vadd.f32 %v9573_v11, %v9509_v33 }
 0x2d7   :  { %v9575_v32 = vpop.f32.mrf.mxu1 }
 0x2d8   :  { %v13041_v5 = vmax.f32 %v14827_v9, %v1925_v27  ;;  %v9576_v52 = vadd.f32 %v9575_v32, %v9574_v49  ;;  %v14836_v49 = vmax.f32 %v12850_v42, %v12947_v25 }
 0x2d9   :  { %v9577_v61 = vpop.f32.mrf.mxu1 }
 0x2da   :  { %v1930_v0 = vadd.f32 %v9576_v52, %v14828_v58  ;;  %v9630_v52 = vpop.f32.mrf.mxu0 }
 0x2db   :  { %v9578_v20 = vpop.f32.mrf.mxu1 }
 0x2dc   :  { %v13051_v41 = vmax.f32 %v1559_v1, %v1930_v0  ;;  %v9579_v23 = vadd.f32 %v9578_v20, %v9577_v61  ;;  %v14834_v1 = vld [vmem:[#allocation18_spill] sm:$0xff]  ;;  %v13085_v16 = vpop.f32.mrf.mxu0 }
 0x2dd   :  { %v9580_v62 = vpop.f32.mrf.mxu1  ;;  %v9521_v18 = vadd.f32 %v14834_v1, %v14833_v17 }
 0x2de   :  { %v1933_v13 = vadd.f32 %v9579_v23, %v9515_v39  ;;  %v14838_v39 = vmax.f32 %v12862_v19, %v12958_v37 }
 0x2df   :  { %v9581_v29 = vpop.f32.mrf.mxu1 }
 0x2e0   :  { %v13058_v4 = vmax.f32 %v14831_v56, %v1933_v13  ;;  %v9582_v48 = vadd.f32 %v9581_v29, %v9580_v62  ;;  %v9633_v13 = vpop.f32.mrf.mxu0  ;;  %v9613_v56 = vadd.f32 %v14841_v2, %v14840_v8 }
 0x2e1   :  { %v9583_v46 = vpop.f32.mrf.mxu1 }
 0x2e2   :  { %v1938_v63 = vadd.f32 %v9582_v48, %v14832_v47 }
 0x2e3   :  { %v9584_v6 = vpop.f32.mrf.mxu1 }
 0x2e4   :  { %v13068_v45 = vmax.f32 %v14835_v60, %v1938_v63  ;;  %v9585_v44 = vadd.f32 %v9584_v6, %v9583_v46  ;;  %v9635_v63 = vpop.f32.mrf.mxu0 }
 0x2e5   :  { %v9586_v33 = vpop.f32.mrf.mxu1 }
 0x2e6   :  { %v1941_v3 = vadd.f32 %v9585_v44, %v9521_v18  ;;  %v9636_v18 = vpop.f32.mrf.mxu0 }
 0x2e7   :  { %v9587_v11 = vpop.f32.mrf.mxu1 }
 0x2e8   :  { %v13075_v27 = vmax.f32 %v14836_v49, %v1941_v3  ;;  %v9588_v32 = vadd.f32 %v9587_v11, %v9586_v33  ;;  %v9619_v3 = vadd.f32 %v13003_v38, %v12996_v12 }
 0x2e9   :  { %v9589_v9 = vpop.f32.mrf.mxu1 }
 0x2ea   :  { %v1946_v61 = vadd.f32 %v9588_v32, %v12857_v34  ;;  %v9638_v32 = vpop.f32.mrf.mxu0 }
 0x2eb   :  { %v9590_v58 = vpop.f32.mrf.mxu1 }
 0x2ec   :  { %v13083_v0 = vmax.f32 %v14837_v50, %v1946_v61  ;;  %v9591_v20 = vadd.f32 %v9590_v58, %v9589_v9 }
 0x2ed   :  { %v9672_v28 = vpop.f32.mrf.mxu1 }
 0x2ee   :  { %v1949_v42 = vadd.f32 %v9591_v20, %v9527_v43  ;;  %v9639_v20 = vpop.f32.mrf.mxu0 }
 0x2ef   :  { %v9673_v25 = vpop.f32.mrf.mxu1 }
 0x2f0   :  { %v13090_v23 = vmax.f32 %v14838_v39, %v1949_v42  ;;  %v9674_v34 = vadd.f32 %v9673_v25, %v9672_v28  ;;  %v9641_v39 = vpop.f32.mrf.mxu0 }
 0x2f1   :  { %v9675_v62 = vpop.f32.mrf.mxu1 }
 0x2f2   :  { %v2293_v10 = vadd.f32 %v9674_v34, %v14839_v35  ;;  %v9642_v35 = vpop.f32.mrf.mxu0 }
 0x2f3   :  { %v9676_v29 = vpop.f32.mrf.mxu1 }
 0x2f4   :  { %v2355_v48 = vmax.f32 %v12968_v54, %v2293_v10  ;;  %v9677_v46 = vadd.f32 %v9676_v29, %v9675_v62  ;;  %v9628_v10 = vadd.f32 %v13060_v31, %v13053_v24  ;;  %v9634_v24 = vadd.f32 %v9633_v13, %v13085_v16 }
 0x2f5   :  { %v9678_v47 = vpop.f32.mrf.mxu1  ;;  %v9643_v13 = vadd.f32 %v9642_v35, %v9641_v39 }
 0x2f6   :  { %v2296_v6 = vadd.f32 %v9677_v46, %v9613_v56  ;;  %v9644_v56 = vpop.f32.mrf.mxu0 }
 0x2f7   :  { %v9679_v17 = vpop.f32.mrf.mxu1 }
 0x2f8   :  { %v2356_v19 = vmax.f32 %v12973_v30, %v2296_v6  ;;  %v9680_v37 = vadd.f32 %v9679_v17, %v9678_v47  ;;  %v9622_v30 = vadd.f32 %v13020_v21, %v13013_v40 }
 0x2f9   :  { %v9681_v1 = vpop.f32.mrf.mxu1 }
 0x2fa   :  { %v13097_v60 = vpack.c.bf16 %v2356_v19, %v2355_v48  ;;  %v2301_v44 = vadd.f32 %v9680_v37, %v12886_v53  ;;  %v9645_v19 = vpop.f32.mrf.mxu0 }
 0x2fb   :  { %v9682_v33 = vpop.f32.mrf.mxu1 }
 0x2fc   :  { %v2357_v54 = vmax.f32 %v12981_v36, %v2301_v44  ;;  %v9683_v11 = vadd.f32 %v9682_v33, %v9681_v1  ;;  %v9625_v36 = vadd.f32 %v13043_v51, %v13036_v26  ;;  %v9631_v26 = vadd.f32 %v9630_v52, %v13070_v59  ;;  %v9647_v33 = vpop.f32.mrf.mxu0 }
 0x2fd   :  { %v9684_v49 = vpop.f32.mrf.mxu1  ;;  %v9637_v1 = vadd.f32 %v9636_v18, %v9635_v63 }
 0x2fe   :  { %v2304_v9 = vadd.f32 %v9683_v11, %v9619_v3 }
 0x2ff   :  { %v9685_v61 = vpop.f32.mrf.mxu1 }
 0x300   :  { %v2358_v58 = vmax.f32 %v12986_v22, %v2304_v9  ;;  %v9686_v43 = vadd.f32 %v9685_v61, %v9684_v49  ;;  %v9648_v9 = vpop.f32.mrf.mxu0  ;;  %v9640_v61 = vadd.f32 %v9639_v20, %v9638_v32 }
 0x301   :  { %v9687_v50 = vpop.f32.mrf.mxu1  ;;  %v9649_v20 = vadd.f32 %v9648_v9, %v9647_v33  ;;  %v11399_v33 = vld [vmem:[%s14784_s6 + $0x38] sm:$0xff]   ;;  %v11406_v9 = vld [vmem:[%s14784_s6 + $0xd0] sm:$0xff]  }
 0x302   :  { %v13106_v53 = vpack.c.bf16 %v2358_v58, %v2357_v54  ;;  %v2309_v28 = vadd.f32 %v9686_v43, %v9622_v30  ;;  %v9650_v43 = vpop.f32.mrf.mxu0 }
 0x303   :  { %v9688_v42 = vpop.f32.mrf.mxu1 }
 0x304   :  { %v2359_v12 = vmax.f32 %v12994_v7, %v2309_v28  ;;  %v9689_v38 = vadd.f32 %v9688_v42, %v9687_v50 }
 0x305   :  { %v9690_v25 = vpop.f32.mrf.mxu1 }
 0x306   :  { %v2312_v34 = vadd.f32 %v9689_v38, %v9625_v36  ;;  %v9646_v38 = vadd.f32 %v9645_v19, %v9644_v56  ;;  %v11392_v19 = vld [vmem:[%s14784_s6 + $0x58] sm:$0xff]  }
 0x307   :  { %v9691_v62 = vpop.f32.mrf.mxu1 }
 0x308   :  { %v2360_v40 = vmax.f32 %v13001_v14, %v2312_v34  ;;  %v9692_v22 = vadd.f32 %v9691_v62, %v9690_v25 }
 0x309   :  { %v9693_v21 = vpop.f32.mrf.mxu1 }
 0x30a   :  { %v13114_v29 = vpack.c.bf16 %v2360_v40, %v2359_v12  ;;  %v2317_v51 = vadd.f32 %v9692_v22, %v9628_v10 }
 0x30b   :  { %v9694_v8 = vpop.f32.mrf.mxu1 }
 0x30c   :  { %v9695_v7 = vadd.f32 %v9694_v8, %v9693_v21  ;;  %v2361_v47 = vmax.f32 %v13011_v15, %v2317_v51 }
 0x30d   :  { %v9696_v2 = vpop.f32.mrf.mxu1 }
 0x30e   :  { %v2320_v48 = vadd.f32 %v9695_v7, %v9631_v26 }
 0x30f   :  { %v9697_v46 = vpop.f32.mrf.mxu1 }
 0x310   :  { %v2362_v14 = vmax.f32 %v13018_v55, %v2320_v48  ;;  %v9698_v6 = vadd.f32 %v9697_v46, %v9696_v2 }
 0x311   :  { %v9699_v17 = vpop.f32.mrf.mxu1 }
 0x312   :  { %v13120_v31 = vpack.c.bf16 %v2362_v14, %v2361_v47  ;;  %v2325_v59 = vadd.f32 %v9698_v6, %v9634_v24  ;;  %v11393_v24 = vld [vmem:[%s14784_s6 + $0x20] sm:$0xff]  }
 0x313   :  { %v9700_v37 = vpop.f32.mrf.mxu1 }
 0x314   :  { %v9701_v52 = vadd.f32 %v9700_v37, %v9699_v17  ;;  %v2363_v11 = vmax.f32 %v13034_v57, %v2325_v59  ;;  %v11391_v17 = vld [vmem:[%s14784_s6 + $0x18] sm:$0xff]   ;;  %v11394_v37 = vld [vmem:[%s14784_s6 + $0x60] sm:$0xff]   ;;  %v11396_v59 = vld [vmem:[%s14784_s6 + $0x68] sm:$0xff]  }
 0x315   :  { %v9702_v44 = vpop.f32.mrf.mxu1 }
 0x316   :  { %v2328_v3 = vadd.f32 %v9701_v52, %v9637_v1  ;;  %v11395_v1 = vld [vmem:[%s14784_s6 + $0x28] sm:$0xff]   ;;  %v11397_v52 = vld [vmem:[%s14784_s6 + $0x30] sm:$0xff]  }
 0x317   :  { %v9703_v54 = vpop.f32.mrf.mxu1 }
 0x318   :  { %v2364_v15 = vmax.f32 %v13041_v5, %v2328_v3  ;;  %v9704_v55 = vadd.f32 %v9703_v54, %v9702_v44  ;;  %v9651_v5 = vpop.f32.mrf.mxu0  ;;  %v11398_v44 = vld [vmem:[%s14784_s6 + $0x70] sm:$0xff]   ;;  %v11400_v3 = vld [vmem:[%s14784_s6 + $0x78] sm:$0xff]   ;;  %v11401_v54 = vld [vmem:[%s14784_s6 + $0x80] sm:$0xff]  }
 0x319   :  { %v9705_v49 = vpop.f32.mrf.mxu1  ;;  %v9652_v26 = vadd.f32 %v9651_v5, %v9650_v43  ;;  %v11413_v43 = vld [vmem:[%s14784_s6 + $0xb0] sm:$0xff]   ;;  %v11419_v5 = vld [vmem:[%s14784_s6 + $0x108] sm:$0xff]  }
 0x31a   :  { %v13124_v30 = vpack.c.bf16 %v2364_v15, %v2363_v11  ;;  %v2333_v58 = vadd.f32 %v9704_v55, %v9640_v61  ;;  %v9653_v62 = vpop.f32.mrf.mxu0  ;;  %v11402_v11 = vld [vmem:[%s14784_s6 + $0xc0] sm:$0xff]   ;;  %v11403_v15 = vld [vmem:[%s14784_s6 + $0x88] sm:$0xff]   ;;  %v11407_v61 = vld [vmem:[%s14784_s6 + $0x98] sm:$0xff]  }
 0x31b   :  { %v9706_v16 = vpop.f32.mrf.mxu1  ;;  %v11404_v55 = vld [vmem:[%s14784_s6 + $0xc8] sm:$0xff]  }
 0x31c   :  { %v9707_v63 = vadd.f32 %v9706_v16, %v9705_v49  ;;  %v2365_v42 = vmax.f32 %v13051_v41, %v2333_v58  ;;  %v11405_v49 = vld [vmem:[%s14784_s6 + $0x90] sm:$0xff]   ;;  %v11408_v16 = vld [vmem:[%s14784_s6 + $0xd8] sm:$0xff]   ;;  %v11410_v58 = vld [vmem:[%s14784_s6 + $0xe0] sm:$0xff]  }
 0x31d   :  { %v9708_v18 = vpop.f32.mrf.mxu1 }
 0x31e   :  { %v2336_v50 = vadd.f32 %v9707_v63, %v9643_v13  ;;  %v11409_v13 = vld [vmem:[%s14784_s6 + $0xa0] sm:$0xff]   ;;  %v11411_v63 = vld [vmem:[%s14784_s6 + $0xa8] sm:$0xff]  }
 0x31f   :  { %v9709_v28 = vpop.f32.mrf.mxu1 }
 0x320   :  { %v2366_v57 = vmax.f32 %v13058_v4, %v2336_v50  ;;  %v9710_v36 = vadd.f32 %v9709_v28, %v9708_v18  ;;  %v9654_v4 = vpop.f32.mrf.mxu0  ;;  %v11412_v18 = vld [vmem:[%s14784_s6 + $0xe8] sm:$0xff]   ;;  %v11414_v50 = vld [vmem:[%s14784_s6 + $0xf0] sm:$0xff]   ;;  %v11415_v28 = vld [vmem:[%s14784_s6 + $0xb8] sm:$0xff]  }
 0x321   :  { %v9711_v12 = vpop.f32.mrf.mxu1  ;;  %v9655_v2 = vadd.f32 %v9654_v4, %v9653_v62  ;;  %v11426_v62 = vld [vmem:[%s14784_s6 + $0x160] sm:$0xff]  }
 0x322   :  { %v13128_v25 = vpack.c.bf16 %v2366_v57, %v2365_v42  ;;  %v2341_v34 = vadd.f32 %v9710_v36, %v9646_v38  ;;  %v11416_v42 = vld [vmem:[%s14784_s6 + $0xf8] sm:$0xff]   ;;  %v11417_v57 = vld [vmem:[%s14784_s6 + $0x100] sm:$0xff]   ;;  %v11421_v38 = vld [vmem:[%s14784_s6 + $0x110] sm:$0xff]  }
 0x323   :  { %v9712_v32 = vpop.f32.mrf.mxu1  ;;  %v11418_v36 = vld [vmem:[%s14784_s6 + $0x140] sm:$0xff]  }
 0x324   :  { %v9713_v39 = vadd.f32 %v9712_v32, %v9711_v12  ;;  %v2367_v35 = vmax.f32 %v13068_v45, %v2341_v34  ;;  %v11387_v45 = vld [vmem:[%s14784_s6 + $0x8] sm:$0xff]   ;;  %v11422_v32 = vld [vmem:[%s14784_s6 + $0x150] sm:$0xff]   ;;  %v11424_v34 = vld [vmem:[%s14784_s6 + $0x158] sm:$0xff]  }
 0x325   :  { %v9714_v40 = vpop.f32.mrf.mxu1  ;;  %v11420_v12 = vld [vmem:[%s14784_s6 + $0x148] sm:$0xff]   ;;  %v11433_v4 = vld [vmem:[%s14784_s6 + $0x180] sm:$0xff]  }
 0x326   :  { %v2344_v22 = vadd.f32 %v9713_v39, %v9649_v20  ;;  %v11423_v20 = vld [vmem:[%s14784_s6 + $0x118] sm:$0xff]   ;;  %v11425_v39 = vld [vmem:[%s14784_s6 + $0x120] sm:$0xff]  }
 0x327   :  { %v9715_v21 = vpop.f32.mrf.mxu1 }
 0x328   :  { %v2368_v41 = vmax.f32 %v13075_v27, %v2344_v22  ;;  %v9716_v10 = vadd.f32 %v9715_v21, %v9714_v40  ;;  %v11388_v27 = vld [vmem:[%s14784_s6 + $0x48] sm:$0xff]   ;;  %v11429_v21 = vld [vmem:[%s14784_s6 + $0x130] sm:$0xff]  }
 0x329   :  { %v9717_v8 = vpop.f32.mrf.mxu1  ;;  %v11427_v40 = vld [vmem:[%s14784_s6 + $0x128] sm:$0xff]  }
 0x32a   :  { %v13132_v51 = vpack.c.bf16 %v2368_v41, %v2367_v35  ;;  %v2349_v56 = vadd.f32 %v9716_v10, %v9652_v26  ;;  %v11428_v22 = vld [vmem:[%s14784_s6 + $0x168] sm:$0xff]   ;;  %v11430_v35 = vld [vmem:[%s14784_s6 + $0x170] sm:$0xff]   ;;  %v11431_v41 = vld [vmem:[%s14784_s6 + $0x138] sm:$0xff]  }
 0x32b   :  { %v9718_v7 = vpop.f32.mrf.mxu1  ;;  %v11432_v10 = vld [vmem:[%s14784_s6 + $0x178] sm:$0xff]  }
 0x32c   :  { %v9719_v48 = vadd.f32 %v9718_v7, %v9717_v8  ;;  %v2369_v47 = vmax.f32 %v13083_v0, %v2349_v56  ;;  %v11389_v0 = vld [vmem:[%s14784_s6 + $0x10] sm:$0xff]   ;;  %v11434_v8 = vld [vmem:[%s14784_s6 + $0x1c0] sm:$0xff]   ;;  %v11457_v26 = vld [vmem:[%s14782_s4 + $0x78] sm:$0xff]  }
 0x32d   :  { %v11435_v7 = vld [vmem:[%s14784_s6 + $0x188] sm:$0xff]   ;;  %v11437_v56 = vld [vmem:[%s14784_s6 + $0x190] sm:$0xff]  }
 0x32e   :  { %v2352_v46 = vadd.f32 %v9719_v48, %v9655_v2  ;;  %v11436_v2 = vld [vmem:[%s14784_s6 + $0x1c8] sm:$0xff]   ;;  %v11439_v48 = vld [vmem:[%s14784_s6 + $0x1d0] sm:$0xff]  }
 0x330   :  { %v2370_v14 = vmax.f32 %v13090_v23, %v2352_v46  ;;  %v11390_v23 = vld [vmem:[%s14784_s6 + $0x50] sm:$0xff]   ;;  %v11458_v46 = vld [vmem:[%s14782_s4 + $0x38] sm:$0xff]  }
 0x332   :  { %v13136_v6 = vpack.c.bf16 %v2370_v14, %v2369_v47  ;;  %v11459_v47 = vld [vmem:[%s14782_s4 + $0x70] sm:$0xff]  }
 0x333   :  { %v11460_v14 = vld [vmem:[%s14782_s4 + $0x30] sm:$0xff]  }
 0x334   :  { %10535 = vmatprep.subr.bf16.mxu0 %v13136_v6  ;;  %10567 = vmatprep.subr.bf16.mxu1 %v13136_v6 }
 0x335   :  { %10536 = vmatpush3.bf16.msra.mxu0 %v13136_v6  ;;  %10568 = vmatpush3.bf16.msra.mxu1 %v13136_v6 }
 0x336   :  { %10537 = vmatprep.subr.bf16.mxu0 %v13132_v51  ;;  %10569 = vmatprep.subr.bf16.mxu1 %v13132_v51 }
 0x339   :  { %10538 = vmatpush3.bf16.msra.mxu0 %v13132_v51  ;;  %10570 = vmatpush3.bf16.msra.mxu1 %v13132_v51 }
 0x33a   :  { %10539 = vmatprep.subr.bf16.mxu0 %v13128_v25  ;;  %10571 = vmatprep.subr.bf16.mxu1 %v13128_v25 }
 0x33d   :  { %10540 = vmatpush3.bf16.msra.mxu0 %v13128_v25  ;;  %10572 = vmatpush3.bf16.msra.mxu1 %v13128_v25 }
 0x33e   :  { %10541 = vmatprep.subr.bf16.mxu0 %v13124_v30  ;;  %10573 = vmatprep.subr.bf16.mxu1 %v13124_v30 }
 0x341   :  { %10542 = vmatpush3.bf16.msra.mxu0 %v13124_v30  ;;  %10574 = vmatpush3.bf16.msra.mxu1 %v13124_v30 }
 0x342   :  { %10543 = vmatprep.subr.bf16.mxu0 %v13120_v31  ;;  %10575 = vmatprep.subr.bf16.mxu1 %v13120_v31 }
 0x345   :  { %10544 = vmatpush3.bf16.msra.mxu0 %v13120_v31  ;;  %10576 = vmatpush3.bf16.msra.mxu1 %v13120_v31 }
 0x346   :  { %10545 = vmatprep.subr.bf16.mxu0 %v13114_v29  ;;  %10577 = vmatprep.subr.bf16.mxu1 %v13114_v29 }
 0x349   :  { %10546 = vmatpush3.bf16.msra.mxu0 %v13114_v29  ;;  %10578 = vmatpush3.bf16.msra.mxu1 %v13114_v29 }
 0x34a   :  { %10547 = vmatprep.subr.bf16.mxu0 %v13106_v53  ;;  %10579 = vmatprep.subr.bf16.mxu1 %v13106_v53 }
 0x34d   :  { %10548 = vmatpush3.bf16.msra.mxu0 %v13106_v53  ;;  %10580 = vmatpush3.bf16.msra.mxu1 %v13106_v53 }
 0x34e   :  { %10549 = vmatprep.subr.bf16.mxu0 %v13097_v60  ;;  %10581 = vmatprep.subr.bf16.mxu1 %v13097_v60 }
 0x351   :  { %10550 = vmatpush3.bf16.msra.mxu0 %v13097_v60  ;;  %10582 = vmatpush3.bf16.msra.mxu1 %v13097_v60 }
 0x352   :  { %10599 = vmatprep.subr.bf16.mxu0 %v13136_v6  ;;  %10631 = vmatprep.subr.bf16.mxu1 %v13136_v6 }
 0x354   :  { %10552 = vmatmul.mubr.bf16.vlgmr.msra.gmra.mxu0 %v11387_v45  ;;  %10584 = vmatmul.mubr.bf16.vlgmr.msra.gmra.mxu1 %v11388_v27  ;;  %v11438_v45 = vld [vmem:[%s14784_s6 + $0x198] sm:$0xff]  }
 0x355   :  { %10600 = vmatpush3.bf16.msra.mxu0 %v13136_v6  ;;  %10632 = vmatpush3.bf16.msra.mxu1 %v13136_v6  ;;  %v11440_v27 = vld [vmem:[%s14784_s6 + $0x1d8] sm:$0xff]  }
 0x356   :  { %10601 = vmatprep.subr.bf16.mxu0 %v13132_v51  ;;  %10633 = vmatprep.subr.bf16.mxu1 %v13132_v51 }
 0x357   :  { %10555 = vmatprep.mubr.bf16.mxu0 %v11389_v0  ;;  %10587 = vmatprep.mubr.bf16.mxu1 %v11390_v23  ;;  %v11445_v0 = vld [vmem:[%s14784_s6 + $0x1e0] sm:$0xff]   ;;  %v11461_v23 = vld [vmem:[%s14782_s4 + $0x68] sm:$0xff]  }
 0x359   :  { %10602 = vmatpush3.bf16.msra.mxu0 %v13132_v51  ;;  %10634 = vmatpush3.bf16.msra.mxu1 %v13132_v51 }
 0x35a   :  { %10603 = vmatprep.subr.bf16.mxu0 %v13128_v25  ;;  %10635 = vmatprep.subr.bf16.mxu1 %v13128_v25 }
 0x35c   :  { %10556 = vmatmul.mubr.bf16.gmra.mxu0 %v11391_v17  ;;  %10588 = vmatmul.mubr.bf16.gmra.mxu1 %v11392_v19  ;;  %v11463_v17 = vld [vmem:[%s14782_s4 + $0x60] sm:$0xff]   ;;  %v11442_v19 = vld [vmem:[%s14784_s6 + $0x1a8] sm:$0xff]  }
 0x35d   :  { %10604 = vmatpush3.bf16.msra.mxu0 %v13128_v25  ;;  %10636 = vmatpush3.bf16.msra.mxu1 %v13128_v25 }
 0x35e   :  { %10605 = vmatprep.subr.bf16.mxu0 %v13124_v30  ;;  %10637 = vmatprep.subr.bf16.mxu1 %v13124_v30 }
 0x35f   :  { %10559 = vmatprep.mubr.bf16.mxu0 %v11393_v24  ;;  %10591 = vmatprep.mubr.bf16.mxu1 %v11394_v37  ;;  %v11446_v24 = vld [vmem:[%s14784_s6 + $0x1e8] sm:$0xff]   ;;  %v11451_v37 = vld [vmem:[%s14784_s6 + $0x1f0] sm:$0xff]  }
 0x361   :  { %10606 = vmatpush3.bf16.msra.mxu0 %v13124_v30  ;;  %10638 = vmatpush3.bf16.msra.mxu1 %v13124_v30 }
 0x362   :  { %10607 = vmatprep.subr.bf16.mxu0 %v13120_v31  ;;  %10639 = vmatprep.subr.bf16.mxu1 %v13120_v31 }
 0x364   :  { %10560 = vmatmul.mubr.bf16.gmra.mxu0 %v11395_v1  ;;  %10592 = vmatmul.mubr.bf16.gmra.mxu1 %v11396_v59  ;;  %v11464_v1 = vld [vmem:[%s14782_s4 + $0x20] sm:$0xff]   ;;  %v11466_v59 = vld [vmem:[%s14782_s4 + $0x18] sm:$0xff]  }
 0x365   :  { %10608 = vmatpush3.bf16.msra.mxu0 %v13120_v31  ;;  %10640 = vmatpush3.bf16.msra.mxu1 %v13120_v31 }
 0x366   :  { %10609 = vmatprep.subr.bf16.mxu0 %v13114_v29  ;;  %10641 = vmatprep.subr.bf16.mxu1 %v13114_v29 }
 0x367   :  { %10563 = vmatprep.mubr.bf16.mxu0 %v11397_v52  ;;  %10595 = vmatprep.mubr.bf16.mxu1 %v11398_v44  ;;  %v11444_v52 = vld [vmem:[%s14784_s6 + $0x1b8] sm:$0xff]  }
 0x368   :  { %v11452_v44 = vld [vmem:[%s14784_s6 + $0x1f8] sm:$0xff]  }
 0x369   :  { %10610 = vmatpush3.bf16.msra.mxu0 %v13114_v29  ;;  %10642 = vmatpush3.bf16.msra.mxu1 %v13114_v29 }
 0x36a   :  { %10611 = vmatprep.subr.bf16.mxu0 %v13106_v53  ;;  %10643 = vmatprep.subr.bf16.mxu1 %v13106_v53 }
 0x36c   :  { %10564 = vmatmul.mubr.bf16.gmra.mxu0 %v11399_v33  ;;  %10596 = vmatmul.mubr.bf16.gmra.mxu1 %v11400_v3  ;;  %v11467_v33 = vld [vmem:[%s14782_s4 + $0x50] sm:$0xff]  }
 0x36d   :  { %10612 = vmatpush3.bf16.msra.mxu0 %v13106_v53  ;;  %10644 = vmatpush3.bf16.msra.mxu1 %v13106_v53  ;;  %v11468_v3 = vld [vmem:[%s14782_s4 + $0x10] sm:$0xff]  }
 0x36e   :  { %10613 = vmatprep.subr.bf16.mxu0 %v13097_v60  ;;  %10645 = vmatprep.subr.bf16.mxu1 %v13097_v60 }
 0x36f   :  { %10615 = vmatprep.mubr.bf16.mxu0 %v11401_v54  ;;  %10647 = vmatprep.mubr.bf16.mxu1 %v11402_v11  ;;  %v11473_v54 = vld [vmem:[%s14782_s4 + $0xf8] sm:$0xff]   ;;  %v11470_v11 = vld [vmem:[%s14782_s4 + $0x8] sm:$0xff]  }
 0x371   :  { %10614 = vmatpush3.bf16.msra.mxu0 %v13097_v60  ;;  %10646 = vmatpush3.bf16.msra.mxu1 %v13097_v60 }
 0x372   :  { %10663 = vmatprep.subr.bf16.mxu0 %v13136_v6  ;;  %10695 = vmatprep.subr.bf16.mxu1 %v13136_v6 }
 0x374   :  { %10616 = vmatmul.mubr.bf16.vlgmr.msra.gmra.mxu0 %v11403_v15  ;;  %10648 = vmatmul.mubr.bf16.vlgmr.msra.gmra.mxu1 %v11404_v55  ;;  %v11448_v15 = vld [vmem:[%s14784_s6 + $0x208] sm:$0xff]   ;;  %v11449_v55 = vld [vmem:[%s14784_s6 + $0x210] sm:$0xff]  }
 0x375   :  { %10664 = vmatpush3.bf16.msra.mxu0 %v13136_v6  ;;  %10696 = vmatpush3.bf16.msra.mxu1 %v13136_v6 }
 0x376   :  { %10665 = vmatprep.subr.bf16.mxu0 %v13132_v51  ;;  %10697 = vmatprep.subr.bf16.mxu1 %v13132_v51 }
 0x377   :  { %10619 = vmatprep.mubr.bf16.mxu0 %v11405_v49  ;;  %10651 = vmatprep.mubr.bf16.mxu1 %v11406_v9  ;;  %v11474_v49 = vld [vmem:[%s14782_s4 + $0xb8] sm:$0xff]   ;;  %v11475_v9 = vld [vmem:[%s14782_s4 + $0xf0] sm:$0xff]  }
 0x379   :  { %10666 = vmatpush3.bf16.msra.mxu0 %v13132_v51  ;;  %10698 = vmatpush3.bf16.msra.mxu1 %v13132_v51 }
 0x37a   :  { %10667 = vmatprep.subr.bf16.mxu0 %v13128_v25  ;;  %10699 = vmatprep.subr.bf16.mxu1 %v13128_v25 }
 0x37c   :  { %10620 = vmatmul.mubr.bf16.gmra.mxu0 %v11407_v61  ;;  %10652 = vmatmul.mubr.bf16.gmra.mxu1 %v11408_v16  ;;  %v11472_v61 = vld [vmem:[%s14782_s4] sm:$0xff]   ;;  %v11476_v16 = vld [vmem:[%s14782_s4 + $0xb0] sm:$0xff]  }
 0x37d   :  { %10668 = vmatpush3.bf16.msra.mxu0 %v13128_v25  ;;  %10700 = vmatpush3.bf16.msra.mxu1 %v13128_v25 }
 0x37e   :  { %10669 = vmatprep.subr.bf16.mxu0 %v13124_v30  ;;  %10701 = vmatprep.subr.bf16.mxu1 %v13124_v30 }
 0x37f   :  { %10623 = vmatprep.mubr.bf16.mxu0 %v11409_v13  ;;  %10655 = vmatprep.mubr.bf16.mxu1 %v11410_v58  ;;  %v11477_v13 = vld [vmem:[%s14782_s4 + $0xe8] sm:$0xff]   ;;  %v11450_v58 = vld [vmem:[%s14784_s6 + $0x218] sm:$0xff]  }
 0x381   :  { %10670 = vmatpush3.bf16.msra.mxu0 %v13124_v30  ;;  %10702 = vmatpush3.bf16.msra.mxu1 %v13124_v30 }
 0x382   :  { %10671 = vmatprep.subr.bf16.mxu0 %v13120_v31  ;;  %10703 = vmatprep.subr.bf16.mxu1 %v13120_v31 }
 0x384   :  { %10624 = vmatmul.mubr.bf16.gmra.mxu0 %v11411_v63  ;;  %10656 = vmatmul.mubr.bf16.gmra.mxu1 %v11412_v18  ;;  %v11453_v63 = vld [vmem:[%s14784_s6 + $0x220] sm:$0xff]   ;;  %v11478_v18 = vld [vmem:[%s14782_s4 + $0xa8] sm:$0xff]  }
 0x385   :  { %10672 = vmatpush3.bf16.msra.mxu0 %v13120_v31  ;;  %10704 = vmatpush3.bf16.msra.mxu1 %v13120_v31 }
 0x386   :  { %10673 = vmatprep.subr.bf16.mxu0 %v13114_v29  ;;  %10705 = vmatprep.subr.bf16.mxu1 %v13114_v29 }
 0x387   :  { %10627 = vmatprep.mubr.bf16.mxu0 %v11413_v43  ;;  %10659 = vmatprep.mubr.bf16.mxu1 %v11414_v50  ;;  %v11479_v43 = vld [vmem:[%s14782_s4 + $0xe0] sm:$0xff]  }
 0x388   :  { %v11480_v50 = vld [vmem:[%s14782_s4 + $0xa0] sm:$0xff]  }
 0x389   :  { %10674 = vmatpush3.bf16.msra.mxu0 %v13114_v29  ;;  %10706 = vmatpush3.bf16.msra.mxu1 %v13114_v29 }
 0x38a   :  { %10675 = vmatprep.subr.bf16.mxu0 %v13106_v53  ;;  %10707 = vmatprep.subr.bf16.mxu1 %v13106_v53 }
 0x38c   :  { %10628 = vmatmul.mubr.bf16.gmra.mxu0 %v11415_v28  ;;  %10660 = vmatmul.mubr.bf16.gmra.mxu1 %v11416_v42  ;;  %v11481_v28 = vld [vmem:[%s14782_s4 + $0xd8] sm:$0xff]   ;;  %v11454_v42 = vld [vmem:[%s14784_s6 + $0x228] sm:$0xff]  }
 0x38d   :  { %10676 = vmatpush3.bf16.msra.mxu0 %v13106_v53  ;;  %10708 = vmatpush3.bf16.msra.mxu1 %v13106_v53 }
 0x38e   :  { %10677 = vmatprep.subr.bf16.mxu0 %v13097_v60  ;;  %10709 = vmatprep.subr.bf16.mxu1 %v13097_v60 }
 0x38f   :  { %10679 = vmatprep.mubr.bf16.mxu0 %v11417_v57  ;;  %10711 = vmatprep.mubr.bf16.mxu1 %v11418_v36  ;;  %v11455_v57 = vld [vmem:[%s14784_s6 + $0x230] sm:$0xff]   ;;  %v11482_v36 = vld [vmem:[%s14782_s4 + $0x98] sm:$0xff]  }
 0x391   :  { %10678 = vmatpush3.bf16.msra.mxu0 %v13097_v60  ;;  %10710 = vmatpush3.bf16.msra.mxu1 %v13097_v60 }
 0x392   :  { %10727 = vmatprep.subr.bf16.mxu0 %v13136_v6  ;;  %10759 = vmatprep.subr.bf16.mxu1 %v13136_v6 }
 0x394   :  { %10680 = vmatmul.mubr.bf16.vlgmr.msra.gmra.mxu0 %v11419_v5  ;;  %10712 = vmatmul.mubr.bf16.vlgmr.msra.gmra.mxu1 %v11420_v12  ;;  %v11483_v5 = vld [vmem:[%s14782_s4 + $0xd0] sm:$0xff]  }
 0x395   :  { %10728 = vmatpush3.bf16.msra.mxu0 %v13136_v6  ;;  %10760 = vmatpush3.bf16.msra.mxu1 %v13136_v6  ;;  %v11484_v12 = vld [vmem:[%s14782_s4 + $0x90] sm:$0xff]  }
 0x396   :  { %10729 = vmatprep.subr.bf16.mxu0 %v13132_v51  ;;  %10761 = vmatprep.subr.bf16.mxu1 %v13132_v51 }
 0x397   :  { %10683 = vmatprep.mubr.bf16.mxu0 %v11421_v38  ;;  %10715 = vmatprep.mubr.bf16.mxu1 %v11422_v32  ;;  %v11485_v38 = vld [vmem:[%s14782_s4 + $0xc8] sm:$0xff]   ;;  %v11456_v32 = vld [vmem:[%s14784_s6 + $0x238] sm:$0xff]  }
 0x399   :  { %10730 = vmatpush3.bf16.msra.mxu0 %v13132_v51  ;;  %10762 = vmatpush3.bf16.msra.mxu1 %v13132_v51 }
 0x39a   :  { %10731 = vmatprep.subr.bf16.mxu0 %v13128_v25  ;;  %10763 = vmatprep.subr.bf16.mxu1 %v13128_v25 }
 0x39c   :  { %10684 = vmatmul.mubr.bf16.gmra.mxu0 %v11423_v20  ;;  %10716 = vmatmul.mubr.bf16.gmra.mxu1 %v11424_v34  ;;  %v11486_v20 = vld [vmem:[%s14782_s4 + $0x88] sm:$0xff]   ;;  %v11487_v34 = vld [vmem:[%s14782_s4 + $0xc0] sm:$0xff]  }
 0x39d   :  { %10732 = vmatpush3.bf16.msra.mxu0 %v13128_v25  ;;  %10764 = vmatpush3.bf16.msra.mxu1 %v13128_v25 }
 0x39e   :  { %10733 = vmatprep.subr.bf16.mxu0 %v13124_v30  ;;  %10765 = vmatprep.subr.bf16.mxu1 %v13124_v30 }
 0x39f   :  { %10687 = vmatprep.mubr.bf16.mxu0 %v11425_v39  ;;  %10719 = vmatprep.mubr.bf16.mxu1 %v11426_v62  ;;  %v11488_v39 = vld [vmem:[%s14782_s4 + $0x80] sm:$0xff]   ;;  %v11505_v62 = vld [vmem:[%s14782_s4 + $0x1f8] sm:$0xff]  }
 0x3a1   :  { %10734 = vmatpush3.bf16.msra.mxu0 %v13124_v30  ;;  %10766 = vmatpush3.bf16.msra.mxu1 %v13124_v30 }
 0x3a2   :  { %10735 = vmatprep.subr.bf16.mxu0 %v13120_v31  ;;  %10767 = vmatprep.subr.bf16.mxu1 %v13120_v31 }
 0x3a4   :  { %10688 = vmatmul.mubr.bf16.gmra.mxu0 %v11427_v40  ;;  %10720 = vmatmul.mubr.bf16.gmra.mxu1 %v11428_v22 }
 0x3a5   :  { %10736 = vmatpush3.bf16.msra.mxu0 %v13120_v31  ;;  %10768 = vmatpush3.bf16.msra.mxu1 %v13120_v31 }
 0x3a6   :  { %10737 = vmatprep.subr.bf16.mxu0 %v13114_v29  ;;  %10769 = vmatprep.subr.bf16.mxu1 %v13114_v29 }
 0x3a7   :  { %10691 = vmatprep.mubr.bf16.mxu0 %v11429_v21  ;;  %10723 = vmatprep.mubr.bf16.mxu1 %v11430_v35 }
 0x3a9   :  { %10738 = vmatpush3.bf16.msra.mxu0 %v13114_v29  ;;  %10770 = vmatpush3.bf16.msra.mxu1 %v13114_v29 }
 0x3aa   :  { %10739 = vmatprep.subr.bf16.mxu0 %v13106_v53  ;;  %10771 = vmatprep.subr.bf16.mxu1 %v13106_v53 }
 0x3ac   :  { %10692 = vmatmul.mubr.bf16.gmra.mxu0 %v11431_v41  ;;  %10724 = vmatmul.mubr.bf16.gmra.mxu1 %v11432_v10 }
 0x3ad   :  { %10740 = vmatpush3.bf16.msra.mxu0 %v13106_v53  ;;  %10772 = vmatpush3.bf16.msra.mxu1 %v13106_v53 }
 0x3ae   :  { %10741 = vmatprep.subr.bf16.mxu0 %v13097_v60  ;;  %10773 = vmatprep.subr.bf16.mxu1 %v13097_v60 }
 0x3af   :  { %10743 = vmatprep.mubr.bf16.mxu0 %v11433_v4  ;;  %10775 = vmatprep.mubr.bf16.mxu1 %v11434_v8 }
 0x3b1   :  { %10742 = vmatpush3.bf16.msra.mxu0 %v13097_v60  ;;  %10774 = vmatpush3.bf16.msra.mxu1 %v13097_v60 }
 0x3b2   :  { %10791 = vmatprep.subr.bf16.mxu0 %v13136_v6  ;;  %9864 = vmatprep.subr.bf16.mxu1 %v11457_v26 }
 0x3b4   :  { %10744 = vmatmul.mubr.bf16.vlgmr.msra.gmra.mxu0 %v11435_v7  ;;  %10776 = vmatmul.mubr.bf16.vlgmr.msra.gmra.mxu1 %v11436_v2  ;;  %v11490_v2 = vld [vmem:[%s14782_s4 + $0x138] sm:$0xff]  }
 0x3b5   :  { %10792 = vmatpush3.bf16.msra.mxu0 %v13136_v6  ;;  %10747 = vmatprep.mubr.bf16.mxu0 %v11437_v56  ;;  %v11441_v6 = vld [vmem:[%s14784_s6 + $0x1a0] sm:$0xff]  }
 0x3b6   :  { %10793 = vmatprep.subr.bf16.mxu0 %v13132_v51  ;;  %10779 = vmatprep.mubr.bf16.mxu1 %v11439_v48 }
 0x3b7   :  { %9865 = vmatpush3.bf16.msra.mxu1 %v11458_v46  ;;  %v11491_v46 = vld [vmem:[%s14782_s4 + $0x170] sm:$0xff]  }
 0x3b8   :  { %9866 = vmatprep.subr.bf16.mxu1 %v11459_v47 }
 0x3b9   :  { %10794 = vmatpush3.bf16.msra.mxu0 %v13132_v51  ;;  %v11462_v51 = vld [vmem:[%s14782_s4 + $0x28] sm:$0xff]  }
 0x3ba   :  { %10795 = vmatprep.subr.bf16.mxu0 %v13128_v25 }
 0x3bb   :  { %9867 = vmatpush3.bf16.msra.mxu1 %v11460_v14 }
 0x3bc   :  { %10748 = vmatmul.mubr.bf16.gmra.mxu0 %v11438_v45  ;;  %10780 = vmatmul.mubr.bf16.gmra.mxu1 %v11440_v27  ;;  %v11492_v27 = vld [vmem:[%s14782_s4 + $0x130] sm:$0xff]  }
 0x3bd   :  { %10796 = vmatpush3.bf16.msra.mxu0 %v13128_v25  ;;  %10751 = vmatprep.mubr.bf16.mxu0 %v11441_v6  ;;  %v11443_v25 = vld [vmem:[%s14784_s6 + $0x1b0] sm:$0xff]  }
 0x3be   :  { %10797 = vmatprep.subr.bf16.mxu0 %v13124_v30  ;;  %10783 = vmatprep.mubr.bf16.mxu1 %v11445_v0 }
 0x3bf   :  { %9868 = vmatprep.subr.bf16.mxu1 %v11461_v23  ;;  %v11493_v23 = vld [vmem:[%s14782_s4 + $0x168] sm:$0xff]  }
 0x3c0   :  { %9869 = vmatpush3.bf16.msra.mxu1 %v11462_v51 }
 0x3c1   :  { %10798 = vmatpush3.bf16.msra.mxu0 %v13124_v30  ;;  %9870 = vmatprep.subr.bf16.mxu1 %v11463_v17  ;;  %v11465_v30 = vld [vmem:[%s14782_s4 + $0x58] sm:$0xff]  }
 0x3c2   :  { %10799 = vmatprep.subr.bf16.mxu0 %v13120_v31 }
 0x3c4   :  { %10752 = vmatmul.mubr.bf16.gmra.mxu0 %v11442_v19  ;;  %10784 = vmatmul.mubr.bf16.gmra.mxu1 %v11446_v24  ;;  %v11494_v19 = vld [vmem:[%s14782_s4 + $0x128] sm:$0xff]  }
 0x3c5   :  { %10800 = vmatpush3.bf16.msra.mxu0 %v13120_v31  ;;  %10755 = vmatprep.mubr.bf16.mxu0 %v11443_v25  ;;  %v11447_v31 = vld [vmem:[%s14784_s6 + $0x200] sm:$0xff]  }
 0x3c6   :  { %10801 = vmatprep.subr.bf16.mxu0 %v13114_v29  ;;  %10787 = vmatprep.mubr.bf16.mxu1 %v11451_v37 }
 0x3c7   :  { %9871 = vmatpush3.bf16.msra.mxu1 %v11464_v1  ;;  %v11495_v1 = vld [vmem:[%s14782_s4 + $0x160] sm:$0xff]  }
 0x3c8   :  { %9872 = vmatprep.subr.bf16.mxu1 %v11465_v30 }
 0x3c9   :  { %10802 = vmatpush3.bf16.msra.mxu0 %v13114_v29  ;;  %v11469_v29 = vld [vmem:[%s14782_s4 + $0x48] sm:$0xff]  }
 0x3ca   :  { %10803 = vmatprep.subr.bf16.mxu0 %v13106_v53 }
 0x3cb   :  { %9873 = vmatpush3.bf16.msra.mxu1 %v11466_v59 }
 0x3cc   :  { %10756 = vmatmul.mubr.bf16.gmra.mxu0 %v11444_v52  ;;  %10788 = vmatmul.mubr.bf16.gmra.mxu1 %v11452_v44  ;;  %v11496_v44 = vld [vmem:[%s14782_s4 + $0x120] sm:$0xff]  }
 0x3cd   :  { %10804 = vmatpush3.bf16.msra.mxu0 %v13106_v53  ;;  %10807 = vmatprep.mubr.bf16.mxu0 %v11447_v31  ;;  %v11471_v53 = vld [vmem:[%s14782_s4 + $0x40] sm:$0xff]  }
 0x3ce   :  { %10805 = vmatprep.subr.bf16.mxu0 %v13097_v60  ;;  %9874 = vmatprep.subr.bf16.mxu1 %v11467_v33 }
 0x3cf   :  { %9875 = vmatpush3.bf16.msra.mxu1 %v11468_v3  ;;  %v11497_v3 = vld [vmem:[%s14782_s4 + $0x158] sm:$0xff]  }
 0x3d0   :  { %9876 = vmatprep.subr.bf16.mxu1 %v11469_v29 }
 0x3d1   :  { %10806 = vmatpush3.bf16.msra.mxu0 %v13097_v60  ;;  %v11489_v60 = vld [vmem:[%s14782_s4 + $0x178] sm:$0xff]  }
 0x3d2   :  { %9928 = vmatprep.subr.bf16.mxu0 %v11473_v54 }
 0x3d3   :  { %9877 = vmatpush3.bf16.msra.mxu1 %v11470_v11  ;;  %v11498_v11 = vld [vmem:[%s14782_s4 + $0x118] sm:$0xff]  }
 0x3d4   :  { %10808 = vmatmul.mubr.bf16.vlgmr.msra.gmra.mxu0 %v11448_v15  ;;  %9878 = vmatprep.subr.bf16.mxu1 %v11471_v53 }
 0x3d5   :  { %10811 = vmatprep.mubr.bf16.mxu0 %v11449_v55  ;;  %9929 = vmatpush3.bf16.msra.mxu0 %v11474_v49  ;;  %v11499_v49 = vld [vmem:[%s14782_s4 + $0x150] sm:$0xff]  }
 0x3d6   :  { %9930 = vmatprep.subr.bf16.mxu0 %v11475_v9 }
 0x3d7   :  { %9879 = vmatpush3.bf16.msra.mxu1 %v11472_v61 }
 0x3d8   :  { %9992 = vmatprep.subr.bf16.mxu1 %v11489_v60 }
 0x3d9   :  { %9931 = vmatpush3.bf16.msra.mxu0 %v11476_v16  ;;  %v11500_v16 = vld [vmem:[%s14782_s4 + $0x110] sm:$0xff]  }
 0x3da   :  { %9932 = vmatprep.subr.bf16.mxu0 %v11477_v13 }
 0x3dc   :  { %10812 = vmatmul.mubr.bf16.gmra.mxu0 %v11450_v58 }
 0x3dd   :  { %10815 = vmatprep.mubr.bf16.mxu0 %v11453_v63  ;;  %9933 = vmatpush3.bf16.msra.mxu0 %v11478_v18  ;;  %v11501_v63 = vld [vmem:[%s14782_s4 + $0x148] sm:$0xff]  }
 0x3de   :  { %9934 = vmatprep.subr.bf16.mxu0 %v11479_v43 }
 0x3e1   :  { %9935 = vmatpush3.bf16.msra.mxu0 %v11480_v50  ;;  %v11502_v50 = vld [vmem:[%s14782_s4 + $0x108] sm:$0xff]  }
 0x3e2   :  { %9936 = vmatprep.subr.bf16.mxu0 %v11481_v28 }
 0x3e4   :  { %10816 = vmatmul.mubr.bf16.gmra.mxu0 %v11454_v42 }
 0x3e5   :  { %10819 = vmatprep.mubr.bf16.mxu0 %v11455_v57  ;;  %9937 = vmatpush3.bf16.msra.mxu0 %v11482_v36  ;;  %v11503_v36 = vld [vmem:[%s14782_s4 + $0x140] sm:$0xff]  }
 0x3e6   :  { %9938 = vmatprep.subr.bf16.mxu0 %v11483_v5 }
 0x3e9   :  { %9939 = vmatpush3.bf16.msra.mxu0 %v11484_v12 }
 0x3ea   :  { %9940 = vmatprep.subr.bf16.mxu0 %v11485_v38 }
 0x3ec   :  { %10820 = vmatmul.mubr.bf16.gmra.mxu0 %v11456_v32  ;;  %v11504_v32 = vld [vmem:[%s14782_s4 + $0x100] sm:$0xff]  }
 0x3ed   :  { %9941 = vmatpush3.bf16.msra.mxu0 %v11486_v20 }
 0x3ee   :  { %9942 = vmatprep.subr.bf16.mxu0 %v11487_v34 }
 0x3f1   :  { %9943 = vmatpush3.bf16.msra.mxu0 %v11488_v39  ;;  %v13667_v39 = vld [vmem:[%s14782_s4 + $0x238] sm:$0xff]  }
 0x3f2   :  { %10056 = vmatprep.subr.bf16.mxu0 %v11505_v62 }
 0x414   :  { %v10553_v40 = vpop.f32.mrf.mxu0  ;;  %v10585_v22 = vpop.f32.mrf.mxu1 }
 0x416   :  { %v2477_v21 = vpop.f32.mrf.mxu0  ;;  %v2647_v35 = vpop.f32.mrf.mxu1 }
 0x418   :  { %v10554_v41 = vpop.f32.mrf.mxu0  ;;  %v10586_v10 = vpop.f32.mrf.mxu1 }
 0x419   :  { %v2711_v47 = vpack.c.bf16 %v10586_v10, %v10585_v22  ;;  %v2541_v24 = vpack.c.bf16 %v10554_v41, %v10553_v40 }
 0x41a   :  { %v2480_v4 = vpop.f32.mrf.mxu0  ;;  %v2650_v8 = vpop.f32.mrf.mxu1 }
 0x41b   :  { %v2540_v26 = vpack.c.bf16 %v2480_v4, %v2477_v21  ;;  %v2710_v7 = vpack.c.bf16 %v2650_v8, %v2647_v35  ;;  %v11506_v4 = vld [vmem:[%s14782_s4 + $0x1b8] sm:$0xff]  }
 0x41c   :  { %v13597_v56 = vpop.f32.mrf.mxu0  ;;  %v10589_v48 = vpop.f32.mrf.mxu1 }
 0x41d   :  { %4523 = vmatprep.mubr.bf16.mxu1 %v2710_v7  ;;  %v11507_v7 = vld [vmem:[%s14782_s4 + $0x1f0] sm:$0xff]  }
 0x41e   :  { %v2493_v14 = vpop.f32.mrf.mxu0  ;;  %v2663_v45 = vpop.f32.mrf.mxu1  ;;  %4524 = vmatmul.mubr.bf16.vlgmr.msra.gmra.mxu1 %v2540_v26 }
 0x41f   :  { %4531 = vmatprep.mubr.bf16.mxu1 %v2711_v47  ;;  %9993 = vmatpush3.bf16.msra.mxu1 %v11490_v2  ;;  %v11508_v47 = vld [vmem:[%s14782_s4 + $0x1b0] sm:$0xff]  }
 0x420   :  { %v10558_v6 = vpop.f32.mrf.mxu0  ;;  %v10590_v0 = vpop.f32.mrf.mxu1  ;;  %9994 = vmatprep.subr.bf16.mxu1 %v11491_v46 }
 0x421   :  { %v2713_v9 = vpack.c.bf16 %v10590_v0, %v10589_v48  ;;  %v2543_v28 = vpack.c.bf16 %v10558_v6, %v13597_v56 }
 0x422   :  { %v2496_v51 = vpop.f32.mrf.mxu0  ;;  %v2666_v17 = vpop.f32.mrf.mxu1 }
 0x423   :  { %9995 = vmatpush3.bf16.msra.mxu1 %v11492_v27  ;;  %v2712_v30 = vpack.c.bf16 %v2666_v17, %v2663_v45  ;;  %v2542_v15 = vpack.c.bf16 %v2496_v51, %v2493_v14  ;;  %v11509_v14 = vld [vmem:[%s14782_s4 + $0x1e8] sm:$0xff]  }
 0x424   :  { %v13611_v25 = vpop.f32.mrf.mxu0  ;;  %v13613_v37 = vpop.f32.mrf.mxu1  ;;  %9996 = vmatprep.subr.bf16.mxu1 %v11493_v23  ;;  %v11510_v17 = vld [vmem:[%s14782_s4 + $0x1a8] sm:$0xff]  }
 0x426   :  { %v13618_v59 = vpop.f32.mrf.mxu0  ;;  %v2679_v52 = vpop.f32.mrf.mxu1  ;;  %4532 = vmatmul.mubr.bf16.gmra.mxu1 %v2541_v24 }
 0x427   :  { %4539 = vmatprep.mubr.bf16.mxu1 %v2712_v30  ;;  %9997 = vmatpush3.bf16.msra.mxu1 %v11494_v19 }
 0x428   :  { %v13623_v31 = vpop.f32.mrf.mxu0  ;;  %v10594_v33 = vpop.f32.mrf.mxu1  ;;  %9998 = vmatprep.subr.bf16.mxu1 %v11495_v1 }
 0x429   :  { %v2715_v8 = vpack.c.bf16 %v10594_v33, %v13613_v37  ;;  %v2545_v6 = vpack.c.bf16 %v13623_v31, %v13611_v25  ;;  %v11511_v37 = vld [vmem:[%s14782_s4 + $0x1e0] sm:$0xff]  }
 0x42a   :  { %v2512_v29 = vpop.f32.mrf.mxu0  ;;  %v2682_v54 = vpop.f32.mrf.mxu1 }
 0x42b   :  { %9999 = vmatpush3.bf16.msra.mxu1 %v11496_v44  ;;  %v2714_v5 = vpack.c.bf16 %v2682_v54, %v2679_v52  ;;  %v2544_v35 = vpack.c.bf16 %v2512_v29, %v13618_v59  ;;  %v11512_v52 = vld [vmem:[%s14782_s4 + $0x1a0] sm:$0xff]   ;;  %v11513_v44 = vld [vmem:[%s14782_s4 + $0x1d8] sm:$0xff]  }
 0x42c   :  { %v13631_v53 = vpop.f32.mrf.mxu0  ;;  %v13633_v55 = vpop.f32.mrf.mxu1  ;;  %10000 = vmatprep.subr.bf16.mxu1 %v11497_v3 }
 0x42e   :  { %v13638_v61 = vpop.f32.mrf.mxu0  ;;  %v13640_v60 = vpop.f32.mrf.mxu1  ;;  %4540 = vmatmul.mubr.bf16.gmra.mxu1 %v2542_v15  ;;  %v11514_v15 = vld [vmem:[%s14782_s4 + $0x198] sm:$0xff]  }
 0x42f   :  { %4547 = vmatprep.mubr.bf16.mxu1 %v2713_v9  ;;  %10001 = vmatpush3.bf16.msra.mxu1 %v11498_v11 }
 0x430   :  { %v13645_v13 = vpop.f32.mrf.mxu0  ;;  %v13647_v58 = vpop.f32.mrf.mxu1  ;;  %10002 = vmatprep.subr.bf16.mxu1 %v11499_v49 }
 0x431   :  { %v2717_v49 = vpack.c.bf16 %v13647_v58, %v13633_v55  ;;  %v11516_v55 = vld [vmem:[%s14782_s4 + $0x190] sm:$0xff]   ;;  %v11517_v58 = vld [vmem:[%s14782_s4 + $0x1c8] sm:$0xff]  }
 0x432   :  { %v13652_v18 = vpop.f32.mrf.mxu0  ;;  %v2698_v43 = vpop.f32.mrf.mxu1 }
 0x433   :  { %10003 = vmatpush3.bf16.msra.mxu1 %v11500_v16  ;;  %v2716_v19 = vpack.c.bf16 %v2698_v43, %v13640_v60  ;;  %v2546_v3 = vpack.c.bf16 %v13652_v18, %v13638_v61  ;;  %v11515_v60 = vld [vmem:[%s14782_s4 + $0x1d0] sm:$0xff]  }
 0x434   :  { %v10617_v42 = vpop.f32.mrf.mxu0  ;;  %v10649_v57 = vpop.f32.mrf.mxu1  ;;  %10004 = vmatprep.subr.bf16.mxu1 %v11501_v63 }
 0x436   :  { %v2817_v12 = vpop.f32.mrf.mxu0  ;;  %v2987_v38 = vpop.f32.mrf.mxu1  ;;  %4548 = vmatmul.mubr.bf16.gmra.mxu1 %v2543_v28  ;;  %v2547_v28 = vpack.c.bf16 %v13645_v13, %v13631_v53 }
 0x437   :  { %4555 = vmatprep.mubr.bf16.mxu1 %v2714_v5  ;;  %10005 = vmatpush3.bf16.msra.mxu1 %v11502_v50  ;;  %v11518_v5 = vld [vmem:[%s14782_s4 + $0x188] sm:$0xff]  }
 0x438   :  { %v10618_v20 = vpop.f32.mrf.mxu0  ;;  %v10650_v34 = vpop.f32.mrf.mxu1  ;;  %10006 = vmatprep.subr.bf16.mxu1 %v11503_v36 }
 0x439   :  { %v3051_v26 = vpack.c.bf16 %v10650_v34, %v10649_v57  ;;  %v2881_v0 = vpack.c.bf16 %v10618_v20, %v10617_v42  ;;  %v11520_v34 = vld [vmem:[%s14782_s4 + $0x180] sm:$0xff]  }
 0x43a   :  { %v2820_v62 = vpop.f32.mrf.mxu0  ;;  %v2990_v40 = vpop.f32.mrf.mxu1 }
 0x43b   :  { %v2880_v22 = vpack.c.bf16 %v2820_v62, %v2817_v12  ;;  %v3050_v21 = vpack.c.bf16 %v2990_v40, %v2987_v38  ;;  %10007 = vmatpush3.bf16.msra.mxu1 %v11504_v32  ;;  %v11519_v38 = vld [vmem:[%s14782_s4 + $0x1c0] sm:$0xff]  }
 0x43c   :  { %v13670_v41 = vpop.f32.mrf.mxu0  ;;  %v10653_v10 = vpop.f32.mrf.mxu1  ;;  %10823 = vmatprep.subr.bf16.mxu1 %v13667_v39 }
 0x43d   :  { %4620 = vmatprep.mubr.bf16.mxu0 %v3050_v21 }
 0x43e   :  { %v2833_v2 = vpop.f32.mrf.mxu0  ;;  %v3003_v56 = vpop.f32.mrf.mxu1  ;;  %4556 = vmatmul.mubr.bf16.gmra.mxu1 %v2544_v35  ;;  %4621 = vmatmul.mubr.bf16.vlgmr.msra.gmra.mxu0 %v2880_v22 }
 0x43f   :  { %4563 = vmatprep.mubr.bf16.mxu1 %v2715_v8  ;;  %4628 = vmatprep.mubr.bf16.mxu0 %v3051_v26  ;;  %v11522_v26 = vld [vmem:[%s14782_s4 + $0x230] sm:$0xff]  }
 0x440   :  { %v13680_v48 = vpop.f32.mrf.mxu0  ;;  %v10654_v46 = vpop.f32.mrf.mxu1  ;;  %10057 = vmatpush3.bf16.msra.mxu0 %v11506_v4 }
 0x441   :  { %10058 = vmatprep.subr.bf16.mxu0 %v11507_v7  ;;  %v3053_v9 = vpack.c.bf16 %v10654_v46, %v10653_v10  ;;  %v2883_v42 = vpack.c.bf16 %v13680_v48, %v13670_v41  ;;  %v11523_v46 = vld [vmem:[%s14782_s4 + $0x228] sm:$0xff]  }
 0x442   :  { %v2836_v45 = vpop.f32.mrf.mxu0  ;;  %v3006_v27 = vpop.f32.mrf.mxu1 }
 0x443   :  { %v3052_v24 = vpack.c.bf16 %v3006_v27, %v3003_v56  ;;  %v2882_v29 = vpack.c.bf16 %v2836_v45, %v2833_v2 }
 0x444   :  { %v13690_v23 = vpop.f32.mrf.mxu0  ;;  %v13692_v51 = vpop.f32.mrf.mxu1  ;;  %10059 = vmatpush3.bf16.msra.mxu0 %v11508_v47 }
 0x445   :  { %10060 = vmatprep.subr.bf16.mxu0 %v11509_v14 }
 0x446   :  { %v13701_v1 = vpop.f32.mrf.mxu0  ;;  %v3019_v25 = vpop.f32.mrf.mxu1  ;;  %4564 = vmatmul.mubr.bf16.gmra.mxu1 %v2545_v6  ;;  %4629 = vmatmul.mubr.bf16.gmra.mxu0 %v2881_v0 }
 0x447   :  { %4571 = vmatprep.mubr.bf16.mxu1 %v2716_v19  ;;  %4636 = vmatprep.mubr.bf16.mxu0 %v3052_v24 }
 0x448   :  { %v13703_v30 = vpop.f32.mrf.mxu0  ;;  %v13705_v59 = vpop.f32.mrf.mxu1  ;;  %10061 = vmatpush3.bf16.msra.mxu0 %v11510_v17 }
 0x449   :  { %10062 = vmatprep.subr.bf16.mxu0 %v11511_v37  ;;  %v3055_v4 = vpack.c.bf16 %v13705_v59, %v13692_v51  ;;  %v2885_v45 = vpack.c.bf16 %v13703_v30, %v13690_v23 }
 0x44a   :  { %v2852_v31 = vpop.f32.mrf.mxu0  ;;  %v3022_v33 = vpop.f32.mrf.mxu1 }
 0x44b   :  { %v3054_v12 = vpack.c.bf16 %v3022_v33, %v3019_v25  ;;  %v2884_v35 = vpack.c.bf16 %v2852_v31, %v13701_v1  ;;  %v11525_v1 = vld [vmem:[%s14782_s4 + $0x218] sm:$0xff]  }
 0x44c   :  { %v13715_v54 = vpop.f32.mrf.mxu0  ;;  %v13717_v11 = vpop.f32.mrf.mxu1  ;;  %10063 = vmatpush3.bf16.msra.mxu0 %v11512_v52 }
 0x44d   :  { %10064 = vmatprep.subr.bf16.mxu0 %v11513_v44 }
 0x44e   :  { %v13727_v61 = vpop.f32.mrf.mxu0  ;;  %v13729_v16 = vpop.f32.mrf.mxu1  ;;  %4572 = vmatmul.mubr.bf16.gmra.mxu1 %v2546_v3  ;;  %4637 = vmatmul.mubr.bf16.gmra.mxu0 %v2882_v29  ;;  %v11526_v29 = vld [vmem:[%s14782_s4 + $0x210] sm:$0xff]  }
 0x44f   :  { %4579 = vmatprep.mubr.bf16.mxu1 %v2717_v49  ;;  %4644 = vmatprep.mubr.bf16.mxu0 %v3053_v9 }
 0x450   :  { %v13731_v63 = vpop.f32.mrf.mxu0  ;;  %v13733_v18 = vpop.f32.mrf.mxu1  ;;  %10065 = vmatpush3.bf16.msra.mxu0 %v11514_v15 }
 0x451   :  { %10066 = vmatprep.subr.bf16.mxu0 %v11515_v60  ;;  %v3057_v33 = vpack.c.bf16 %v13733_v18, %v13717_v11  ;;  %v11527_v11 = vld [vmem:[%s14782_s4 + $0x208] sm:$0xff]   ;;  %v2887_v18 = vpack.c.bf16 %v13731_v63, %v13715_v54 }
 0x452   :  { %v13741_v43 = vpop.f32.mrf.mxu0  ;;  %v3038_v50 = vpop.f32.mrf.mxu1 }
 0x453   :  { %v3056_v51 = vpack.c.bf16 %v3038_v50, %v13729_v16  ;;  %v2886_v59 = vpack.c.bf16 %v13741_v43, %v13727_v61 }
 0x454   :  { %v10681_v57 = vpop.f32.mrf.mxu0  ;;  %v10713_v36 = vpop.f32.mrf.mxu1  ;;  %10067 = vmatpush3.bf16.msra.mxu0 %v11516_v55 }
 0x455   :  { %10068 = vmatprep.subr.bf16.mxu0 %v11517_v58 }
 0x456   :  { %v3157_v32 = vpop.f32.mrf.mxu0  ;;  %v3327_v20 = vpop.f32.mrf.mxu1  ;;  %4580 = vmatmul.mubr.bf16.gmra.mxu1 %v2547_v28  ;;  %4645 = vmatmul.mubr.bf16.gmra.mxu0 %v2883_v42  ;;  %v11528_v28 = vld [vmem:[%s14782_s4 + $0x200] sm:$0xff]  }
 0x457   :  { %4652 = vmatprep.mubr.bf16.mxu0 %v3054_v12 }
 0x458   :  { %v10682_v53 = vpop.f32.mrf.mxu0  ;;  %v10714_v13 = vpop.f32.mrf.mxu1  ;;  %10069 = vmatpush3.bf16.msra.mxu0 %v11518_v5 }
 0x459   :  { %10070 = vmatprep.subr.bf16.mxu0 %v11519_v38  ;;  %v3391_v8 = vpack.c.bf16 %v10714_v13, %v10713_v36  ;;  %v3221_v27 = vpack.c.bf16 %v10682_v53, %v10681_v57 }
 0x45a   :  { %v3160_v62 = vpop.f32.mrf.mxu0  ;;  %v3330_v40 = vpop.f32.mrf.mxu1 }
 0x45b   :  { %v3220_v22 = vpack.c.bf16 %v3160_v62, %v3157_v32  ;;  %v3390_v21 = vpack.c.bf16 %v3330_v40, %v3327_v20 }
 0x45c   :  { %v13757_v41 = vpop.f32.mrf.mxu0  ;;  %v10717_v10 = vpop.f32.mrf.mxu1  ;;  %10071 = vmatpush3.bf16.msra.mxu0 %v11520_v34 }
 0x45d   :  { %4717 = vmatprep.mubr.bf16.mxu1 %v3390_v21 }
 0x45e   :  { %v3173_v7 = vpop.f32.mrf.mxu0  ;;  %v3343_v2 = vpop.f32.mrf.mxu1  ;;  %4653 = vmatmul.mubr.bf16.gmra.mxu0 %v2884_v35  ;;  %4718 = vmatmul.mubr.bf16.vlgmr.msra.gmra.mxu1 %v3220_v22 }
 0x45f   :  { %4660 = vmatprep.mubr.bf16.mxu0 %v3055_v4  ;;  %4725 = vmatprep.mubr.bf16.mxu1 %v3391_v8 }
 0x460   :  { %v10686_v56 = vpop.f32.mrf.mxu0  ;;  %v10718_v48 = vpop.f32.mrf.mxu1  ;;  %10824 = vmatpush3.bf16.msra.mxu1 %v13667_v39  ;;  %v11524_v39 = vld [vmem:[%s14782_s4 + $0x220] sm:$0xff]  }
 0x461   :  { %10825 = vmatprep.subr.bf16.mxu1 %v11522_v26  ;;  %v3393_v3 = vpack.c.bf16 %v10718_v48, %v10717_v10  ;;  %v3223_v55 = vpack.c.bf16 %v10686_v56, %v13757_v41 }
 0x462   :  { %v3176_v47 = vpop.f32.mrf.mxu0  ;;  %v3346_v14 = vpop.f32.mrf.mxu1 }
 0x463   :  { %v3392_v17 = vpack.c.bf16 %v3346_v14, %v3343_v2  ;;  %v3222_v52 = vpack.c.bf16 %v3176_v47, %v3173_v7 }
 0x464   :  { %v13770_v6 = vpop.f32.mrf.mxu0  ;;  %v13772_v0 = vpop.f32.mrf.mxu1  ;;  %10826 = vmatpush3.bf16.msra.mxu1 %v11522_v26 }
 0x465   :  { %10827 = vmatprep.subr.bf16.mxu1 %v11523_v46 }
 0x466   :  { %v13778_v19 = vpop.f32.mrf.mxu0  ;;  %v3359_v24 = vpop.f32.mrf.mxu1  ;;  %4661 = vmatmul.mubr.bf16.gmra.mxu0 %v2885_v45  ;;  %4726 = vmatmul.mubr.bf16.gmra.mxu1 %v3221_v27 }
 0x467   :  { %4668 = vmatprep.mubr.bf16.mxu0 %v3056_v51  ;;  %4733 = vmatprep.mubr.bf16.mxu1 %v3392_v17 }
 0x468   :  { %v13780_v23 = vpop.f32.mrf.mxu0  ;;  %v10722_v37 = vpop.f32.mrf.mxu1  ;;  %10828 = vmatpush3.bf16.msra.mxu1 %v11523_v46 }
 0x469   :  { %10829 = vmatprep.subr.bf16.mxu1 %v11524_v39  ;;  %v3395_v13 = vpack.c.bf16 %v10722_v37, %v13772_v0  ;;  %v3225_v4 = vpack.c.bf16 %v13780_v23, %v13770_v6 }
 0x46a   :  { %v3192_v25 = vpop.f32.mrf.mxu0  ;;  %v3362_v30 = vpop.f32.mrf.mxu1 }
 0x46b   :  { %v3394_v50 = vpack.c.bf16 %v3362_v30, %v3359_v24  ;;  %v3224_v32 = vpack.c.bf16 %v3192_v25, %v13778_v19 }
 0x46c   :  { %v13787_v44 = vpop.f32.mrf.mxu0  ;;  %v13789_v31 = vpop.f32.mrf.mxu1  ;;  %10830 = vmatpush3.bf16.msra.mxu1 %v11524_v39 }
 0x46d   :  { %10831 = vmatprep.subr.bf16.mxu1 %v11525_v1 }
 0x46e   :  { %v13796_v15 = vpop.f32.mrf.mxu0  ;;  %v3375_v49 = vpop.f32.mrf.mxu1  ;;  %4669 = vmatmul.mubr.bf16.gmra.mxu0 %v2886_v59  ;;  %4734 = vmatmul.mubr.bf16.gmra.mxu1 %v3222_v52 }
 0x46f   :  { %4676 = vmatprep.mubr.bf16.mxu0 %v3057_v33  ;;  %4741 = vmatprep.mubr.bf16.mxu1 %v3393_v3 }
 0x470   :  { %v13798_v9 = vpop.f32.mrf.mxu0  ;;  %v13800_v60 = vpop.f32.mrf.mxu1  ;;  %10832 = vmatpush3.bf16.msra.mxu1 %v11525_v1 }
 0x471   :  { %10833 = vmatprep.subr.bf16.mxu1 %v11526_v29  ;;  %v3397_v6 = vpack.c.bf16 %v13800_v60, %v13789_v31  ;;  %v3227_v37 = vpack.c.bf16 %v13798_v9, %v13787_v44 }
 0x472   :  { %v3208_v61 = vpop.f32.mrf.mxu0  ;;  %v3378_v16 = vpop.f32.mrf.mxu1 }
 0x473   :  { %v3396_v2 = vpack.c.bf16 %v3378_v16, %v3375_v49  ;;  %v3226_v14 = vpack.c.bf16 %v3208_v61, %v13796_v15 }
 0x474   :  { %v10745_v58 = vpop.f32.mrf.mxu0  ;;  %v10777_v43 = vpop.f32.mrf.mxu1  ;;  %10834 = vmatpush3.bf16.msra.mxu1 %v11526_v29 }
 0x475   :  { %10835 = vmatprep.subr.bf16.mxu1 %v11527_v11 }
 0x476   :  { %v3497_v42 = vpop.f32.mrf.mxu0  ;;  %v3667_v57 = vpop.f32.mrf.mxu1  ;;  %4677 = vmatmul.mubr.bf16.gmra.mxu0 %v2887_v18  ;;  %4742 = vmatmul.mubr.bf16.gmra.mxu1 %v3223_v55 }
 0x477   :  { %4749 = vmatprep.mubr.bf16.mxu1 %v3394_v50 }
 0x478   :  { %v10746_v36 = vpop.f32.mrf.mxu0  ;;  %v10778_v5 = vpop.f32.mrf.mxu1  ;;  %10836 = vmatpush3.bf16.msra.mxu1 %v11527_v11 }
 0x479   :  { %10837 = vmatprep.subr.bf16.mxu1 %v11528_v28  ;;  %v3731_v34 = vpack.c.bf16 %v10778_v5, %v10777_v43  ;;  %v3561_v8 = vpack.c.bf16 %v10746_v36, %v10745_v58 }
 0x47a   :  { %v3500_v54 = vpop.f32.mrf.mxu0  ;;  %v3670_v63 = vpop.f32.mrf.mxu1 }
 0x47b   :  { %v3560_v12 = vpack.c.bf16 %v3500_v54, %v3497_v42  ;;  %v3730_v38 = vpack.c.bf16 %v3670_v63, %v3667_v57 }
 0x47c   :  { %v10749_v20 = vpop.f32.mrf.mxu0  ;;  %v10781_v53 = vpop.f32.mrf.mxu1  ;;  %10838 = vmatpush3.bf16.msra.mxu1 %v11528_v28 }
 0x47d   :  { %4814 = vmatprep.mubr.bf16.mxu0 %v3730_v38 }
 0x47e   :  { %v3513_v62 = vpop.f32.mrf.mxu0  ;;  %4750 = vmatmul.mubr.bf16.gmra.mxu1 %v3224_v32  ;;  %4815 = vmatmul.mubr.bf16.vlgmr.msra.gmra.mxu0 %v3560_v12  ;;  %v3683_v40 = vpop.f32.mrf.mxu1 }
 0x47f   :  { %4757 = vmatprep.mubr.bf16.mxu1 %v3395_v13  ;;  %4822 = vmatprep.mubr.bf16.mxu0 %v3731_v34 }
 0x480   :  { %v10750_v22 = vpop.f32.mrf.mxu0  ;;  %v10782_v21 = vpop.f32.mrf.mxu1 }
 0x481   :  { %v3733_v51 = vpack.c.bf16 %v10782_v21, %v10781_v53  ;;  %v3563_v1 = vpack.c.bf16 %v10750_v22, %v10749_v20 }
 0x482   :  { %v3516_v35 = vpop.f32.mrf.mxu0  ;;  %v3686_v41 = vpop.f32.mrf.mxu1 }
 0x483   :  { %v3732_v10 = vpack.c.bf16 %v3686_v41, %v3683_v40  ;;  %v3562_v45 = vpack.c.bf16 %v3516_v35, %v3513_v62 }
 0x484   :  { %v10753_v26 = vpop.f32.mrf.mxu0  ;;  %v10785_v7 = vpop.f32.mrf.mxu1 }
 0x486   :  { %v3529_v56 = vpop.f32.mrf.mxu0  ;;  %4758 = vmatmul.mubr.bf16.gmra.mxu1 %v3225_v4  ;;  %4823 = vmatmul.mubr.bf16.gmra.mxu0 %v3561_v8  ;;  %v3699_v46 = vpop.f32.mrf.mxu1 }
 0x487   :  { %4765 = vmatprep.mubr.bf16.mxu1 %v3396_v2  ;;  %4830 = vmatprep.mubr.bf16.mxu0 %v3732_v10 }
 0x488   :  { %v10754_v48 = vpop.f32.mrf.mxu0  ;;  %v10786_v0 = vpop.f32.mrf.mxu1 }
 0x489   :  { %v3735_v11 = vpack.c.bf16 %v10786_v0, %v10785_v7  ;;  %v3565_v43 = vpack.c.bf16 %v10754_v48, %v10753_v26 }
 0x48a   :  { %v3532_v47 = vpop.f32.mrf.mxu0  ;;  %v3702_v19 = vpop.f32.mrf.mxu1 }
 0x48b   :  { %v3734_v23 = vpack.c.bf16 %v3702_v19, %v3699_v46  ;;  %v3564_v15 = vpack.c.bf16 %v3532_v47, %v3529_v56 }
 0x48c   :  { %v13816_v27 = vpop.f32.mrf.mxu0  ;;  %v10789_v30 = vpop.f32.mrf.mxu1 }
 0x48e   :  { %v3545_v17 = vpop.f32.mrf.mxu0  ;;  %4766 = vmatmul.mubr.bf16.gmra.mxu1 %v3226_v14  ;;  %4831 = vmatmul.mubr.bf16.gmra.mxu0 %v3562_v45  ;;  %v3715_v31 = vpop.f32.mrf.mxu1 }
 0x48f   :  { %4773 = vmatprep.mubr.bf16.mxu1 %v3397_v6  ;;  %4838 = vmatprep.mubr.bf16.mxu0 %v3733_v51  ;;  %v13826_v6 = vld [vmem:[%s14783_s5] ss:$0 sm:$0xff] }
 0x490   :  { %v10758_v39 = vpop.f32.mrf.mxu0  ;;  %v10790_v60 = vpop.f32.mrf.mxu1 }
 0x491   :  { %v3737_v12 = vpack.c.bf16 %v10790_v60, %v10789_v30  ;;  %v3567_v34 = vpack.c.bf16 %v10758_v39, %v13816_v27 }
 0x492   :  { %v3548_v24 = vpop.f32.mrf.mxu0  ;;  %v3718_v9 = vpop.f32.mrf.mxu1 }
 0x493   :  { %v3736_v58 = vpack.c.bf16 %v3718_v9, %v3715_v31  ;;  %v3566_v54 = vpack.c.bf16 %v3548_v24, %v3545_v17 }
 0x494   :  { %v10809_v25 = vpop.f32.mrf.mxu0 }
 0x496   :  { %v3837_v59 = vpop.f32.mrf.mxu0  ;;  %4774 = vmatmul.mubr.bf16.gmra.mxu1 %v3227_v37  ;;  %4839 = vmatmul.mubr.bf16.gmra.mxu0 %v3563_v1 }
 0x497   :  { %4846 = vmatprep.mubr.bf16.mxu0 %v3734_v23 }
 0x498   :  { %v10810_v52 = vpop.f32.mrf.mxu0 }
 0x499   :  { %v3901_v33 = vpack.c.bf16 %v10810_v52, %v10809_v25 }
 0x49a   :  { %v3840_v3 = vpop.f32.mrf.mxu0 }
 0x49b   :  { %v3900_v29 = vpack.c.bf16 %v3840_v3, %v3837_v59 }
 0x49c   :  { %v10813_v49 = vpop.f32.mrf.mxu0 }
 0x49d   :  { %10839 = vmatprep.mubr.bf16.mxu1 %v3900_v29 }
 0x49e   :  { %v3853_v61 = vpop.f32.mrf.mxu0  ;;  %4847 = vmatmul.mubr.bf16.gmra.mxu0 %v3564_v15  ;;  %10840 = vmatmul.mubr.bf16.vlgmr.msra.gmra.mxu1 %v3901_v33 }
 0x49f   :  { %4854 = vmatprep.mubr.bf16.mxu0 %v3735_v11 }
 0x4a0   :  { %v10814_v44 = vpop.f32.mrf.mxu0 }
 0x4a1   :  { %v3903_v16 = vpack.c.bf16 %v10814_v44, %v10813_v49 }
 0x4a2   :  { %v3856_v18 = vpop.f32.mrf.mxu0 }
 0x4a3   :  { %v3902_v55 = vpack.c.bf16 %v3856_v18, %v3853_v61 }
 0x4a4   :  { %v10817_v50 = vpop.f32.mrf.mxu0 }
 0x4a5   :  { %10843 = vmatprep.mubr.bf16.mxu1 %v3902_v55 }
 0x4a6   :  { %v3869_v28 = vpop.f32.mrf.mxu0  ;;  %4855 = vmatmul.mubr.bf16.gmra.mxu0 %v3565_v43  ;;  %10844 = vmatmul.mubr.bf16.gmra.mxu1 %v3903_v16 }
 0x4a7   :  { %4862 = vmatprep.mubr.bf16.mxu0 %v3736_v58 }
 0x4a8   :  { %v10818_v42 = vpop.f32.mrf.mxu0 }
 0x4a9   :  { %v3905_v57 = vpack.c.bf16 %v10818_v42, %v10817_v50 }
 0x4aa   :  { %v3872_v36 = vpop.f32.mrf.mxu0 }
 0x4ab   :  { %v3904_v5 = vpack.c.bf16 %v3872_v36, %v3869_v28 }
 0x4ac   :  { %v10821_v63 = vpop.f32.mrf.mxu0 }
 0x4ad   :  { %10847 = vmatprep.mubr.bf16.mxu1 %v3904_v5 }
 0x4ae   :  { %v3885_v38 = vpop.f32.mrf.mxu0  ;;  %4863 = vmatmul.mubr.bf16.gmra.mxu0 %v3566_v54  ;;  %10848 = vmatmul.mubr.bf16.gmra.mxu1 %v3905_v57 }
 0x4af   :  { %4870 = vmatprep.mubr.bf16.mxu0 %v3737_v12 }
 0x4b0   :  { %v10822_v32 = vpop.f32.mrf.mxu0 }
 0x4b1   :  { %v3907_v20 = vpack.c.bf16 %v10822_v32, %v10821_v63 }
 0x4b2   :  { %v3888_v53 = vpop.f32.mrf.mxu0 }
 0x4b3   :  { %v3906_v13 = vpack.c.bf16 %v3888_v53, %v3885_v38 }
 0x4b5   :  { %10851 = vmatprep.mubr.bf16.mxu1 %v3906_v13 }
 0x4b6   :  { %4871 = vmatmul.mubr.bf16.gmra.mxu0 %v3567_v34  ;;  %10852 = vmatmul.mubr.bf16.gmra.mxu1 %v3907_v20 }
 0x4de   :  { %v9880_v62 = vpop.f32.mrf.mxu1 }
 0x4e0   :  { %v9881_v40 = vpop.f32.mrf.mxu1 }
 0x4e1   :  { %v9882_v22 = vadd.f32 %v9881_v40, %v9880_v62 }
 0x4e2   :  { %v9883_v21 = vpop.f32.mrf.mxu1 }
 0x4e3   :  { %v4526_v24 = vadd.f32 %v9882_v22, %v13826_v6 }
 0x4e4   :  { %v9884_v35 = vpop.f32.mrf.mxu1 }
 0x4e5   :  { %v9885_v23 = vadd.f32 %v9884_v35, %v9883_v21 }
 0x4e6   :  { %v9886_v41 = vpop.f32.mrf.mxu1 }
 0x4e7   :  { %v4529_v33 = vadd.f32 %v9885_v23, %v13826_v6 }
 0x4e8   :  { %v9887_v10 = vpop.f32.mrf.mxu1 }
 0x4e9   :  { %v9888_v4 = vadd.f32 %v9887_v10, %v9886_v41 }
 0x4ea   :  { %v9889_v8 = vpop.f32.mrf.mxu1 }
 0x4eb   :  { %v4534_v61 = vadd.f32 %v9888_v4, %v13826_v6 }
 0x4ec   :  { %v9890_v26 = vpop.f32.mrf.mxu1 }
 0x4ed   :  { %v9891_v44 = vadd.f32 %v9890_v26, %v9889_v8 }
 0x4ee   :  { %v9892_v7 = vpop.f32.mrf.mxu1 }
 0x4ef   :  { %v4537_v28 = vadd.f32 %v9891_v44, %v13826_v6 }
 0x4f0   :  { %v9893_v2 = vpop.f32.mrf.mxu1 }
 0x4f1   :  { %v9894_v56 = vadd.f32 %v9893_v2, %v9892_v7 }
 0x4f2   :  { %v9895_v48 = vpop.f32.mrf.mxu1 }
 0x4f3   :  { %v4542_v12 = vadd.f32 %v9894_v56, %v13826_v6 }
 0x4f4   :  { %v9896_v46 = vpop.f32.mrf.mxu1 }
 0x4f5   :  { %v9897_v38 = vadd.f32 %v9896_v46, %v9895_v48 }
 0x4f6   :  { %v9898_v47 = vpop.f32.mrf.mxu1 }
 0x4f7   :  { %v4545_v22 = vadd.f32 %v9897_v38, %v13826_v6 }
 0x4f8   :  { %v9899_v14 = vpop.f32.mrf.mxu1 }
 0x4f9   :  { %v9900_v45 = vadd.f32 %v9899_v14, %v9898_v47 }
 0x4fa   :  { %v9901_v27 = vpop.f32.mrf.mxu1 }
 0x4fb   :  { %v4550_v26 = vadd.f32 %v9900_v45, %v13826_v6 }
 0x4fc   :  { %v9902_v0 = vpop.f32.mrf.mxu1 }
 0x4fd   :  { %v9903_v7 = vadd.f32 %v9902_v0, %v9901_v27 }
 0x4fe   :  { %v9904_v51 = vpop.f32.mrf.mxu1  ;;  %v9944_v17 = vpop.f32.mrf.mxu0 }
 0x500   :  { %v9905_v39 = vpop.f32.mrf.mxu1  ;;  %v9945_v19 = vpop.f32.mrf.mxu0 }
 0x501   :  { %v9906_v37 = vadd.f32 %v9905_v39, %v9904_v51  ;;  %v9946_v1 = vadd.f32 %v9945_v19, %v9944_v17  ;;  %v4553_v17 = vadd.f32 %v9903_v7, %v13826_v6 }
 0x502   :  { %v9907_v25 = vpop.f32.mrf.mxu1  ;;  %v9947_v30 = vpop.f32.mrf.mxu0 }
 0x503   :  { %v13829_v59 = vadd.f32 %v9946_v1, %v4526_v24  ;;  %v4558_v0 = vadd.f32 %v9906_v37, %v13826_v6  ;;  %v11529_v37 = vld [vmem:[%s14785_s7] sm:$0xff]  }
 0x504   :  { %v9908_v52 = vpop.f32.mrf.mxu1  ;;  %v9948_v31 = vpop.f32.mrf.mxu0  ;;  %10871 = vmatprep.mubr.bf16.mxu0 %v11529_v37 }
 0x505   :  { %v9949_v3 = vadd.f32 %v9948_v31, %v9947_v30  ;;  %v9909_v1 = vadd.f32 %v9908_v52, %v9907_v25  ;;  %v11530_v25 = vld [vmem:[%s14785_s7 + $0x10] sm:$0xff]  }
 0x506   :  { %v9910_v29 = vpop.f32.mrf.mxu1  ;;  %v9950_v15 = vpop.f32.mrf.mxu0  ;;  %10891 = vmatprep.mubr.bf16.mxu1 %v11530_v25 }
 0x507   :  { %v13832_v49 = vadd.f32 %v9949_v3, %v4529_v33 }
 0x508   :  { %v9911_v60 = vpop.f32.mrf.mxu1  ;;  %v9951_v11 = vpop.f32.mrf.mxu0 }
 0x509   :  { %v13835_v9 = vadd.f32 %v9911_v60, %v9910_v29  ;;  %v9952_v16 = vadd.f32 %v9951_v11, %v9950_v15 }
 0x50a   :  { %v13837_v18 = vpop.f32.mrf.mxu1  ;;  %v9953_v55 = vpop.f32.mrf.mxu0 }
 0x50b   :  { %v13839_v58 = vadd.f32 %v9952_v16, %v4534_v61  ;;  %v4561_v61 = vadd.f32 %v9909_v1, %v13826_v6 }
 0x50c   :  { %v13841_v43 = vpop.f32.mrf.mxu1  ;;  %v9954_v50 = vpop.f32.mrf.mxu0 }
 0x50d   :  { %v9955_v42 = vadd.f32 %v9954_v50, %v9953_v55 }
 0x50e   :  { %v9916_v57 = vpop.f32.mrf.mxu1  ;;  %v9956_v36 = vpop.f32.mrf.mxu0 }
 0x50f   :  { %v13844_v5 = vadd.f32 %v9955_v42, %v4537_v28 }
 0x510   :  { %v9917_v54 = vpop.f32.mrf.mxu1  ;;  %v9957_v63 = vpop.f32.mrf.mxu0 }
 0x511   :  { %v13847_v32 = vadd.f32 %v9917_v54, %v9916_v57  ;;  %v9958_v20 = vadd.f32 %v9957_v63, %v9956_v36  ;;  %v4566_v57 = vadd.f32 %v13835_v9, %v13826_v6  ;;  %v9915_v36 = vadd.f32 %v13841_v43, %v13837_v18 }
 0x512   :  { %v13849_v53 = vpop.f32.mrf.mxu1  ;;  %v9959_v13 = vpop.f32.mrf.mxu0 }
 0x513   :  { %v13851_v34 = vadd.f32 %v9958_v20, %v4542_v12 }
 0x514   :  { %v13853_v62 = vpop.f32.mrf.mxu1  ;;  %v9960_v40 = vpop.f32.mrf.mxu0 }
 0x515   :  { %v9961_v21 = vadd.f32 %v9960_v40, %v9959_v13 }
 0x516   :  { %v9922_v35 = vpop.f32.mrf.mxu1  ;;  %v9962_v41 = vpop.f32.mrf.mxu0 }
 0x517   :  { %v13856_v10 = vadd.f32 %v9961_v21, %v4545_v22  ;;  %v4569_v22 = vadd.f32 %v9915_v36, %v13826_v6 }
 0x518   :  { %v9923_v4 = vpop.f32.mrf.mxu1  ;;  %v9963_v8 = vpop.f32.mrf.mxu0 }
 0x519   :  { %v13859_v2 = vadd.f32 %v9923_v4, %v9922_v35  ;;  %v9964_v56 = vadd.f32 %v9963_v8, %v9962_v41 }
 0x51a   :  { %v13861_v48 = vpop.f32.mrf.mxu1  ;;  %v9965_v46 = vpop.f32.mrf.mxu0 }
 0x51b   :  { %v13863_v47 = vadd.f32 %v9964_v56, %v4550_v26  ;;  %v4574_v26 = vadd.f32 %v13847_v32, %v13826_v6 }
 0x51c   :  { %v13865_v14 = vpop.f32.mrf.mxu1  ;;  %v9966_v51 = vpop.f32.mrf.mxu0 }
 0x51d   :  { %v9967_v39 = vadd.f32 %v9966_v51, %v9965_v46 }
 0x51e   :  { %v9968_v19 = vpop.f32.mrf.mxu0  ;;  %v10008_v24 = vpop.f32.mrf.mxu1 }
 0x51f   :  { %v13868_v23 = vadd.f32 %v9967_v39, %v4553_v17 }
 0x520   :  { %v9969_v45 = vpop.f32.mrf.mxu0  ;;  %v10009_v27 = vpop.f32.mrf.mxu1 }
 0x521   :  { %v9970_v30 = vadd.f32 %v9969_v45, %v9968_v19  ;;  %v10010_v31 = vadd.f32 %v10009_v27, %v10008_v24 }
 0x522   :  { %v9971_v33 = vpop.f32.mrf.mxu0  ;;  %v10011_v3 = vpop.f32.mrf.mxu1 }
 0x523   :  { %v13871_v29 = vadd.f32 %v9970_v30, %v4558_v0  ;;  %v13874_v15 = vadd.f32 %v10010_v31, %v13829_v59  ;;  %v4582_v31 = vadd.f32 %v13859_v2, %v13826_v6 }
 0x524   :  { %v9972_v60 = vpop.f32.mrf.mxu0  ;;  %v10012_v11 = vpop.f32.mrf.mxu1 }
 0x525   :  { %v9973_v44 = vadd.f32 %v9972_v60, %v9971_v33  ;;  %v10013_v16 = vadd.f32 %v10012_v11, %v10011_v3 }
 0x526   :  { %v9974_v52 = vpop.f32.mrf.mxu0  ;;  %v10014_v55 = vpop.f32.mrf.mxu1 }
 0x527   :  { %v13883_v50 = vadd.f32 %v9973_v44, %v4561_v61  ;;  %v13886_v59 = vadd.f32 %v10013_v16, %v13832_v49 }
 0x528   :  { %v9975_v28 = vpop.f32.mrf.mxu0  ;;  %v10015_v42 = vpop.f32.mrf.mxu1 }
 0x529   :  { %v9976_v54 = vadd.f32 %v9975_v28, %v9974_v52  ;;  %v10016_v63 = vadd.f32 %v10015_v42, %v10014_v55 }
 0x52a   :  { %v9977_v12 = vpop.f32.mrf.mxu0  ;;  %v10017_v38 = vpop.f32.mrf.mxu1 }
 0x52b   :  { %v13892_v20 = vadd.f32 %v9976_v54, %v4566_v57  ;;  %v13895_v13 = vadd.f32 %v10016_v63, %v13839_v58  ;;  %v9921_v58 = vadd.f32 %v13853_v62, %v13849_v53 }
 0x52c   :  { %v9978_v49 = vpop.f32.mrf.mxu0  ;;  %v10018_v40 = vpop.f32.mrf.mxu1 }
 0x52d   :  { %v9979_v21 = vadd.f32 %v9978_v49, %v9977_v12  ;;  %v10019_v35 = vadd.f32 %v10018_v40, %v10017_v38 }
 0x52e   :  { %v9980_v41 = vpop.f32.mrf.mxu0  ;;  %v10020_v9 = vpop.f32.mrf.mxu1 }
 0x52f   :  { %v13898_v4 = vadd.f32 %v9979_v21, %v4569_v22  ;;  %v4731_v18 = vadd.f32 %v10019_v35, %v13844_v5  ;;  %v4577_v5 = vadd.f32 %v9921_v58, %v13826_v6 }
 0x530   :  { %v9981_v43 = vpop.f32.mrf.mxu0  ;;  %v10021_v8 = vpop.f32.mrf.mxu1 }
 0x531   :  { %v9982_v7 = vadd.f32 %v9981_v43, %v9980_v41  ;;  %v10022_v56 = vadd.f32 %v10021_v8, %v10020_v9 }
 0x532   :  { %v9983_v46 = vpop.f32.mrf.mxu0  ;;  %v10023_v51 = vpop.f32.mrf.mxu1 }
 0x533   :  { %v13905_v17 = vadd.f32 %v9982_v7, %v4574_v26  ;;  %v4736_v39 = vadd.f32 %v10022_v56, %v13851_v34 }
 0x534   :  { %v9984_v19 = vpop.f32.mrf.mxu0  ;;  %v10024_v24 = vpop.f32.mrf.mxu1 }
 0x535   :  { %v9985_v45 = vadd.f32 %v9984_v19, %v9983_v46  ;;  %v10025_v27 = vadd.f32 %v10024_v24, %v10023_v51 }
 0x536   :  { %v9986_v0 = vpop.f32.mrf.mxu0  ;;  %v10026_v1 = vpop.f32.mrf.mxu1 }
 0x537   :  { %v13909_v32 = vadd.f32 %v9985_v45, %v4577_v5  ;;  %v13912_v53 = vadd.f32 %v10025_v27, %v13856_v10 }
 0x538   :  { %v9987_v62 = vpop.f32.mrf.mxu0  ;;  %v10027_v30 = vpop.f32.mrf.mxu1 }
 0x539   :  { %v9988_v33 = vadd.f32 %v9987_v62, %v9986_v0  ;;  %v10028_v34 = vadd.f32 %v10027_v30, %v10026_v1 }
 0x53a   :  { %v13916_v3 = vpop.f32.mrf.mxu0  ;;  %v10029_v60 = vpop.f32.mrf.mxu1 }
 0x53b   :  { %v13918_v11 = vadd.f32 %v9988_v33, %v4582_v31  ;;  %v13921_v61 = vadd.f32 %v10028_v34, %v13863_v47 }
 0x53c   :  { %v13923_v44 = vpop.f32.mrf.mxu0  ;;  %v10030_v16 = vpop.f32.mrf.mxu1 }
 0x53d   :  { %v10031_v10 = vadd.f32 %v10030_v16, %v10029_v60 }
 0x53e   :  { %v10032_v37 = vpop.f32.mrf.mxu1  ;;  %v10072_v25 = vpop.f32.mrf.mxu0 }
 0x53f   :  { %v13926_v52 = vadd.f32 %v10031_v10, %v13868_v23 }
 0x540   :  { %v10033_v2 = vpop.f32.mrf.mxu1  ;;  %v10073_v55 = vpop.f32.mrf.mxu0 }
 0x541   :  { %v10034_v28 = vadd.f32 %v10033_v2, %v10032_v37  ;;  %v10074_v42 = vadd.f32 %v10073_v55, %v10072_v25 }
 0x542   :  { %v13928_v57 = vpop.f32.mrf.mxu1  ;;  %v10075_v36 = vpop.f32.mrf.mxu0 }
 0x543   :  { %v13931_v54 = vadd.f32 %v10034_v28, %v13871_v29  ;;  %v4817_v47 = vadd.f32 %v10074_v42, %v13874_v15 }
 0x544   :  { %v13934_v63 = vpop.f32.mrf.mxu1  ;;  %v10076_v12 = vpop.f32.mrf.mxu0 }
 0x545   :  { %v10077_v38 = vadd.f32 %v10076_v12, %v10075_v36 }
 0x546   :  { %v10038_v49 = vpop.f32.mrf.mxu1  ;;  %v10078_v40 = vpop.f32.mrf.mxu0 }
 0x547   :  { %v4820_v23 = vadd.f32 %v10077_v38, %v13886_v59 }
 0x548   :  { %v10039_v22 = vpop.f32.mrf.mxu1  ;;  %v10079_v21 = vpop.f32.mrf.mxu0 }
 0x549   :  { %v10080_v35 = vadd.f32 %v10079_v21, %v10078_v40 }
 0x54a   :  { %v10041_v41 = vpop.f32.mrf.mxu1  ;;  %v10081_v9 = vpop.f32.mrf.mxu0 }
 0x54b   :  { %v4825_v43 = vadd.f32 %v10080_v35, %v13895_v13 }
 0x54c   :  { %v10042_v8 = vpop.f32.mrf.mxu1  ;;  %v10082_v29 = vpop.f32.mrf.mxu0 }
 0x54d   :  { %v10083_v26 = vadd.f32 %v10082_v29, %v10081_v9 }
 0x54e   :  { %v13938_v58 = vpop.f32.mrf.mxu1  ;;  %v10084_v15 = vpop.f32.mrf.mxu0 }
 0x54f   :  { %v4828_v7 = vadd.f32 %v10083_v26, %v4731_v18 }
 0x550   :  { %v13940_v56 = vpop.f32.mrf.mxu1  ;;  %v10085_v46 = vpop.f32.mrf.mxu0 }
 0x551   :  { %v10086_v51 = vadd.f32 %v10085_v46, %v10084_v15  ;;  %v10040_v46 = vadd.f32 %v10039_v22, %v10038_v49 }
 0x552   :  { %v13942_v19 = vpop.f32.mrf.mxu1  ;;  %v10087_v59 = vpop.f32.mrf.mxu0 }
 0x553   :  { %v4833_v24 = vadd.f32 %v10086_v51, %v4736_v39 }
 0x554   :  { %v13944_v5 = vpop.f32.mrf.mxu1  ;;  %v10088_v45 = vpop.f32.mrf.mxu0 }
 0x555   :  { %v10089_v21 = vadd.f32 %v10088_v45, %v10087_v59 }
 0x556   :  { %v13946_v27 = vpop.f32.mrf.mxu1  ;;  %v10090_v13 = vpop.f32.mrf.mxu0 }
 0x558   :  { %v13948_v0 = vpop.f32.mrf.mxu1  ;;  %v10091_v1 = vpop.f32.mrf.mxu0 }
 0x559   :  { %v10092_v25 = vadd.f32 %v10091_v1, %v10090_v13 }
 0x55a   :  { %v13950_v62 = vpop.f32.mrf.mxu1  ;;  %v10093_v18 = vpop.f32.mrf.mxu0 }
 0x55c   :  { %v13952_v30 = vpop.f32.mrf.mxu1  ;;  %v10094_v31 = vpop.f32.mrf.mxu0 }
 0x55d   :  { %v10095_v36 = vadd.f32 %v10094_v31, %v10093_v18  ;;  %v10043_v18 = vadd.f32 %v10042_v8, %v10041_v41 }
 0x55e   :  { %v10096_v33 = vpop.f32.mrf.mxu0  ;;  %v10841_v34 = vpop.f32.mrf.mxu1 }
 0x55f   :  { %v4922_v39 = vadd.f32 %v10841_v34, %v4825_v43  ;;  %v4841_v43 = vadd.f32 %v10092_v25, %v13921_v61  ;;  %v4844_v1 = vadd.f32 %v10095_v36, %v13926_v52  ;;  %v4760_v61 = vadd.f32 %v10040_v46, %v13892_v20 }
 0x560   :  { %v10097_v60 = vpop.f32.mrf.mxu0  ;;  %v4913_v16 = vpop.f32.mrf.mxu1  ;;  %v4763_v41 = vadd.f32 %v10043_v18, %v13898_v4  ;;  %v10046_v4 = vadd.f32 %v13940_v56, %v13938_v58  ;;  %v9991_v56 = vadd.f32 %v13923_v44, %v13916_v3  ;;  %v10055_v3 = vadd.f32 %v13952_v30, %v13950_v62 }
 0x561   :  { %v4914_v2 = vadd.f32 %v4913_v16, %v4817_v47  ;;  %v4978_v12 = vmax.f32 %v4922_v39, 0.0  ;;  %v4836_v16 = vadd.f32 %v10089_v21, %v13912_v53  ;;  %v10037_v39 = vadd.f32 %v13934_v63, %v13928_v57 }
 0x562   :  { %v10099_v10 = vpop.f32.mrf.mxu0  ;;  %v10842_v37 = vpop.f32.mrf.mxu1  ;;  %v10098_v49 = vadd.f32 %v10097_v60, %v10096_v33 }
 0x563   :  { %v4925_v55 = vadd.f32 %v10842_v37, %v4828_v7  ;;  %v4976_v29 = vmax.f32 %v4914_v2, 0.0  ;;  %v4755_v57 = vadd.f32 %v10037_v39, %v13883_v50  ;;  %v10049_v50 = vadd.f32 %v13944_v5, %v13942_v19 }
 0x564   :  { %v10100_v28 = vpop.f32.mrf.mxu0  ;;  %v4916_v42 = vpop.f32.mrf.mxu1 }
 0x565   :  { %v4979_v38 = vmax.f32 %v4925_v55, 0.0  ;;  %v4917_v40 = vadd.f32 %v4916_v42, %v4820_v23  ;;  %v10101_v8 = vadd.f32 %v10100_v28, %v10099_v10 }
 0x566   :  { %v10102_v35 = vpop.f32.mrf.mxu0  ;;  %v10845_v9 = vpop.f32.mrf.mxu1 }
 0x567   :  { %v13954_v26 = vpack.c.bf16 %v4979_v38, %v4978_v12  ;;  %v4977_v15 = vmax.f32 %v4917_v40, 0.0  ;;  %v4938_v7 = vadd.f32 %v10845_v9, %v4841_v43  ;;  %v4849_v40 = vadd.f32 %v10098_v49, %v13931_v54 }
 0x568   :  { %v10103_v51 = vpop.f32.mrf.mxu0  ;;  %v4929_v13 = vpop.f32.mrf.mxu1  ;;  %v10052_v43 = vadd.f32 %v13948_v0, %v13946_v27  ;;  %v4771_v0 = vadd.f32 %v10049_v50, %v13909_v32 }
 0x569   :  { %v13957_v47 = vpack.c.bf16 %v4977_v15, %v4976_v29  ;;  %v10104_v59 = vadd.f32 %v10103_v51, %v10102_v35  ;;  %v4930_v45 = vadd.f32 %v4929_v13, %v4833_v24  ;;  %v4982_v25 = vmax.f32 %v4938_v7, 0.0 }
 0x56a   :  { %v10105_v31 = vpop.f32.mrf.mxu0  ;;  %v10846_v23 = vpop.f32.mrf.mxu1  ;;  %v4852_v29 = vadd.f32 %v10101_v8, %v4755_v57  ;;  %v9927_v15 = vadd.f32 %v13865_v14, %v13861_v48  ;;  %v11533_v57 = vld [vmem:[%s14785_s7 + $0x20] sm:$0xff]  }
 0x56b   :  { %v4941_v34 = vadd.f32 %v10846_v23, %v4844_v1  ;;  %v4980_v36 = vmax.f32 %v4930_v45, 0.0  ;;  %v4857_v38 = vadd.f32 %v10104_v59, %v4760_v61  ;;  %v4768_v1 = vadd.f32 %v10046_v4, %v13905_v17 }
 0x56c   :  { %v10106_v22 = vpop.f32.mrf.mxu0  ;;  %v4932_v37 = vpop.f32.mrf.mxu1  ;;  %v4585_v27 = vadd.f32 %v9927_v15, %v13826_v6  ;;  %v4776_v23 = vadd.f32 %v10052_v43, %v13918_v11 }
 0x56d   :  { %v4983_v2 = vmax.f32 %v4941_v34, 0.0  ;;  %v10107_v55 = vadd.f32 %v10106_v22, %v10105_v31  ;;  %v4933_v52 = vadd.f32 %v4932_v37, %v4836_v16 }
 0x56e   :  { %v10108_v42 = vpop.f32.mrf.mxu0  ;;  %v10849_v24 = vpop.f32.mrf.mxu1  ;;  %v4682_v61 = vadd.f32 %v9991_v56, %v4585_v27 }
 0x56f   :  { %v13965_v12 = vpack.c.bf16 %v4983_v2, %v4982_v25  ;;  %v4981_v53 = vmax.f32 %v4933_v52, 0.0  ;;  %v4954_v60 = vadd.f32 %v10849_v24, %v4857_v38  ;;  %v4860_v21 = vadd.f32 %v10107_v55, %v4763_v41  ;;  %v11532_v38 = vld [vmem:[%s14785_s7 + $0x18] sm:$0xff]  }
 0x570   :  { %v10109_v20 = vpop.f32.mrf.mxu0  ;;  %v4945_v63 = vpop.f32.mrf.mxu1  ;;  %v4779_v32 = vadd.f32 %v10055_v3, %v4682_v61  ;;  %v11541_v3 = vld [vmem:[%s14788_s10 + $0x10] sm:$0xff]   ;;  %v11546_v61 = vld [vmem:[%s14788_s10 + $0x28] sm:$0xff]  }
 0x571   :  { %v13968_v33 = vpack.c.bf16 %v4981_v53, %v4980_v36  ;;  %v4946_v35 = vadd.f32 %v4945_v63, %v4849_v40  ;;  %v4986_v51 = vmax.f32 %v4954_v60, 0.0  ;;  %v10110_v13 = vadd.f32 %v10109_v20, %v10108_v42  ;;  %v11531_v53 = vld [vmem:[%s14785_s7 + $0x8] sm:$0xff]   ;;  %v11535_v20 = vld [vmem:[%s14785_s7 + $0x30] sm:$0xff]   ;;  %v11536_v63 = vld [vmem:[%s14785_s7 + $0x38] sm:$0xff]  }
 0x572   :  { %v10111_v10 = vpop.f32.mrf.mxu0  ;;  %v10850_v28 = vpop.f32.mrf.mxu1 }
 0x573   :  { %v4957_v9 = vadd.f32 %v10850_v28, %v4860_v21  ;;  %v4984_v48 = vmax.f32 %v4946_v35, 0.0  ;;  %v4865_v34 = vadd.f32 %v10110_v13, %v4768_v1 }
 0x574   :  { %v10112_v46 = vpop.f32.mrf.mxu0  ;;  %v4948_v54 = vpop.f32.mrf.mxu1 }
 0x575   :  { %v4987_v7 = vmax.f32 %v4957_v9, 0.0  ;;  %v4949_v58 = vadd.f32 %v4948_v54, %v4852_v29  ;;  %v10113_v19 = vadd.f32 %v10112_v46, %v10111_v10 }
 0x576   :  { %v10114_v18 = vpop.f32.mrf.mxu0  ;;  %v10853_v31 = vpop.f32.mrf.mxu1 }
 0x577   :  { %v13982_v14 = vpack.c.bf16 %v4987_v7, %v4986_v51  ;;  %v4985_v5 = vmax.f32 %v4949_v58, 0.0  ;;  %v4868_v37 = vadd.f32 %v10113_v19, %v4771_v0 }
 0x578   :  { %v10115_v59 = vpop.f32.mrf.mxu0  ;;  %v4961_v45 = vpop.f32.mrf.mxu1 }
 0x579   :  { %v13989_v44 = vpack.c.bf16 %v4985_v5, %v4984_v48  ;;  %v10116_v17 = vadd.f32 %v10115_v59, %v10114_v18  ;;  %v4962_v22 = vadd.f32 %v4961_v45, %v4865_v34  ;;  %v11538_v59 = vld [vmem:[%s14788_s10 + $0x8] sm:$0xff]  }
 0x57a   :  { %v10117_v16 = vpop.f32.mrf.mxu0  ;;  %v10854_v39 = vpop.f32.mrf.mxu1  ;;  %v11540_v45 = vld [vmem:[%s14788_s10 + $0x48] sm:$0xff]  }
 0x57b   :  { %v4873_v49 = vadd.f32 %v10116_v17, %v4776_v23  ;;  %v4988_v52 = vmax.f32 %v4962_v22, 0.0  ;;  %v11542_v17 = vld [vmem:[%s14788_s10 + $0x18] sm:$0xff]   ;;  %v11544_v34 = vld [vmem:[%s14788_s10 + $0x68] sm:$0xff]   ;;  %v11547_v22 = vld [vmem:[%s14788_s10 + $0x30] sm:$0xff]  }
 0x57c   :  { %v10118_v6 = vpop.f32.mrf.mxu0  ;;  %v4964_v25 = vpop.f32.mrf.mxu1 }
 0x57d   :  { %v10119_v2 = vadd.f32 %v10118_v6, %v10117_v16  ;;  %v4965_v11 = vadd.f32 %v4964_v25, %v4868_v37  ;;  %v4970_v55 = vadd.f32 %v10853_v31, %v4873_v49  ;;  %v11545_v16 = vld [vmem:[%s14788_s10 + $0x20] sm:$0xff]   ;;  %v11554_v49 = vld [vmem:[%s14788_s10 + $0x88] sm:$0xff]   ;;  %v11548_v37 = vld [vmem:[%s14788_s10 + $0x38] sm:$0xff]  }
 0x57e   :  { %v11549_v6 = vld [vmem:[%s14788_s10 + $0x50] sm:$0xff]   ;;  %v11550_v25 = vld [vmem:[%s14788_s10 + $0x58] sm:$0xff]  }
 0x57f   :  { %v4876_v41 = vadd.f32 %v10119_v2, %v4779_v32  ;;  %v4989_v8 = vmax.f32 %v4965_v11, 0.0  ;;  %v4990_v42 = vmax.f32 %v4970_v55, 0.0  ;;  %v11551_v32 = vld [vmem:[%s14788_s10 + $0x70] sm:$0xff]   ;;  %v11555_v2 = vld [vmem:[%s14786_s8 + $0x78] sm:$0xff]  }
 0x580   :  { %v11552_v11 = vld [vmem:[%s14788_s10 + $0x78] sm:$0xff]  }
 0x581   :  { %v4973_v62 = vadd.f32 %v10854_v39, %v4876_v41  ;;  %v4998_v30 = vpack.c.bf16 %v4989_v8, %v4988_v52  ;;  %v11553_v39 = vld [vmem:[%s14788_s10 + $0x80] sm:$0xff]   ;;  %v11556_v55 = vld [vmem:[%s14786_s8 + $0x38] sm:$0xff]   ;;  %v11557_v52 = vld [vmem:[%s14786_s8 + $0x70] sm:$0xff]  }
 0x582   :  { %v11558_v41 = vld [vmem:[%s14786_s8 + $0x30] sm:$0xff]   ;;  %v11559_v8 = vld [vmem:[%s14786_s8 + $0x68] sm:$0xff]  }
 0x583   :  { %v4991_v24 = vmax.f32 %v4973_v62, 0.0  ;;  %v11560_v62 = vld [vmem:[%s14786_s8 + $0x28] sm:$0xff]  }
 0x585   :  { %v4999_v36 = vpack.c.bf16 %v4991_v24, %v4990_v42  ;;  %v11562_v42 = vld [vmem:[%s14786_s8 + $0x20] sm:$0xff]   ;;  %v11563_v24 = vld [vmem:[%s14786_s8 + $0x58] sm:$0xff]  }
 0x587   :  { %10855 = vmatprep.subr.bf16.mxu0 %v4999_v36  ;;  %10875 = vmatprep.subr.bf16.mxu1 %v4999_v36 }
 0x588   :  { %10856 = vmatpush3.bf16.msra.mxu0 %v4999_v36  ;;  %10876 = vmatpush3.bf16.msra.mxu1 %v4999_v36 }
 0x589   :  { %10857 = vmatprep.subr.bf16.mxu0 %v4998_v30  ;;  %10877 = vmatprep.subr.bf16.mxu1 %v4998_v30 }
 0x58c   :  { %10858 = vmatpush3.bf16.msra.mxu0 %v4998_v30  ;;  %10878 = vmatpush3.bf16.msra.mxu1 %v4998_v30 }
 0x58d   :  { %10859 = vmatprep.subr.bf16.mxu0 %v13982_v14  ;;  %10879 = vmatprep.subr.bf16.mxu1 %v13982_v14 }
 0x590   :  { %10860 = vmatpush3.bf16.msra.mxu0 %v13982_v14  ;;  %10880 = vmatpush3.bf16.msra.mxu1 %v13982_v14 }
 0x591   :  { %10861 = vmatprep.subr.bf16.mxu0 %v13989_v44  ;;  %10881 = vmatprep.subr.bf16.mxu1 %v13989_v44 }
 0x594   :  { %10862 = vmatpush3.bf16.msra.mxu0 %v13989_v44  ;;  %10882 = vmatpush3.bf16.msra.mxu1 %v13989_v44 }
 0x595   :  { %10863 = vmatprep.subr.bf16.mxu0 %v13965_v12  ;;  %10883 = vmatprep.subr.bf16.mxu1 %v13965_v12 }
 0x598   :  { %10864 = vmatpush3.bf16.msra.mxu0 %v13965_v12  ;;  %10884 = vmatpush3.bf16.msra.mxu1 %v13965_v12 }
 0x599   :  { %10865 = vmatprep.subr.bf16.mxu0 %v13968_v33  ;;  %10885 = vmatprep.subr.bf16.mxu1 %v13968_v33 }
 0x59c   :  { %10866 = vmatpush3.bf16.msra.mxu0 %v13968_v33  ;;  %10886 = vmatpush3.bf16.msra.mxu1 %v13968_v33 }
 0x59d   :  { %10867 = vmatprep.subr.bf16.mxu0 %v13954_v26  ;;  %10887 = vmatprep.subr.bf16.mxu1 %v13954_v26 }
 0x5a0   :  { %10868 = vmatpush3.bf16.msra.mxu0 %v13954_v26  ;;  %10888 = vmatpush3.bf16.msra.mxu1 %v13954_v26 }
 0x5a1   :  { %10869 = vmatprep.subr.bf16.mxu0 %v13957_v47  ;;  %10889 = vmatprep.subr.bf16.mxu1 %v13957_v47 }
 0x5a4   :  { %10870 = vmatpush3.bf16.msra.mxu0 %v13957_v47  ;;  %10890 = vmatpush3.bf16.msra.mxu1 %v13957_v47 }
 0x5a5   :  { %10895 = vmatprep.subr.bf16.mxu0 %v4999_v36  ;;  %10915 = vmatprep.subr.bf16.mxu1 %v4999_v36 }
 0x5a7   :  { %10872 = vmatmul.mubr.bf16.vlgmr.msra.gmra.mxu0 %v11531_v53  ;;  %10892 = vmatmul.mubr.bf16.vlgmr.msra.gmra.mxu1 %v11532_v38  ;;  %v11565_v53 = vld [vmem:[%s14786_s8 + $0x18] sm:$0xff]  }
 0x5a8   :  { %10896 = vmatpush3.bf16.msra.mxu0 %v4999_v36  ;;  %10916 = vmatpush3.bf16.msra.mxu1 %v4999_v36  ;;  %v11564_v36 = vld [vmem:[%s14786_s8 + $0xf8] sm:$0xff]  }
 0x5a9   :  { %10897 = vmatprep.subr.bf16.mxu0 %v4998_v30  ;;  %10917 = vmatprep.subr.bf16.mxu1 %v4998_v30  ;;  %v11566_v38 = vld [vmem:[%s14786_s8 + $0xb8] sm:$0xff]  }
 0x5aa   :  { %10911 = vmatprep.mubr.bf16.mxu0 %v11533_v57  ;;  %10931 = vmatprep.mubr.bf16.mxu1 %v11535_v20  ;;  %v11567_v57 = vld [vmem:[%s14786_s8 + $0x50] sm:$0xff]  }
 0x5ab   :  { %v11568_v20 = vld [vmem:[%s14786_s8 + $0xf0] sm:$0xff]  }
 0x5ac   :  { %10898 = vmatpush3.bf16.msra.mxu0 %v4998_v30  ;;  %10918 = vmatpush3.bf16.msra.mxu1 %v4998_v30  ;;  %v11561_v30 = vld [vmem:[%s14786_s8 + $0x60] sm:$0xff]  }
 0x5ad   :  { %10899 = vmatprep.subr.bf16.mxu0 %v13982_v14  ;;  %10919 = vmatprep.subr.bf16.mxu1 %v13982_v14 }
 0x5b0   :  { %10900 = vmatpush3.bf16.msra.mxu0 %v13982_v14  ;;  %10920 = vmatpush3.bf16.msra.mxu1 %v13982_v14 }
 0x5b1   :  { %10901 = vmatprep.subr.bf16.mxu0 %v13989_v44  ;;  %10921 = vmatprep.subr.bf16.mxu1 %v13989_v44 }
 0x5b4   :  { %10902 = vmatpush3.bf16.msra.mxu0 %v13989_v44  ;;  %10922 = vmatpush3.bf16.msra.mxu1 %v13989_v44  ;;  %v11543_v44 = vld [vmem:[%s14788_s10 + $0x60] sm:$0xff]  }
 0x5b5   :  { %10903 = vmatprep.subr.bf16.mxu0 %v13965_v12  ;;  %10923 = vmatprep.subr.bf16.mxu1 %v13965_v12 }
 0x5b8   :  { %10904 = vmatpush3.bf16.msra.mxu0 %v13965_v12  ;;  %10924 = vmatpush3.bf16.msra.mxu1 %v13965_v12  ;;  %v11534_v12 = vld [vmem:[%s14785_s7 + $0x28] sm:$0xff]  }
 0x5b9   :  { %10905 = vmatprep.subr.bf16.mxu0 %v13968_v33  ;;  %10925 = vmatprep.subr.bf16.mxu1 %v13968_v33 }
 0x5bc   :  { %10906 = vmatpush3.bf16.msra.mxu0 %v13968_v33  ;;  %10926 = vmatpush3.bf16.msra.mxu1 %v13968_v33  ;;  %v11539_v33 = vld [vmem:[%s14788_s10 + $0x40] sm:$0xff]  }
 0x5bd   :  { %10907 = vmatprep.subr.bf16.mxu0 %v13954_v26  ;;  %10927 = vmatprep.subr.bf16.mxu1 %v13954_v26 }
 0x5c0   :  { %10908 = vmatpush3.bf16.msra.mxu0 %v13954_v26  ;;  %10928 = vmatpush3.bf16.msra.mxu1 %v13954_v26  ;;  %v11537_v26 = vld [vmem:[%s14788_s10] sm:$0xff]  }
 0x5c1   :  { %10909 = vmatprep.subr.bf16.mxu0 %v13957_v47  ;;  %10929 = vmatprep.subr.bf16.mxu1 %v13957_v47 }
 0x5c4   :  { %10910 = vmatpush3.bf16.msra.mxu0 %v13957_v47  ;;  %10930 = vmatpush3.bf16.msra.mxu1 %v13957_v47 }
 0x5c7   :  { %10912 = vmatmul.mubr.bf16.vlgmr.msra.gmra.mxu0 %v11534_v12  ;;  %10932 = vmatmul.mubr.bf16.vlgmr.msra.gmra.mxu1 %v11536_v63  ;;  %v11569_v12 = vld [vmem:[%s14786_s8 + $0x10] sm:$0xff]  }
 0x5c8   :  { %10939 = vmatprep.mubr.msk.bf16.mxu0 %vm5291_vm1, %v11537_v26  ;;  %10971 = vmatprep.mubr.msk.bf16.mxu1 %vm5291_vm1, %v11539_v33  ;;  %v11570_v63 = vld [vmem:[%s14786_s8 + $0xb0] sm:$0xff]   ;;  %v11571_v26 = vld [vmem:[%s14786_s8 + $0x48] sm:$0xff]  }
 0x5c9   :  { %v11572_v33 = vld [vmem:[%s14786_s8 + $0xe8] sm:$0xff]  }
 0x667   :  { %v10873_v60 = vpop.f32.mrf.mxu0  ;;  %v10893_v40 = vpop.f32.mrf.mxu1 }
 0x668   :  { %v5133_v15 = vmax.f32 %v10873_v60, %v10893_v40  ;;  %v11573_v60 = vld [vmem:[%s14786_s8 + $0x8] sm:$0xff]  }
 0x669   :  { %v5050_v21 = vpop.f32.mrf.mxu0  ;;  %v5116_v4 = vpop.f32.mrf.mxu1  ;;  %v11574_v40 = vld [vmem:[%s14786_s8 + $0xa8] sm:$0xff]  }
 0x66a   :  { %v5131_v46 = vmax.f32 %v5050_v21, %v5116_v4  ;;  %v11575_v21 = vld [vmem:[%s14786_s8 + $0x40] sm:$0xff]  }
 0x66b   :  { %v10874_v47 = vpop.f32.mrf.mxu0  ;;  %v10894_v10 = vpop.f32.mrf.mxu1  ;;  %v11576_v4 = vld [vmem:[%s14786_s8 + $0xe0] sm:$0xff]  }
 0x66c   :  { %v5134_v54 = vmax.f32 %v10874_v47, %v10894_v10  ;;  %v11577_v47 = vld [vmem:[%s14786_s8] sm:$0xff]  }
 0x66d   :  { %v5053_v28 = vpop.f32.mrf.mxu0  ;;  %v5119_v35 = vpop.f32.mrf.mxu1  ;;  %v11578_v10 = vld [vmem:[%s14786_s8 + $0xa0] sm:$0xff]  }
 0x66e   :  { %v5132_v58 = vmax.f32 %v5053_v28, %v5119_v35  ;;  %v11579_v28 = vld [vmem:[%s14786_s8 + $0xd8] sm:$0xff]  }
 0x66f   :  { %v11580_v35 = vld [vmem:[%s14786_s8 + $0x178] sm:$0xff]  }
 0x687   :  { %v10913_v9 = vpop.f32.mrf.mxu0  ;;  %v10933_v29 = vpop.f32.mrf.mxu1 }
 0x688   :  { %v5203_v51 = vmax.f32 %v5133_v15, %v10913_v9  ;;  %v11581_v9 = vld [vmem:[%s14786_s8 + $0x98] sm:$0xff]   ;;  %v11585_v15 = vld [vmem:[%s14786_s8 + $0x90] sm:$0xff]  }
 0x689   :  { %v5186_v50 = vpop.f32.mrf.mxu0  ;;  %v5256_v43 = vpop.f32.mrf.mxu1 }
 0x68a   :  { %v5201_v56 = vmax.f32 %v5131_v46, %v5186_v50  ;;  %v5273_v31 = vmax.f32 %v5203_v51, %v10933_v29  ;;  %v11583_v29 = vld [vmem:[%s14786_s8 + $0xd0] sm:$0xff]   ;;  %v11587_v50 = vld [vmem:[%s14786_s8 + $0xc8] sm:$0xff]   ;;  %v11591_v46 = vld [vmem:[%s14786_s8 + $0xc0] sm:$0xff]  }
 0x68b   :  { %v10914_v13 = vpop.f32.mrf.mxu0  ;;  %v10934_v7 = vpop.f32.mrf.mxu1  ;;  %v11596_v51 = vld [vmem:[%s14786_s8 + $0x1f8] sm:$0xff]  }
 0x68c   :  { %v5204_v1 = vmax.f32 %v5134_v54, %v10914_v13  ;;  %v5271_v5 = vmax.f32 %v5201_v56, %v5256_v43  ;;  %v11589_v43 = vld [vmem:[%s14786_s8 + $0x88] sm:$0xff]   ;;  %v11593_v54 = vld [vmem:[%s14786_s8 + $0x80] sm:$0xff]  }
 0x68d   :  { %v5189_v18 = vpop.f32.mrf.mxu0  ;;  %v5259_v19 = vpop.f32.mrf.mxu1 }
 0x68e   :  { %v5202_v48 = vmax.f32 %v5132_v58, %v5189_v18  ;;  %v5274_v14 = vmax.f32 %v5204_v1, %v10934_v7 }
 0x690   :  { %v14065_v27 = vpack.c.bf16 %v5274_v14, %v5273_v31  ;;  %v5272_v0 = vmax.f32 %v5202_v48, %v5259_v19 }
 0x692   :  { %v14067_v23 = vpack.c.bf16 %v5272_v0, %v5271_v5  ;;  %10935 = vmatprep.subr.bf16.mxu0 %v14065_v27  ;;  %10967 = vmatprep.subr.bf16.mxu1 %v14065_v27  ;;  %v11582_v5 = vld [vmem:[%s14786_s8 + $0x138] sm:$0xff]  }
 0x693   :  { %10936 = vmatpush3.bf16.msra.mxu0 %v14065_v27  ;;  %10968 = vmatpush3.bf16.msra.mxu1 %v14065_v27 }
 0x694   :  { %10937 = vmatprep.subr.bf16.mxu0 %v14067_v23  ;;  %10969 = vmatprep.subr.bf16.mxu1 %v14067_v23 }
 0x697   :  { %10938 = vmatpush3.bf16.msra.mxu0 %v14067_v23  ;;  %10970 = vmatpush3.bf16.msra.mxu1 %v14067_v23 }
 0x698   :  { %10943 = vmatprep.subr.bf16.mxu0 %v14065_v27  ;;  %10983 = vmatprep.subr.bf16.mxu1 %v14065_v27 }
 0x69a   :  { %10940 = vmatmul.mubr.msk.bf16.vlgmr.msra.gmra.mxu0 %vm5291_vm1, %v11538_v59  ;;  %10972 = vmatmul.mubr.msk.bf16.vlgmr.msra.gmra.mxu1 %vm5291_vm1, %v11540_v45 }
 0x69b   :  { %10944 = vmatpush3.bf16.msra.mxu0 %v14065_v27  ;;  %10984 = vmatpush3.bf16.msra.mxu1 %v14065_v27 }
 0x69c   :  { %10945 = vmatprep.subr.bf16.mxu0 %v14067_v23  ;;  %10985 = vmatprep.subr.bf16.mxu1 %v14067_v23 }
 0x69d   :  { %10947 = vmatprep.mubr.msk.bf16.mxu0 %vm5291_vm1, %v11541_v3  ;;  %10987 = vmatprep.mubr.msk.bf16.mxu1 %vm5291_vm1, %v11543_v44  ;;  %v11586_v44 = vld [vmem:[%s14786_s8 + $0x130] sm:$0xff]  }
 0x69f   :  { %10946 = vmatpush3.bf16.msra.mxu0 %v14067_v23  ;;  %10986 = vmatpush3.bf16.msra.mxu1 %v14067_v23 }
 0x6a0   :  { %10951 = vmatprep.subr.bf16.mxu0 %v14065_v27  ;;  %10999 = vmatprep.subr.bf16.mxu1 %v14065_v27 }
 0x6a2   :  { %10948 = vmatmul.mubr.msk.bf16.vlgmr.msra.gmra.mxu0 %vm5291_vm1, %v11542_v17  ;;  %10988 = vmatmul.mubr.msk.bf16.vlgmr.msra.gmra.mxu1 %vm5291_vm1, %v11544_v34  ;;  %v11588_v34 = vld [vmem:[%s14786_s8 + $0x168] sm:$0xff]  }
 0x6a3   :  { %10952 = vmatpush3.bf16.msra.mxu0 %v14065_v27  ;;  %11000 = vmatpush3.bf16.msra.mxu1 %v14065_v27 }
 0x6a4   :  { %10953 = vmatprep.subr.bf16.mxu0 %v14067_v23  ;;  %11001 = vmatprep.subr.bf16.mxu1 %v14067_v23 }
 0x6a5   :  { %10955 = vmatprep.mubr.msk.bf16.mxu0 %vm5291_vm1, %v11545_v16  ;;  %11003 = vmatprep.mubr.msk.bf16.mxu1 %vm5291_vm1, %v11553_v39 }
 0x6a7   :  { %10954 = vmatpush3.bf16.msra.mxu0 %v14067_v23  ;;  %11002 = vmatpush3.bf16.msra.mxu1 %v14067_v23 }
 0x6a8   :  { %10959 = vmatprep.subr.bf16.mxu0 %v14065_v27  ;;  %10240 = vmatprep.subr.bf16.mxu1 %v11564_v36 }
 0x6aa   :  { %10956 = vmatmul.mubr.msk.bf16.vlgmr.msra.gmra.mxu0 %vm5291_vm1, %v11546_v61  ;;  %11004 = vmatmul.mubr.msk.bf16.vlgmr.msra.gmra.mxu1 %vm5291_vm1, %v11554_v49  ;;  %v11590_v61 = vld [vmem:[%s14786_s8 + $0x128] sm:$0xff]  }
 0x6ab   :  { %10960 = vmatpush3.bf16.msra.mxu0 %v14065_v27  ;;  %10963 = vmatprep.mubr.msk.bf16.mxu0 %vm5291_vm1, %v11547_v22 }
 0x6ac   :  { %10961 = vmatprep.subr.bf16.mxu0 %v14067_v23  ;;  %10241 = vmatpush3.bf16.msra.mxu1 %v11566_v38 }
 0x6ad   :  { %10242 = vmatprep.subr.bf16.mxu1 %v11568_v20  ;;  %v11601_v20 = vld [vmem:[%s14786_s8 + $0x110] sm:$0xff]  }
 0x6af   :  { %10962 = vmatpush3.bf16.msra.mxu0 %v14067_v23 }
 0x6b0   :  { %10975 = vmatprep.subr.bf16.mxu0 %v14065_v27  ;;  %10243 = vmatpush3.bf16.msra.mxu1 %v11570_v63  ;;  %v11603_v63 = vld [vmem:[%s14786_s8 + $0x148] sm:$0xff]  }
 0x6b1   :  { %10244 = vmatprep.subr.bf16.mxu1 %v11572_v33 }
 0x6b2   :  { %10964 = vmatmul.mubr.msk.bf16.vlgmr.msra.gmra.mxu0 %vm5291_vm1, %v11548_v37  ;;  %v11592_v37 = vld [vmem:[%s14786_s8 + $0x160] sm:$0xff]  }
 0x6b3   :  { %10976 = vmatpush3.bf16.msra.mxu0 %v14065_v27  ;;  %10979 = vmatprep.mubr.msk.bf16.mxu0 %vm5291_vm1, %v11549_v6 }
 0x6b4   :  { %10977 = vmatprep.subr.bf16.mxu0 %v14067_v23  ;;  %10245 = vmatpush3.bf16.msra.mxu1 %v11574_v40 }
 0x6b5   :  { %10246 = vmatprep.subr.bf16.mxu1 %v11576_v4  ;;  %v11606_v4 = vld [vmem:[%s14786_s8 + $0x1a8] sm:$0xff]  }
 0x6b7   :  { %10978 = vmatpush3.bf16.msra.mxu0 %v14067_v23 }
 0x6b8   :  { %10991 = vmatprep.subr.bf16.mxu0 %v14065_v27  ;;  %10247 = vmatpush3.bf16.msra.mxu1 %v11578_v10 }
 0x6b9   :  { %10248 = vmatprep.subr.bf16.mxu1 %v11579_v28  ;;  %v11607_v28 = vld [vmem:[%s14786_s8 + $0x140] sm:$0xff]  }
 0x6ba   :  { %10980 = vmatmul.mubr.msk.bf16.vlgmr.msra.gmra.mxu0 %vm5291_vm1, %v11550_v25 }
 0x6bb   :  { %10992 = vmatpush3.bf16.msra.mxu0 %v14065_v27  ;;  %10995 = vmatprep.mubr.msk.bf16.mxu0 %vm5291_vm1, %v11551_v32  ;;  %v11594_v32 = vld [vmem:[%s14786_s8 + $0x120] sm:$0xff]  }
 0x6bc   :  { %10993 = vmatprep.subr.bf16.mxu0 %v14067_v23  ;;  %10249 = vmatpush3.bf16.msra.mxu1 %v11581_v9 }
 0x6bd   :  { %10250 = vmatprep.subr.bf16.mxu1 %v11583_v29 }
 0x6bf   :  { %10994 = vmatpush3.bf16.msra.mxu0 %v14067_v23  ;;  %v11584_v23 = vld [vmem:[%s14786_s8 + $0x170] sm:$0xff]  }
 0x6c0   :  { %10212 = vmatprep.subr.bf16.mxu0 %v11555_v2  ;;  %10251 = vmatpush3.bf16.msra.mxu1 %v11585_v15 }
 0x6c1   :  { %10252 = vmatprep.subr.bf16.mxu1 %v11587_v50 }
 0x6c2   :  { %10996 = vmatmul.mubr.msk.bf16.vlgmr.msra.gmra.mxu0 %vm5291_vm1, %v11552_v11  ;;  %v11595_v11 = vld [vmem:[%s14786_s8 + $0x158] sm:$0xff]  }
 0x6c3   :  { %10213 = vmatpush3.bf16.msra.mxu0 %v11556_v55 }
 0x6c4   :  { %10214 = vmatprep.subr.bf16.mxu0 %v11557_v52  ;;  %10253 = vmatpush3.bf16.msra.mxu1 %v11589_v43  ;;  %v11609_v43 = vld [vmem:[%s14786_s8 + $0x100] sm:$0xff]  }
 0x6c5   :  { %10254 = vmatprep.subr.bf16.mxu1 %v11591_v46  ;;  %v11610_v46 = vld [vmem:[%s14786_s8 + $0x1a0] sm:$0xff]  }
 0x6c7   :  { %10215 = vmatpush3.bf16.msra.mxu0 %v11558_v41 }
 0x6c8   :  { %10216 = vmatprep.subr.bf16.mxu0 %v11559_v8  ;;  %10255 = vmatpush3.bf16.msra.mxu1 %v11593_v54  ;;  %v11597_v8 = vld [vmem:[%s14786_s8 + $0x118] sm:$0xff]  }
 0x6c9   :  { %10296 = vmatprep.subr.bf16.mxu1 %v11596_v51  ;;  %v11611_v54 = vld [vmem:[%s14786_s8 + $0x1d8] sm:$0xff]  }
 0x6ca   :  { %v11612_v51 = vld [vmem:[%s14786_s8 + $0x238] sm:$0xff]  }
 0x6cb   :  { %10217 = vmatpush3.bf16.msra.mxu0 %v11560_v62  ;;  %v11598_v62 = vld [vmem:[%s14786_s8 + $0x1b8] sm:$0xff]  }
 0x6cc   :  { %10218 = vmatprep.subr.bf16.mxu0 %v11561_v30 }
 0x6cf   :  { %10219 = vmatpush3.bf16.msra.mxu0 %v11562_v42  ;;  %v11599_v42 = vld [vmem:[%s14786_s8 + $0x150] sm:$0xff]  }
 0x6d0   :  { %10220 = vmatprep.subr.bf16.mxu0 %v11563_v24  ;;  %v11600_v24 = vld [vmem:[%s14786_s8 + $0x1f0] sm:$0xff]  }
 0x6d3   :  { %10221 = vmatpush3.bf16.msra.mxu0 %v11565_v53 }
 0x6d4   :  { %10222 = vmatprep.subr.bf16.mxu0 %v11567_v57 }
 0x6d7   :  { %10223 = vmatpush3.bf16.msra.mxu0 %v11569_v12  ;;  %v11602_v12 = vld [vmem:[%s14786_s8 + $0x1b0] sm:$0xff]  }
 0x6d8   :  { %10224 = vmatprep.subr.bf16.mxu0 %v11571_v26  ;;  %v11604_v26 = vld [vmem:[%s14786_s8 + $0x1e8] sm:$0xff]  }
 0x6db   :  { %10225 = vmatpush3.bf16.msra.mxu0 %v11573_v60 }
 0x6dc   :  { %10226 = vmatprep.subr.bf16.mxu0 %v11575_v21  ;;  %v11605_v21 = vld [vmem:[%s14786_s8 + $0x108] sm:$0xff]  }
 0x6df   :  { %10227 = vmatpush3.bf16.msra.mxu0 %v11577_v47 }
 0x6e0   :  { %10268 = vmatprep.subr.bf16.mxu0 %v11580_v35  ;;  %v11608_v35 = vld [vmem:[%s14786_s8 + $0x1e0] sm:$0xff]  }
 0x75a   :  { %v10941_v13 = vpop.f32.mrf.mxu0  ;;  %v14271_v14 = vpop.f32.mrf.mxu1 }
 0x75c   :  { %v5332_v7 = vpop.f32.mrf.mxu0  ;;  %v14281_v3 = vpop.f32.mrf.mxu1 }
 0x75e   :  { %v10942_v58 = vpop.f32.mrf.mxu0  ;;  %v14289_v39 = vpop.f32.mrf.mxu1 }
 0x75f   :  { %v5348_v49 = vpack.c.bf16 %v10942_v58, %v10941_v13 }
 0x760   :  { %v5335_v56 = vpop.f32.mrf.mxu0  ;;  %v14297_v25 = vpop.f32.mrf.mxu1 }
 0x761   :  { %v5347_v27 = vpack.c.bf16 %v5335_v56, %v5332_v7  ;;  %v11613_v56 = vld [vmem:[%s14786_s8 + $0x198] sm:$0xff]  }
 0x762   :  { %v10949_v1 = vpop.f32.mrf.mxu0  ;;  %v14305_v55 = vpop.f32.mrf.mxu1 }
 0x764   :  { %v5404_v18 = vpop.f32.mrf.mxu0  ;;  %v14321_v53 = vpop.f32.mrf.mxu1 }
 0x766   :  { %v10950_v31 = vpop.f32.mrf.mxu0  ;;  %v14335_v60 = vpop.f32.mrf.mxu1 }
 0x767   :  { %v5420_v59 = vpack.c.bf16 %v10950_v31, %v10949_v1  ;;  %v11614_v31 = vld [vmem:[%s14786_s8 + $0x1d0] sm:$0xff]  }
 0x768   :  { %v5407_v48 = vpop.f32.mrf.mxu0  ;;  %v5767_v29 = vpop.f32.mrf.mxu1 }
 0x769   :  { %v5419_v19 = vpack.c.bf16 %v5407_v48, %v5404_v18  ;;  %v5635_v18 = vpack.c.bf16 %v14297_v25, %v14281_v3  ;;  %v11615_v48 = vld [vmem:[%s14786_s8 + $0x230] sm:$0xff]   ;;  %v5636_v3 = vpack.c.bf16 %v14289_v39, %v14271_v14  ;;  %v11623_v14 = vld [vmem:[%s14786_s8 + $0x218] sm:$0xff]   ;;  %v5779_v39 = vpack.c.bf16 %v5767_v29, %v14321_v53 }
 0x76a   :  { %v14276_v0 = vpop.f32.mrf.mxu0  ;;  %v14352_v50 = vpop.f32.mrf.mxu1 }
 0x76b   :  { %6540 = vmatprep.mubr.bf16.mxu0 %v5419_v19 }
 0x76c   :  { %v5476_v45 = vpop.f32.mrf.mxu0  ;;  %6541 = vmatmul.mubr.bf16.vlgmr.msra.gmra.mxu0 %v5347_v27  ;;  %v5908_v58 = vpop.f32.mrf.mxu1  ;;  %v11616_v27 = vld [vmem:[%s14786_s8 + $0x190] sm:$0xff]  }
 0x76d   :  { %10269 = vmatpush3.bf16.msra.mxu0 %v11582_v5  ;;  %6548 = vmatprep.mubr.bf16.mxu0 %v5420_v59 }
 0x76e   :  { %v10958_v17 = vpop.f32.mrf.mxu0  ;;  %10270 = vmatprep.subr.bf16.mxu0 %v11584_v23  ;;  %v11006_v19 = vpop.f32.mrf.mxu1  ;;  %v11618_v23 = vld [vmem:[%s14786_s8 + $0x228] sm:$0xff]  }
 0x76f   :  { %v5492_v10 = vpack.c.bf16 %v10958_v17, %v14276_v0  ;;  %v11617_v0 = vld [vmem:[%s14786_s8 + $0x1c8] sm:$0xff]   ;;  %v11621_v17 = vld [vmem:[%s14786_s8 + $0x220] sm:$0xff]   ;;  %v5924_v25 = vpack.c.bf16 %v11006_v19, %v14352_v50 }
 0x770   :  { %v5479_v16 = vpop.f32.mrf.mxu0  ;;  %v5911_v59 = vpop.f32.mrf.mxu1 }
 0x771   :  { %10271 = vmatpush3.bf16.msra.mxu0 %v11586_v44  ;;  %v5491_v30 = vpack.c.bf16 %v5479_v16, %v5476_v45  ;;  %v11619_v45 = vld [vmem:[%s14786_s8 + $0x188] sm:$0xff]   ;;  %v11620_v44 = vld [vmem:[%s14786_s8 + $0x1c0] sm:$0xff]  }
 0x772   :  { %v10965_v22 = vpop.f32.mrf.mxu0  ;;  %10272 = vmatprep.subr.bf16.mxu0 %v11588_v34  ;;  %v5923_v34 = vpack.c.bf16 %v5911_v59, %v5908_v58  ;;  %v11622_v16 = vld [vmem:[%s14786_s8 + $0x180] sm:$0xff]  }
 0x774   :  { %v5548_v6 = vpop.f32.mrf.mxu0  ;;  %6549 = vmatmul.mubr.bf16.gmra.mxu0 %v5348_v49 }
 0x775   :  { %10273 = vmatpush3.bf16.msra.mxu0 %v11590_v61  ;;  %v11624_v61 = vld [vmem:[%s14786_s8 + $0x210] sm:$0xff]  }
 0x776   :  { %v10966_v2 = vpop.f32.mrf.mxu0  ;;  %10274 = vmatprep.subr.bf16.mxu0 %v11592_v37  ;;  %v5780_v37 = vpack.c.bf16 %v14335_v60, %v14305_v55 }
 0x777   :  { %v5564_v57 = vpack.c.bf16 %v10966_v2, %v10965_v22  ;;  %v11625_v22 = vld [vmem:[%s14786_s8 + $0x208] sm:$0xff]  }
 0x778   :  { %v5551_v52 = vpop.f32.mrf.mxu0 }
 0x779   :  { %v5563_v41 = vpack.c.bf16 %v5551_v52, %v5548_v6  ;;  %10275 = vmatpush3.bf16.msra.mxu0 %v11594_v32  ;;  %v11626_v6 = vld [vmem:[%s14786_s8 + $0x200] sm:$0xff]   ;;  %v11722_v32 = vmov 0.0  }
 0x77a   :  { %10276 = vmatprep.subr.bf16.mxu0 %v11595_v11  ;;  %v14319_v36 = vpop.f32.mrf.mxu0 }
 0x77b   :  { %6589 = vmatprep.mubr.bf16.mxu1 %v5563_v41 }
 0x77c   :  { %6590 = vmatmul.mubr.bf16.vlgmr.msra.gmra.mxu1 %v5491_v30  ;;  %v5692_v38 = vpop.f32.mrf.mxu0 }
 0x77d   :  { %10277 = vmatpush3.bf16.msra.mxu0 %v11597_v8  ;;  %10297 = vmatpush3.bf16.msra.mxu1 %v11598_v62 }
 0x77e   :  { %10278 = vmatprep.subr.bf16.mxu0 %v11599_v42  ;;  %10298 = vmatprep.subr.bf16.mxu1 %v11600_v24  ;;  %v10982_v33 = vpop.f32.mrf.mxu0 }
 0x77f   :  { %6597 = vmatprep.mubr.bf16.mxu1 %v5564_v57  ;;  %v5708_v5 = vpack.c.bf16 %v10982_v33, %v14319_v36 }
 0x780   :  { %v5695_v40 = vpop.f32.mrf.mxu0 }
 0x781   :  { %10279 = vmatpush3.bf16.msra.mxu0 %v11601_v20  ;;  %10299 = vmatpush3.bf16.msra.mxu1 %v11602_v12  ;;  %v5707_v47 = vpack.c.bf16 %v5695_v40, %v5692_v38 }
 0x782   :  { %10280 = vmatprep.subr.bf16.mxu0 %v11603_v63  ;;  %10300 = vmatprep.subr.bf16.mxu1 %v11604_v26  ;;  %v14350_v9 = vpop.f32.mrf.mxu0 }
 0x783   :  { %6638 = vmatprep.mubr.bf16.mxu0 %v5707_v47 }
 0x784   :  { %6598 = vmatmul.mubr.bf16.gmra.mxu1 %v5492_v10  ;;  %v5836_v15 = vpop.f32.mrf.mxu0 }
 0x785   :  { %10281 = vmatpush3.bf16.msra.mxu0 %v11605_v21  ;;  %10301 = vmatpush3.bf16.msra.mxu1 %v11606_v4 }
 0x786   :  { %10282 = vmatprep.subr.bf16.mxu0 %v11607_v28  ;;  %10302 = vmatprep.subr.bf16.mxu1 %v11608_v35  ;;  %v10998_v13 = vpop.f32.mrf.mxu0 }
 0x787   :  { %v5852_v49 = vpack.c.bf16 %v10998_v13, %v14350_v9 }
 0x788   :  { %v5839_v7 = vpop.f32.mrf.mxu0 }
 0x789   :  { %10283 = vmatpush3.bf16.msra.mxu0 %v11609_v43  ;;  %10303 = vmatpush3.bf16.msra.mxu1 %v11610_v46  ;;  %v5851_v1 = vpack.c.bf16 %v5839_v7, %v5836_v15  ;;  %v8998_v43 = vld [vmem:[%s14787_s9] ss:$0 sm:$0xff] }
 0x78a   :  { %10304 = vmatprep.subr.bf16.mxu1 %v11611_v54  ;;  %11007 = vmatprep.subr.bf16.mxu0 %v11612_v51 }
 0x78b   :  { %6687 = vmatprep.mubr.bf16.mxu1 %v5851_v1 }
 0x78c   :  { %6639 = vmatmul.mubr.bf16.vlgmr.msra.gmra.mxu0 %v5635_v18 }
 0x78d   :  { %10305 = vmatpush3.bf16.msra.mxu1 %v11613_v56  ;;  %11008 = vmatpush3.bf16.msra.mxu0 %v11612_v51 }
 0x78e   :  { %10306 = vmatprep.subr.bf16.mxu1 %v11614_v31  ;;  %11009 = vmatprep.subr.bf16.mxu0 %v11615_v48 }
 0x78f   :  { %6646 = vmatprep.mubr.bf16.mxu0 %v5708_v5 }
 0x791   :  { %10307 = vmatpush3.bf16.msra.mxu1 %v11616_v27  ;;  %11010 = vmatpush3.bf16.msra.mxu0 %v11615_v48 }
 0x792   :  { %10308 = vmatprep.subr.bf16.mxu1 %v11617_v0  ;;  %11011 = vmatprep.subr.bf16.mxu0 %v11618_v23 }
 0x794   :  { %6647 = vmatmul.mubr.bf16.gmra.mxu0 %v5636_v3 }
 0x795   :  { %10309 = vmatpush3.bf16.msra.mxu1 %v11619_v45  ;;  %11012 = vmatpush3.bf16.msra.mxu0 %v11618_v23 }
 0x796   :  { %10310 = vmatprep.subr.bf16.mxu1 %v11620_v44  ;;  %11013 = vmatprep.subr.bf16.mxu0 %v11621_v17 }
 0x797   :  { %11023 = vmatprep.mubr.bf16.mxu0 %v5923_v34 }
 0x799   :  { %10311 = vmatpush3.bf16.msra.mxu1 %v11622_v16  ;;  %11014 = vmatpush3.bf16.msra.mxu0 %v11621_v17 }
 0x79a   :  { %11015 = vmatprep.subr.bf16.mxu0 %v11623_v14  ;;  %11027 = vmatprep.subr.bf16.mxu1 %v11722_v32 }
 0x79c   :  { %6688 = vmatmul.mubr.bf16.vlgmr.msra.gmra.mxu1 %v5779_v39 }
 0x79d   :  { %11016 = vmatpush3.bf16.msra.mxu0 %v11623_v14  ;;  %6695 = vmatprep.mubr.bf16.mxu1 %v5852_v49 }
 0x79e   :  { %11017 = vmatprep.subr.bf16.mxu0 %v11624_v61 }
 0x7a1   :  { %11018 = vmatpush3.bf16.msra.mxu0 %v11624_v61 }
 0x7a2   :  { %11019 = vmatprep.subr.bf16.mxu0 %v11625_v22 }
 0x7a4   :  { %6696 = vmatmul.mubr.bf16.gmra.mxu1 %v5780_v37 }
 0x7a5   :  { %11020 = vmatpush3.bf16.msra.mxu0 %v11625_v22  ;;  %11031 = vmatprep.mubr.msk.bf16.mxu1 %vm11723_vm2, %v11722_v32 }
 0x7a6   :  { %11021 = vmatprep.subr.bf16.mxu0 %v11626_v6 }
 0x7a9   :  { %11022 = vmatpush3.bf16.msra.mxu0 %v11626_v6 }
 0x7aa   :  { %11051 = vmatprep.subr.bf16.mxu0 %v11722_v32 }
 0x7ac   :  { %11024 = vmatmul.mubr.bf16.vlgmr.msra.gmra.mxu0 %v5924_v25 }
 0x7ad   :  { %11055 = vmatprep.mubr.msk.bf16.mxu0 %vm11723_vm2, %v11722_v32 }
 0x82c   :  { %v10228_v2 = vpop.f32.mrf.mxu0 }
 0x82e   :  { %v10229_v11 = vpop.f32.mrf.mxu0 }
 0x82f   :  { %v10230_v46 = vadd.f32 %v10229_v11, %v10228_v2 }
 0x830   :  { %v10231_v55 = vpop.f32.mrf.mxu0 }
 0x831   :  { %v6543_v0 = vadd.f32 %v10230_v46, %v8998_v43 }
 0x832   :  { %v10232_v52 = vpop.f32.mrf.mxu0 }
 0x833   :  { %v10233_v54 = vadd.f32 %v10232_v52, %v10231_v55 }
 0x834   :  { %v10234_v41 = vpop.f32.mrf.mxu0 }
 0x835   :  { %v6546_v23 = vadd.f32 %v10233_v54, %v8998_v43 }
 0x836   :  { %v10235_v62 = vpop.f32.mrf.mxu0 }
 0x837   :  { %v10236_v9 = vadd.f32 %v10235_v62, %v10234_v41 }
 0x838   :  { %v10237_v42 = vpop.f32.mrf.mxu0 }
 0x839   :  { %v6551_v58 = vadd.f32 %v10236_v9, %v8998_v43 }
 0x83a   :  { %v10238_v36 = vpop.f32.mrf.mxu0 }
 0x83b   :  { %v10239_v29 = vadd.f32 %v10238_v36, %v10237_v42 }
 0x83c   :  { %v10256_v8 = vpop.f32.mrf.mxu1 }
 0x83d   :  { %v6554_v1 = vadd.f32 %v10239_v29, %v8998_v43 }
 0x83e   :  { %v10257_v30 = vpop.f32.mrf.mxu1 }
 0x83f   :  { %v10258_v18 = vadd.f32 %v10257_v30, %v10256_v8 }
 0x840   :  { %v10259_v24 = vpop.f32.mrf.mxu1 }
 0x841   :  { %v6592_v16 = vadd.f32 %v10258_v18, %v6543_v0  ;;  %v9087_v0 = vld [vmem:[%s14792_s14 + $0x14] sm:$0xf] }
 0x842   :  { %v10260_v53 = vpop.f32.mrf.mxu1 }
 0x843   :  { %v10261_v31 = vadd.f32 %v10260_v53, %v10259_v24 }
 0x844   :  { %v10262_v57 = vpop.f32.mrf.mxu1 }
 0x845   :  { %v6595_v14 = vadd.f32 %v10261_v31, %v6546_v23  ;;  %v6942_v31 = vld [vmem:[%s14792_s14] sm:$0xf]  ;;  %v11627_v23 = vld [vmem:[%s14790_s12 + $0x78] sm:$0xff]  }
 0x846   :  { %v10263_v12 = vpop.f32.mrf.mxu1 }
 0x847   :  { %v10264_v50 = vadd.f32 %v10263_v12, %v10262_v57 }
 0x848   :  { %v10265_v26 = vpop.f32.mrf.mxu1 }
 0x849   :  { %v6600_v19 = vadd.f32 %v10264_v50, %v6551_v58 }
 0x84a   :  { %v10266_v60 = vpop.f32.mrf.mxu1 }
 0x84b   :  { %v10267_v51 = vadd.f32 %v10266_v60, %v10265_v26  ;;  %v9076_v26 = vld [vmem:[%s14789_s11 + $0xc] sm:$0xf]  ;;  %v9074_v60 = vld [vmem:[%s14789_s11 + $0x8] sm:$0xf] }
 0x84c   :  { %v10284_v38 = vpop.f32.mrf.mxu0 }
 0x84d   :  { %v6603_v59 = vadd.f32 %v10267_v51, %v6554_v1 }
 0x84e   :  { %v10285_v20 = vpop.f32.mrf.mxu0 }
 0x84f   :  { %v10286_v3 = vadd.f32 %v10285_v20, %v10284_v38 }
 0x850   :  { %v10287_v63 = vpop.f32.mrf.mxu0 }
 0x851   :  { %v6641_v25 = vadd.f32 %v10286_v3, %v6592_v16  ;;  %v11628_v3 = vld [vmem:[%s14790_s12 + $0x38] sm:$0xff]   ;;  %v11631_v16 = vld [vmem:[%s14790_s12 + $0x68] sm:$0xff]  }
 0x852   :  { %v10288_v33 = vpop.f32.mrf.mxu0 }
 0x853   :  { %v10289_v44 = vadd.f32 %v10288_v33, %v10287_v63  ;;  %v6759_v63 = vld [vmem:[%s14789_s11] sm:$0xf]  ;;  %v9072_v33 = vld [vmem:[%s14789_s11 + $0x4] sm:$0xf] }
 0x854   :  { %v10290_v40 = vpop.f32.mrf.mxu0 }
 0x855   :  { %v6644_v2 = vadd.f32 %v10289_v44, %v6595_v14  ;;  %v11632_v44 = vld [vmem:[%s14790_s12 + $0xf8] sm:$0xff]   ;;  %v9093_v14 = vld [vmem:[%s14792_s14 + $0x20] sm:$0xf] }
 0x856   :  { %v10291_v4 = vpop.f32.mrf.mxu0 }
 0x857   :  { %v10292_v56 = vadd.f32 %v10291_v4, %v10290_v40 }
 0x858   :  { %v10293_v28 = vpop.f32.mrf.mxu0 }
 0x859   :  { %v6649_v17 = vadd.f32 %v10292_v56, %v6600_v19  ;;  %v9081_v19 = vld [vmem:[%s14792_s14 + $0x8] sm:$0xf] }
 0x85a   :  { %v10294_v13 = vpop.f32.mrf.mxu0 }
 0x85b   :  { %v10295_v5 = vadd.f32 %v10294_v13, %v10293_v28 }
 0x85c   :  { %v10312_v21 = vpop.f32.mrf.mxu1 }
 0x85d   :  { %v6652_v61 = vadd.f32 %v10295_v5, %v6603_v59  ;;  %v9083_v5 = vld [vmem:[%s14792_s14 + $0xc] sm:$0xf]  ;;  %v9089_v59 = vld [vmem:[%s14792_s14 + $0x18] sm:$0xf] }
 0x85e   :  { %v10313_v47 = vpop.f32.mrf.mxu1 }
 0x85f   :  { %v10314_v49 = vadd.f32 %v10313_v47, %v10312_v21 }
 0x860   :  { %v10315_v10 = vpop.f32.mrf.mxu1 }
 0x861   :  { %v6690_v41 = vadd.f32 %v10314_v49, %v6641_v25  ;;  %v11636_v49 = vld [vmem:[%s14790_s12 + $0xf0] sm:$0xff]   ;;  %v11640_v25 = vld [vmem:[%s14790_s12 + $0xe8] sm:$0xff]  }
 0x862   :  { %v10316_v35 = vpop.f32.mrf.mxu1 }
 0x863   :  { %v10317_v22 = vadd.f32 %v10316_v35, %v10315_v10 }
 0x864   :  { %v10318_v15 = vpop.f32.mrf.mxu1 }
 0x865   :  { %v6693_v62 = vadd.f32 %v10317_v22, %v6644_v2  ;;  %v11635_v22 = vld [vmem:[%s14790_s12 + $0x60] sm:$0xff]   ;;  %v11639_v2 = vld [vmem:[%s14790_s12 + $0x58] sm:$0xff]  }
 0x866   :  { %v10319_v7 = vpop.f32.mrf.mxu1 }
 0x867   :  { %v10320_v27 = vadd.f32 %v10319_v7, %v10318_v15 }
 0x868   :  { %v10321_v48 = vpop.f32.mrf.mxu1 }
 0x869   :  { %v6698_v37 = vadd.f32 %v10320_v27, %v6649_v17  ;;  %v9085_v27 = vld [vmem:[%s14792_s14 + $0x10] sm:$0xf] }
 0x86a   :  { %v10322_v45 = vpop.f32.mrf.mxu1  ;;  %v11629_v17 = vld [vmem:[%s14790_s12 + $0x70] sm:$0xff]  }
 0x86b   :  { %v10323_v34 = vadd.f32 %v10322_v45, %v10321_v48  ;;  %v9079_v48 = vld [vmem:[%s14792_s14 + $0x4] sm:$0xf]  ;;  %v9091_v45 = vld [vmem:[%s14792_s14 + $0x1c] sm:$0xf] }
 0x86c   :  { %v11025_v39 = vpop.f32.mrf.mxu0 }
 0x86d   :  { %v6747_v11 = vadd.f32 %v11025_v39, %v6698_v37  ;;  %v6701_v55 = vadd.f32 %v10323_v34, %v6652_v61  ;;  %v11630_v34 = vld [vmem:[%s14790_s12 + $0x30] sm:$0xff]   ;;  %v11634_v39 = vld [vmem:[%s14790_s12 + $0xb8] sm:$0xff]   ;;  %v11633_v61 = vld [vmem:[%s14790_s12 + $0x28] sm:$0xff]  }
 0x86e   :  { %v6738_v6 = vpop.f32.mrf.mxu0  ;;  %v11638_v37 = vld [vmem:[%s14790_s12 + $0xb0] sm:$0xff]  }
 0x86f   :  { %v6755_v42 = vmax.f32 %v6747_v11, 0.0  ;;  %v6739_v24 = vadd.f32 %v6738_v6, %v6690_v41  ;;  %v11637_v6 = vld [vmem:[%s14790_s12 + $0x20] sm:$0xff]   ;;  %v11642_v11 = vld [vmem:[%s14790_s12 + $0xa8] sm:$0xff]   ;;  %v11643_v41 = vld [vmem:[%s14790_s12 + $0x50] sm:$0xff]  }
 0x870   :  { %v11026_v52 = vpop.f32.mrf.mxu0 }
 0x871   :  { %v6750_v8 = vadd.f32 %v11026_v52, %v6701_v55  ;;  %v6753_v20 = vmax.f32 %v6739_v24, 0.0  ;;  %v11641_v55 = vld [vmem:[%s14790_s12 + $0x18] sm:$0xff]   ;;  %v11644_v52 = vld [vmem:[%s14790_s12 + $0xe0] sm:$0xff]  }
 0x872   :  { %v6741_v30 = vpop.f32.mrf.mxu0  ;;  %v11650_v24 = vld [vmem:[%s14790_s12 + $0x98] sm:$0xff]  }
 0x873   :  { %v6756_v36 = vmax.f32 %v6750_v8, 0.0  ;;  %v6742_v53 = vadd.f32 %v6741_v30, %v6693_v62  ;;  %v11646_v8 = vld [vmem:[%s14790_s12 + $0xa0] sm:$0xff]   ;;  %v11645_v62 = vld [vmem:[%s14790_s12 + $0x10] sm:$0xff]   ;;  %v11648_v30 = vld [vmem:[%s14790_s12 + $0xd8] sm:$0xff]  }
 0x875   :  { %v6758_v38 = vpack.c.bf16 %v6756_v36, %v6755_v42  ;;  %v6754_v57 = vmax.f32 %v6742_v53, 0.0  ;;  %v11647_v42 = vld [vmem:[%s14790_s12 + $0x48] sm:$0xff]   ;;  %v11652_v53 = vld [vmem:[%s14790_s12 + $0xd0] sm:$0xff]  }
 0x876   :  { %v11649_v36 = vld [vmem:[%s14790_s12 + $0x8] sm:$0xff]  }
 0x877   :  { %11028 = vmatpush3.bf16.msra.mxu1 %v6758_v38  ;;  %11052 = vmatpush3.bf16.msra.mxu0 %v6758_v38  ;;  %v6757_v12 = vpack.c.bf16 %v6754_v57, %v6753_v20  ;;  %v11653_v57 = vld [vmem:[%s14790_s12] sm:$0xff]   ;;  %v11654_v20 = vld [vmem:[%s14790_s12 + $0x90] sm:$0xff]  }
 0x878   :  { %11029 = vmatprep.subr.bf16.mxu1 %v11722_v32  ;;  %11053 = vmatprep.subr.bf16.mxu0 %v11722_v32 }
 0x87b   :  { %11030 = vmatpush3.bf16.msra.mxu1 %v6757_v12  ;;  %11054 = vmatpush3.bf16.msra.mxu0 %v6757_v12 }
 0x87c   :  { %11035 = vmatprep.subr.bf16.mxu1 %v11722_v32  ;;  %11065 = vmatprep.subr.bf16.mxu0 %v11722_v32 }
 0x87e   :  { %11032 = vmatmul.mubr.msk.bf16.vlgmr.msra.gmra.mxu1 %vm5291_vm1, %v6759_v63  ;;  %11056 = vmatmul.mubr.msk.bf16.vlgmr.msra.gmra.mxu0 %vm5291_vm1, %v9076_v26  ;;  %v11656_v63 = vld [vmem:[%s14790_s12 + $0x178] sm:$0xff]   ;;  %v11657_v26 = vld [vmem:[%s14790_s12 + $0x88] sm:$0xff]  }
 0x87f   :  { %11036 = vmatpush3.bf16.msra.mxu1 %v6758_v38  ;;  %11039 = vmatprep.mubr.msk.bf16.mxu1 %vm11723_vm2, %v11722_v32 }
 0x880   :  { %11037 = vmatprep.subr.bf16.mxu1 %v11722_v32  ;;  %11067 = vmatprep.mubr.msk.bf16.mxu0 %vm11723_vm2, %v11722_v32 }
 0x883   :  { %11038 = vmatpush3.bf16.msra.mxu1 %v6757_v12 }
 0x884   :  { %11043 = vmatprep.subr.bf16.mxu1 %v11722_v32 }
 0x886   :  { %11040 = vmatmul.mubr.msk.bf16.vlgmr.msra.gmra.mxu1 %vm5291_vm1, %v9072_v33  ;;  %v11659_v33 = vld [vmem:[%s14790_s12 + $0xc0] sm:$0xff]  }
 0x887   :  { %11044 = vmatpush3.bf16.msra.mxu1 %v6758_v38  ;;  %11047 = vmatprep.mubr.msk.bf16.mxu1 %vm11723_vm2, %v11722_v32  ;;  %v11651_v38 = vld [vmem:[%s14790_s12 + $0x40] sm:$0xff]  }
 0x888   :  { %11045 = vmatprep.subr.bf16.mxu1 %v11722_v32 }
 0x88b   :  { %11046 = vmatpush3.bf16.msra.mxu1 %v6757_v12  ;;  %v11655_v12 = vld [vmem:[%s14790_s12 + $0xc8] sm:$0xff]  }
 0x88c   :  { %11059 = vmatprep.subr.bf16.mxu1 %v11722_v32 }
 0x88e   :  { %11048 = vmatmul.mubr.msk.bf16.vlgmr.msra.gmra.mxu1 %vm5291_vm1, %v9074_v60  ;;  %v11661_v60 = vld [vmem:[%s14790_s12 + $0x80] sm:$0xff]  }
 0x88f   :  { %11061 = vmatprep.mubr.msk.bf16.mxu1 %vm11723_vm2, %v11722_v32 }
 0x93e   :  { %v6797_v40 = vpop.f32.mrf.mxu1  ;;  %v6934_v21 = vpop.f32.mrf.mxu0 }
 0x940   :  { %v11033_v4 = vpop.f32.mrf.mxu1  ;;  %v11057_v47 = vpop.f32.mrf.mxu0 }
 0x942   :  { %v6800_v10 = vpop.f32.mrf.mxu1  ;;  %v6937_v28 = vpop.f32.mrf.mxu0 }
 0x943   :  { %v11658_v28 = vld [vmem:[%s14790_s12 + $0x138] sm:$0xff]  }
 0x944   :  { %v11034_v35 = vpop.f32.mrf.mxu1  ;;  %v11058_v9 = vpop.f32.mrf.mxu0 }
 0x946   :  { %v6842_v29 = vpop.f32.mrf.mxu1 }
 0x947   :  { %v6848_v46 = vmax.f32 %v6797_v40, %v6842_v29  ;;  %v11664_v40 = vld [vmem:[%s14790_s12 + $0x1f8] sm:$0xff]   ;;  %v11660_v29 = vld [vmem:[%s14790_s12 + $0x170] sm:$0xff]  }
 0x948   :  { %v11041_v15 = vpop.f32.mrf.mxu1 }
 0x94a   :  { %v6845_v50 = vpop.f32.mrf.mxu1 }
 0x94c   :  { %v11042_v43 = vpop.f32.mrf.mxu1 }
 0x94d   :  { %v11662_v43 = vld [vmem:[%s14790_s12 + $0x130] sm:$0xff]  }
 0x94e   :  { %v6888_v54 = vpop.f32.mrf.mxu1 }
 0x94f   :  { %v6894_v51 = vmax.f32 %v6848_v46, %v6888_v54 }
 0x950   :  { %v11049_v13 = vpop.f32.mrf.mxu1 }
 0x951   :  { %v6940_v7 = vmax.f32 %v6894_v51, %v6934_v21  ;;  %v11663_v51 = vld [vmem:[%s14790_s12 + $0x168] sm:$0xff]  }
 0x952   :  { %v6891_v58 = vpop.f32.mrf.mxu1 }
 0x953   :  { %v6941_v56 = vpack.c.bf16 %v6940_v7, %v6940_v7 }
 0x954   :  { %v11050_v1 = vpop.f32.mrf.mxu1 }
 0x955   :  { %v6949_v18 = vsel %vm6947_vm3, %v6941_v56, 0  ;;  %v11665_v1 = vld [vmem:[%s14790_s12 + $0x128] sm:$0xff]  }
 0x956   :  { %11060 = vmatpush3.bf16.msra.mxu1 %v6949_v18  ;;  %11066 = vmatpush3.bf16.msra.mxu0 %v6949_v18 }
 0x957   :  { %11071 = vmatprep.subr.bf16.mxu1 %v11722_v32  ;;  %11077 = vmatprep.subr.bf16.mxu0 %v11722_v32 }
 0x959   :  { %11062 = vmatmul.mubr.msk.bf16.vlgmr.msra.gmra.mxu1 %vm6943_vm4, %v6942_v31  ;;  %11068 = vmatmul.mubr.msk.bf16.vlgmr.msra.gmra.mxu0 %vm6943_vm4, %v9079_v48  ;;  %v11667_v31 = vld [vmem:[%s14790_s12 + $0x160] sm:$0xff]   ;;  %v11668_v48 = vld [vmem:[%s14790_s12 + $0x1f0] sm:$0xff]  }
 0x95a   :  { %11072 = vmatpush3.bf16.msra.mxu1 %v6949_v18  ;;  %11078 = vmatpush3.bf16.msra.mxu0 %v6949_v18 }
 0x95b   :  { %11073 = vmatprep.mubr.msk.bf16.mxu1 %vm11723_vm2, %v11722_v32  ;;  %11079 = vmatprep.mubr.msk.bf16.mxu0 %vm11723_vm2, %v11722_v32 }
 0x95c   :  { %11083 = vmatprep.subr.bf16.mxu1 %v11722_v32  ;;  %11089 = vmatprep.subr.bf16.mxu0 %v11722_v32 }
 0x961   :  { %11074 = vmatmul.mubr.msk.bf16.vlgmr.msra.gmra.mxu1 %vm6943_vm4, %v9081_v19  ;;  %11080 = vmatmul.mubr.msk.bf16.vlgmr.msra.gmra.mxu0 %vm6943_vm4, %v9083_v5 }
 0x962   :  { %11084 = vmatpush3.bf16.msra.mxu1 %v6949_v18  ;;  %11090 = vmatpush3.bf16.msra.mxu0 %v6949_v18 }
 0x963   :  { %11085 = vmatprep.mubr.msk.bf16.mxu1 %vm11723_vm2, %v11722_v32  ;;  %11091 = vmatprep.mubr.msk.bf16.mxu0 %vm11723_vm2, %v11722_v32 }
 0x964   :  { %11095 = vmatprep.subr.bf16.mxu1 %v11722_v32  ;;  %11101 = vmatprep.subr.bf16.mxu0 %v11722_v32 }
 0x969   :  { %11086 = vmatmul.mubr.msk.bf16.vlgmr.msra.gmra.mxu1 %vm6943_vm4, %v9085_v27  ;;  %11092 = vmatmul.mubr.msk.bf16.vlgmr.msra.gmra.mxu0 %vm6943_vm4, %v9087_v0 }
 0x96a   :  { %11096 = vmatpush3.bf16.msra.mxu1 %v6949_v18  ;;  %11102 = vmatpush3.bf16.msra.mxu0 %v6949_v18 }
 0x96b   :  { %11097 = vmatprep.mubr.msk.bf16.mxu1 %vm11723_vm2, %v11722_v32  ;;  %11107 = vmatprep.subr.bf16.mxu1 %v11722_v32 }
 0x96c   :  { %11103 = vmatprep.mubr.msk.bf16.mxu0 %vm11723_vm2, %v11722_v32  ;;  %10364 = vmatprep.subr.bf16.mxu0 %v11627_v23  ;;  %v11669_v23 = vld [vmem:[%s14790_s12 + $0x120] sm:$0xff]  }
 0x971   :  { %11098 = vmatmul.mubr.msk.bf16.vlgmr.msra.gmra.mxu1 %vm6943_vm4, %v9089_v59  ;;  %11104 = vmatmul.mubr.msk.bf16.vlgmr.msra.gmra.mxu0 %vm6943_vm4, %v9091_v45  ;;  %v11670_v59 = vld [vmem:[%s14790_s12 + $0x1b0] sm:$0xff]   ;;  %v11671_v45 = vld [vmem:[%s14790_s12 + $0x158] sm:$0xff]  }
 0x972   :  { %11108 = vmatpush3.bf16.msra.mxu1 %v6949_v18  ;;  %11109 = vmatprep.mubr.msk.bf16.mxu1 %vm11723_vm2, %v11722_v32  ;;  %v11666_v18 = vld [vmem:[%s14790_s12 + $0x1b8] sm:$0xff]  }
 0x973   :  { %10365 = vmatpush3.bf16.msra.mxu0 %v11628_v3  ;;  %10386 = vmatprep.subr.bf16.mxu1 %v11632_v44  ;;  %v11672_v3 = vld [vmem:[%s14790_s12 + $0x1e8] sm:$0xff]  }
 0x974   :  { %10366 = vmatprep.subr.bf16.mxu0 %v11629_v17 }
 0x977   :  { %10367 = vmatpush3.bf16.msra.mxu0 %v11630_v34 }
 0x978   :  { %10368 = vmatprep.subr.bf16.mxu0 %v11631_v16 }
 0x979   :  { %11110 = vmatmul.mubr.msk.bf16.vlgmr.msra.gmra.mxu1 %vm6943_vm4, %v9093_v14  ;;  %v11673_v14 = vld [vmem:[%s14790_s12 + $0x118] sm:$0xff]  }
 0x97a   :  { %10387 = vmatpush3.bf16.msra.mxu1 %v11634_v39  ;;  %v11674_v39 = vld [vmem:[%s14790_s12 + $0x1a8] sm:$0xff]  }
 0x97b   :  { %10369 = vmatpush3.bf16.msra.mxu0 %v11633_v61  ;;  %10388 = vmatprep.subr.bf16.mxu1 %v11636_v49  ;;  %v11675_v49 = vld [vmem:[%s14790_s12 + $0x150] sm:$0xff]  }
 0x97c   :  { %10370 = vmatprep.subr.bf16.mxu0 %v11635_v22  ;;  %v11676_v22 = vld [vmem:[%s14790_s12 + $0x1e0] sm:$0xff]  }
 0x97e   :  { %10389 = vmatpush3.bf16.msra.mxu1 %v11638_v37 }
 0x97f   :  { %10371 = vmatpush3.bf16.msra.mxu0 %v11637_v6  ;;  %10390 = vmatprep.subr.bf16.mxu1 %v11640_v25 }
 0x980   :  { %10372 = vmatprep.subr.bf16.mxu0 %v11639_v2 }
 0x982   :  { %10391 = vmatpush3.bf16.msra.mxu1 %v11642_v11  ;;  %v11677_v11 = vld [vmem:[%s14790_s12 + $0x110] sm:$0xff]  }
 0x983   :  { %10373 = vmatpush3.bf16.msra.mxu0 %v11641_v55  ;;  %10392 = vmatprep.subr.bf16.mxu1 %v11644_v52  ;;  %v11678_v55 = vld [vmem:[%s14790_s12 + $0x1a0] sm:$0xff]   ;;  %v11679_v52 = vld [vmem:[%s14790_s12 + $0x148] sm:$0xff]  }
 0x984   :  { %10374 = vmatprep.subr.bf16.mxu0 %v11643_v41  ;;  %v11680_v41 = vld [vmem:[%s14790_s12 + $0x1d8] sm:$0xff]  }
 0x986   :  { %10393 = vmatpush3.bf16.msra.mxu1 %v11646_v8 }
 0x987   :  { %10375 = vmatpush3.bf16.msra.mxu0 %v11645_v62  ;;  %10394 = vmatprep.subr.bf16.mxu1 %v11648_v30 }
 0x988   :  { %10376 = vmatprep.subr.bf16.mxu0 %v11647_v42 }
 0x98a   :  { %10395 = vmatpush3.bf16.msra.mxu1 %v11650_v24  ;;  %v11681_v24 = vld [vmem:[%s14790_s12 + $0x108] sm:$0xff]  }
 0x98b   :  { %10377 = vmatpush3.bf16.msra.mxu0 %v11649_v36  ;;  %10396 = vmatprep.subr.bf16.mxu1 %v11652_v53  ;;  %v11682_v36 = vld [vmem:[%s14790_s12 + $0x198] sm:$0xff]  }
 0x98c   :  { %10378 = vmatprep.subr.bf16.mxu0 %v11651_v38  ;;  %v11683_v38 = vld [vmem:[%s14790_s12 + $0x140] sm:$0xff]  }
 0x98e   :  { %10397 = vmatpush3.bf16.msra.mxu1 %v11654_v20 }
 0x98f   :  { %10379 = vmatpush3.bf16.msra.mxu0 %v11653_v57  ;;  %10398 = vmatprep.subr.bf16.mxu1 %v11655_v12  ;;  %v11684_v57 = vld [vmem:[%s14790_s12 + $0x1d0] sm:$0xff]  }
 0x990   :  { %10408 = vmatprep.subr.bf16.mxu0 %v11656_v63 }
 0x992   :  { %10399 = vmatpush3.bf16.msra.mxu1 %v11657_v26 }
 0x993   :  { %10400 = vmatprep.subr.bf16.mxu1 %v11659_v33  ;;  %v11685_v33 = vld [vmem:[%s14790_s12 + $0x100] sm:$0xff]  }
 0x996   :  { %10401 = vmatpush3.bf16.msra.mxu1 %v11661_v60  ;;  %v11686_v60 = vld [vmem:[%s14790_s12 + $0x190] sm:$0xff]  }
 0x997   :  { %10430 = vmatprep.subr.bf16.mxu1 %v11664_v40  ;;  %v11687_v40 = vld [vmem:[%s14790_s12 + $0x1c8] sm:$0xff]  }
 0xa19   :  { %v7031_v21 = vpop.f32.mrf.mxu0  ;;  %v6985_v4 = vpop.f32.mrf.mxu1 }
 0xa1a   :  { %v7037_v47 = vpack.c.bf16 %v7031_v21, %v7031_v21  ;;  %v6991_v10 = vpack.c.bf16 %v6985_v4, %v6985_v4 }
 0xa1b   :  { %v11069_v35 = vpop.f32.mrf.mxu0  ;;  %v11063_v9 = vpop.f32.mrf.mxu1 }
 0xa1c   :  { %7975 = vmatprep.mubr.bf16.mxu0 %v7037_v47  ;;  %v11689_v35 = vld [vmem:[%s14790_s12 + $0x238] sm:$0xff]   ;;  %v11690_v9 = vld [vmem:[%s14790_s12 + $0x1c0] sm:$0xff]  }
 0xa1d   :  { %v7034_v15 = vpop.f32.mrf.mxu0  ;;  %7976 = vmatmul.mubr.bf16.vlgmr.msra.gmra.mxu0 %v6991_v10  ;;  %v6988_v50 = vpop.f32.mrf.mxu1 }
 0xa1e   :  { %10409 = vmatpush3.bf16.msra.mxu0 %v11658_v28  ;;  %v11688_v28 = vld [vmem:[%s14790_s12 + $0x188] sm:$0xff]   ;;  %v11691_v50 = vld [vmem:[%s14790_s12 + $0x180] sm:$0xff]  }
 0xa1f   :  { %v11070_v46 = vpop.f32.mrf.mxu0  ;;  %v11064_v54 = vpop.f32.mrf.mxu1  ;;  %10410 = vmatprep.subr.bf16.mxu0 %v11660_v29 }
 0xa21   :  { %v7123_v13 = vpop.f32.mrf.mxu0  ;;  %v7077_v7 = vpop.f32.mrf.mxu1 }
 0xa22   :  { %v7129_v58 = vpack.c.bf16 %v7123_v13, %v7123_v13  ;;  %10411 = vmatpush3.bf16.msra.mxu0 %v11662_v43  ;;  %v7083_v56 = vpack.c.bf16 %v7077_v7, %v7077_v7  ;;  %v11692_v43 = vld [vmem:[%s14790_s12 + $0x230] sm:$0xff]   ;;  %v11694_v13 = vld [vmem:[%s14790_s12 + $0x220] sm:$0xff]   ;;  %v11695_v7 = vld [vmem:[%s14790_s12 + $0x218] sm:$0xff]  }
 0xa23   :  { %10412 = vmatprep.subr.bf16.mxu0 %v11663_v51  ;;  %v11081_v19 = vpop.f32.mrf.mxu0  ;;  %v11075_v5 = vpop.f32.mrf.mxu1  ;;  %v11693_v51 = vld [vmem:[%s14790_s12 + $0x228] sm:$0xff]  }
 0xa24   :  { %8015 = vmatprep.mubr.bf16.mxu1 %v7129_v58  ;;  %v11696_v58 = vld [vmem:[%s14790_s12 + $0x210] sm:$0xff]  }
 0xa25   :  { %8016 = vmatmul.mubr.bf16.vlgmr.msra.gmra.mxu1 %v7083_v56  ;;  %v7126_v27 = vpop.f32.mrf.mxu0  ;;  %v7080_v0 = vpop.f32.mrf.mxu1  ;;  %v11697_v56 = vld [vmem:[%s14790_s12 + $0x208] sm:$0xff]  }
 0xa26   :  { %10413 = vmatpush3.bf16.msra.mxu0 %v11665_v1  ;;  %10431 = vmatpush3.bf16.msra.mxu1 %v11666_v18  ;;  %v11698_v1 = vld [vmem:[%s14790_s12 + $0x200] sm:$0xff]  }
 0xa27   :  { %10414 = vmatprep.subr.bf16.mxu0 %v11667_v31  ;;  %10432 = vmatprep.subr.bf16.mxu1 %v11668_v48  ;;  %v11082_v44 = vpop.f32.mrf.mxu0  ;;  %v11076_v17 = vpop.f32.mrf.mxu1 }
 0xa29   :  { %v7215_v34 = vpop.f32.mrf.mxu0  ;;  %v7169_v16 = vpop.f32.mrf.mxu1 }
 0xa2a   :  { %10415 = vmatpush3.bf16.msra.mxu0 %v11669_v23  ;;  %10433 = vmatpush3.bf16.msra.mxu1 %v11670_v59  ;;  %v7221_v61 = vpack.c.bf16 %v7215_v34, %v7215_v34  ;;  %v7175_v47 = vpack.c.bf16 %v7169_v16, %v7169_v16 }
 0xa2b   :  { %10416 = vmatprep.subr.bf16.mxu0 %v11671_v45  ;;  %10434 = vmatprep.subr.bf16.mxu1 %v11672_v3  ;;  %v11093_v37 = vpop.f32.mrf.mxu0  ;;  %v11087_v6 = vpop.f32.mrf.mxu1 }
 0xa2c   :  { %8055 = vmatprep.mubr.bf16.mxu0 %v7221_v61 }
 0xa2d   :  { %v7218_v25 = vpop.f32.mrf.mxu0  ;;  %v7172_v2 = vpop.f32.mrf.mxu1 }
 0xa2e   :  { %10417 = vmatpush3.bf16.msra.mxu0 %v11673_v14  ;;  %10435 = vmatpush3.bf16.msra.mxu1 %v11674_v39 }
 0xa2f   :  { %10418 = vmatprep.subr.bf16.mxu0 %v11675_v49  ;;  %10436 = vmatprep.subr.bf16.mxu1 %v11676_v22  ;;  %v11094_v8 = vpop.f32.mrf.mxu0  ;;  %v11088_v62 = vpop.f32.mrf.mxu1  ;;  %v9095_v49 = vld [vmem:[%s14791_s13] ss:$0 sm:$0xff] }
 0xa31   :  { %v7307_v30 = vpop.f32.mrf.mxu0  ;;  %v7261_v42 = vpop.f32.mrf.mxu1 }
 0xa32   :  { %10419 = vmatpush3.bf16.msra.mxu0 %v11677_v11  ;;  %10437 = vmatpush3.bf16.msra.mxu1 %v11678_v55  ;;  %v7313_v53 = vpack.c.bf16 %v7307_v30, %v7307_v30  ;;  %v7267_v54 = vpack.c.bf16 %v7261_v42, %v7261_v42 }
 0xa33   :  { %10420 = vmatprep.subr.bf16.mxu0 %v11679_v52  ;;  %10438 = vmatprep.subr.bf16.mxu1 %v11680_v41  ;;  %v11099_v20 = vpop.f32.mrf.mxu1  ;;  %v11105_v12 = vpop.f32.mrf.mxu0 }
 0xa34   :  { %8095 = vmatprep.mubr.bf16.mxu1 %v7313_v53  ;;  %v8145_v53 = vld [vmem:[%s14793_s15] sm:$0x1]  ;;  %v9173_v20 = vld [vmem:[%s14793_s15 + $0x3] sm:$0x1] }
 0xa35   :  { %v7264_v63 = vpop.f32.mrf.mxu1  ;;  %v7310_v26 = vpop.f32.mrf.mxu0 }
 0xa36   :  { %10421 = vmatpush3.bf16.msra.mxu0 %v11681_v24  ;;  %10439 = vmatpush3.bf16.msra.mxu1 %v11682_v36 }
 0xa37   :  { %10422 = vmatprep.subr.bf16.mxu0 %v11683_v38  ;;  %10440 = vmatprep.subr.bf16.mxu1 %v11684_v57  ;;  %v11100_v21 = vpop.f32.mrf.mxu1  ;;  %v11106_v4 = vpop.f32.mrf.mxu0  ;;  %v9169_v38 = vld [vmem:[%s14793_s15 + $0x1] sm:$0x1]  ;;  %v9171_v57 = vld [vmem:[%s14793_s15 + $0x2] sm:$0x1]  ;;  %s11724_s15 = smov [#allocation2]  }
 0xa38   :  { %s8339_s19 = sshll.u32 %s11724_s15, 4  ;;  %s8340_s19 = int_to_ptr.vmem [resolvable:$true] %s8339_s19 }
 0xa39   :  { %v7353_v10 = vpop.f32.mrf.mxu1  ;;  %s11700_s20 = scalar_lea.vmem %s8340_s19, 32  ;;  %p11705_p1 = scmp.lt.s32.totalorder %s8340_s19, %s8340_s19 }
 0xa3a   :  { %10423 = vmatpush3.bf16.msra.mxu0 %v11685_v33  ;;  %10441 = vmatpush3.bf16.msra.mxu1 %v11686_v60  ;;  %v7359_v18 = vpack.c.bf16 %v7353_v10, %v7353_v10  ;;  %p11701_p0 = scmp.ne.s32.totalorder %s8340_s19, %s11700_s20  ;;  %p11706_p2 = scmp.lt.s32.totalorder %s11700_s20, %s11700_s20 }
 0xa3b   :  { %10442 = vmatprep.subr.bf16.mxu1 %v11687_v40  ;;  %11113 = vmatprep.subr.bf16.mxu0 %v11722_v32  ;;  %v11111_v29 = vpop.f32.mrf.mxu1 }
 0xa3c   :  { %p11707_p3 = por %p11706_p2, %p11705_p1 }
 0xa3d   :  { %8056 = vmatmul.mubr.bf16.vlgmr.msra.gmra.mxu0 %v7175_v47  ;;  %v7356_v15 = vpop.f32.mrf.mxu1 }
 0xa3e   :  { %10443 = vmatpush3.bf16.msra.mxu1 %v11688_v28  ;;  %11114 = vmatpush3.bf16.msra.mxu0 %v11689_v35  ;;  %p11708_p4 = pnand %p11707_p3, %p11701_p0 }
 0xa3f   :  { %10444 = vmatprep.subr.bf16.mxu1 %v11690_v9  ;;  %11115 = vmatprep.subr.bf16.mxu0 %v11722_v32  ;;  %v11112_v46 = vpop.f32.mrf.mxu1 }
 0xa40   :  { %11129 = vmatprep.mubr.msk.bf16.mxu0 %vm11723_vm2, %v11722_v32 }
 0xa42   :  { %10445 = vmatpush3.bf16.msra.mxu1 %v11691_v50  ;;  %11116 = vmatpush3.bf16.msra.mxu0 %v11692_v43 }
 0xa43   :  { %11117 = vmatprep.subr.bf16.mxu0 %v11722_v32  ;;  %11133 = vmatprep.subr.bf16.mxu1 %v11722_v32 }
 0xa45   :  { %8096 = vmatmul.mubr.bf16.vlgmr.msra.gmra.mxu1 %v7267_v54 }
 0xa46   :  { %11118 = vmatpush3.bf16.msra.mxu0 %v11693_v51  ;;  %11135 = vmatprep.mubr.msk.bf16.mxu1 %vm11723_vm2, %v11722_v32 }
 0xa47   :  { %11119 = vmatprep.subr.bf16.mxu0 %v11722_v32 }
 0xa4a   :  { %11120 = vmatpush3.bf16.msra.mxu0 %v11694_v13 }
 0xa4b   :  { %11121 = vmatprep.subr.bf16.mxu0 %v11722_v32 }
 0xa4e   :  { %11122 = vmatpush3.bf16.msra.mxu0 %v11695_v7 }
 0xa4f   :  { %11123 = vmatprep.subr.bf16.mxu0 %v11722_v32 }
 0xa52   :  { %11124 = vmatpush3.bf16.msra.mxu0 %v11696_v58 }
 0xa53   :  { %11125 = vmatprep.subr.bf16.mxu0 %v11722_v32 }
 0xa56   :  { %11126 = vmatpush3.bf16.msra.mxu0 %v11697_v56 }
 0xa57   :  { %11127 = vmatprep.subr.bf16.mxu0 %v11722_v32 }
 0xa5a   :  { %11128 = vmatpush3.bf16.msra.mxu0 %v11698_v1 }
 0xa5d   :  { %11130 = vmatmul.mubr.bf16.vlgmr.msra.gmra.mxu0 %v7359_v18 }
 0xadd   :  { %v10380_v31 = vpop.f32.mrf.mxu0 }
 0xadf   :  { %v10381_v48 = vpop.f32.mrf.mxu0 }
 0xae0   :  { %v10382_v61 = vadd.f32 %v10381_v48, %v10380_v31 }
 0xae1   :  { %v10383_v19 = vpop.f32.mrf.mxu0 }
 0xae2   :  { %v7978_v37 = vadd.f32 %v10382_v61, %v9095_v49 }
 0xae3   :  { %v10384_v5 = vpop.f32.mrf.mxu0 }
 0xae5   :  { %v10402_v27 = vpop.f32.mrf.mxu1 }
 0xae7   :  { %v10403_v0 = vpop.f32.mrf.mxu1 }
 0xae8   :  { %v10404_v22 = vadd.f32 %v10403_v0, %v10402_v27 }
 0xae9   :  { %v10405_v23 = vpop.f32.mrf.mxu1 }
 0xaea   :  { %v8018_v25 = vadd.f32 %v10404_v22, %v7978_v37 }
 0xaeb   :  { %v10406_v59 = vpop.f32.mrf.mxu1 }
 0xafd   :  { %v10424_v45 = vpop.f32.mrf.mxu0 }
 0xaff   :  { %v10425_v3 = vpop.f32.mrf.mxu0 }
 0xb00   :  { %v10426_v6 = vadd.f32 %v10425_v3, %v10424_v45 }
 0xb01   :  { %v10427_v44 = vpop.f32.mrf.mxu0 }
 0xb02   :  { %v8058_v11 = vadd.f32 %v10426_v6, %v8018_v25 }
 0xb03   :  { %v10428_v17 = vpop.f32.mrf.mxu0 }
 0xb05   :  { %v10446_v34 = vpop.f32.mrf.mxu1 }
 0xb07   :  { %v10447_v16 = vpop.f32.mrf.mxu1 }
 0xb08   :  { %v10448_v2 = vadd.f32 %v10447_v16, %v10446_v34 }
 0xb09   :  { %v10449_v14 = vpop.f32.mrf.mxu1 }
 0xb0a   :  { %v8098_v55 = vadd.f32 %v10448_v2, %v8058_v11 }
 0xb0b   :  { %v10450_v39 = vpop.f32.mrf.mxu1 }
 0xb1d   :  { %v8137_v52 = vpop.f32.mrf.mxu0 }
 0xb1e   :  { %v8138_v41 = vadd.f32 %v8137_v52, %v8098_v55 }
 0xb1f   :  { %v11131_v8 = vpop.f32.mrf.mxu0 }
 0xb20   :  { %v8143_v62 = vmax.f32 %v8138_v41, 0.0 }
 0xb21   :  { %v8140_v30 = vpop.f32.mrf.mxu0 }
 0xb22   :  { %v8144_v42 = vpack.c.bf16 %v8143_v62, %v8143_v62 }
 0xb23   :  { %v11132_v24 = vpop.f32.mrf.mxu0 }
 0xb24   :  { %v8150_v36 = vsel %vm6947_vm3, %v8144_v42, 0 }
 0xb25   :  { %11134 = vmatpush3.bf16.msra.mxu1 %v8150_v36 }
 0xb26   :  { %11139 = vmatprep.subr.bf16.mxu1 %v11722_v32 }
 0xb28   :  { %11136 = vmatmul.mubr.msk.bf16.vlgmr.msra.gmra.mxu1 %vm6943_vm4, %v8145_v53 }
 0xb29   :  { %11140 = vmatpush3.bf16.msra.mxu1 %v8150_v36  ;;  %11141 = vmatprep.mubr.msk.bf16.mxu1 %vm11723_vm2, %v11722_v32 }
 0xb2a   :  { %11145 = vmatprep.subr.bf16.mxu1 %v11722_v32 }
 0xb30   :  { %11142 = vmatmul.mubr.msk.bf16.vlgmr.msra.gmra.mxu1 %vm6943_vm4, %v9169_v38 }
 0xb31   :  { %11146 = vmatpush3.bf16.msra.mxu1 %v8150_v36  ;;  %11147 = vmatprep.mubr.msk.bf16.mxu1 %vm11723_vm2, %v11722_v32 }
 0xb32   :  { %11151 = vmatprep.subr.bf16.mxu1 %v11722_v32 }
 0xb38   :  { %11148 = vmatmul.mubr.msk.bf16.vlgmr.msra.gmra.mxu1 %vm6943_vm4, %v9171_v57 }
 0xb39   :  { %11152 = vmatpush3.bf16.msra.mxu1 %v8150_v36  ;;  %11153 = vmatprep.mubr.msk.bf16.mxu1 %vm11723_vm2, %v11722_v32 }
 0xb40   :  { %11154 = vmatmul.mubr.msk.bf16.vlgmr.msra.gmra.mxu1 %vm6943_vm4, %v9173_v20 }
 0xbe8   :  { %v8186_v12 = vpop.f32.mrf.mxu1 }
 0xbea   :  { %v11137_v63 = vpop.f32.mrf.mxu1 }
 0xbec   :  { %v8189_v26 = vpop.f32.mrf.mxu1 }
 0xbee   :  { %v11138_v33 = vpop.f32.mrf.mxu1 }
 0xbf0   :  { %v8231_v60 = vpop.f32.mrf.mxu1 }
 0xbf1   :  { %v8237_v35 = vmax.f32 %v8186_v12, %v8231_v60 }
 0xbf2   :  { %v11143_v40 = vpop.f32.mrf.mxu1 }
 0xbf4   :  { %v8234_v21 = vpop.f32.mrf.mxu1 }
 0xbf6   :  { %v11144_v4 = vpop.f32.mrf.mxu1 }
 0xbf8   :  { %v8277_v47 = vpop.f32.mrf.mxu1 }
 0xbf9   :  { %v8283_v32 = vmax.f32 %v8237_v35, %v8277_v47 }
 0xbfa   :  { %v11149_v10 = vpop.f32.mrf.mxu1 }
 0xbfc   :  { %v8280_v28 = vpop.f32.mrf.mxu1 }
 0xbfe   :  { %v11150_v9 = vpop.f32.mrf.mxu1 }
 0xc00   :  { %v8323_v29 = vpop.f32.mrf.mxu1 }
 0xc01   :  { %v8329_v15 = vmax.f32 %v8283_v32, %v8323_v29 }
 0xc02   :  { %v11155_v50 = vpop.f32.mrf.mxu1 }
 0xc03   :  { %v8330_v43 = vpack.c.bf16 %v8329_v15, %v8329_v15 }
 0xc04   :  { %v8326_v46 = vpop.f32.mrf.mxu1 }
 0xc05   :  { %v8331_v54 = vunpack.c.l.bf16 %v8330_v43 }
 0xc06   :  { %v11156_v51 = vpop.f32.mrf.mxu1 }
 0xc07   :  { %8332 = vst [vmem:[#allocation2] sm:$0x3] %v8331_v54 }
 0xc08   :  { %11711 = shalt.err (!%p11708_p4)
}
 0xc09   :  { %8342 = dma.vmem_to_hbm [thread:$0]  %s8340_s19, 32, %s14794_s16, [#allocation3]  }
 0xc0a   :  { %11720 = dma.done.wait [#allocation3], 32  }
 0xc0b   :  { %11721 = vsyncadd [#allocation3], 4294967264 }
 0xc0c   :  { %8346 = vsyncpa [#allocation3], 1 }

</bundles_post_ra>
